<compile_context>
chip_gen: v5e
topology: v5e:2x2
jax: 0.10.0
libtpu: 0.0.40
codegen_flags: <defaults>
</compile_context>

<pallas_src>
import math

import jax
import jax.numpy as jnp
from jax import lax
from jax.experimental import pallas as pl
from jax.experimental.pallas import tpu as pltpu


_SCAN_GROUP = 8        # time steps per scan group == one f32 sublane tile
_SCAN_LANE_TILE = 512  # d_inner lane tile for the scan (caps live vregs)


# ----------------------------------------------------------------------------
# Pallas kernel: one ResidualBlock (RMSNorm -> MambaBlock -> residual add),
# processed one (batch, time-chunk) tile per grid step.
# ----------------------------------------------------------------------------
def mamba_layer_kernel(x_ref, nw_ref, winx_ref, winz_ref, wconv_ref, bconv_ref,
                       wdl_ref, bdt_ref, wbc_ref, alT_ref, dp_ref, wout_ref,
                       o_ref,
                       dlt_s, dx_s, xs_s, bc_s, y_s, h_s, tail_s):
    chunk_id = pl.program_id(1)
    CH = x_ref.shape[1]
    d_inner = winx_ref.shape[1]
    N = alT_ref.shape[0]
    K = wconv_ref.shape[0]
    G = _SCAN_GROUP
    n_groups = CH // G

    # Reset per-sequence carries at the first time-chunk of each batch element.
    @pl.when(chunk_id == 0)
    def _():
        h_s[...] = jnp.zeros_like(h_s)
        tail_s[...] = jnp.zeros_like(tail_s)

    x = x_ref[0].astype(jnp.float32)                      # (CH, dim)

    # ---- RMSNorm -------------------------------------------------------------
    ms = jnp.mean(x * x, axis=-1, keepdims=True)
    xn_b = (x * lax.rsqrt(ms + 1e-5) * nw_ref[...]).astype(winx_ref.dtype)

    # ---- in_proj, x branch only (z branch computed after the scan) ------------
    xc = jnp.dot(xn_b, winx_ref[...], preferred_element_type=jnp.float32)

    # ---- causal depthwise conv over time --------------------------------------
    # tail_s carries the last K-1 in_proj rows of the previous chunk.
    # TODO(synk): the concat materializes a (CH+K-1, d_inner) temp; XLU/VMEM is
    # not the bottleneck here after the scratch removals, so keep it simple.
    xp = jnp.concatenate([tail_s[...], xc], axis=0)       # (CH+K-1, d_inner)
    acc = wconv_ref[0:1, :] * xp[0:CH, :]
    for k in range(1, K):                                  # static unroll, K=4
        acc = acc + wconv_ref[k:k + 1, :] * xp[k:k + CH, :]
    tail_s[...] = xc[CH - (K - 1):, :]                     # carry for next chunk
    conv = acc + bconv_ref[...]
    xs = conv * jax.nn.sigmoid(conv)                       # SiLU, (CH, d_inner)
    xs_s[...] = xs
    xs_b = xs.astype(wdl_ref.dtype)

    # ---- x_proj: delta (dt_proj folded offline) + fused [B|C] matmul ----------
    pre = jnp.dot(xs_b, wdl_ref[...], preferred_element_type=jnp.float32) \
        + bdt_ref[...]                                     # (CH, d_inner)
    # numerically-stable softplus
    delta = jnp.maximum(pre, 0.0) + jnp.log1p(jnp.exp(-jnp.abs(pre)))
    dlt_s[...] = delta
    dx_s[...] = delta * xs
    bc_s[...] = jnp.dot(xs_b, wbc_ref[...],
                        preferred_element_type=jnp.float32)   # (CH, 2N)

    # ---- sequential selective scan ---------------------------------------------
    # * dA/dBx are built per step in registers (EUP exp + VPU broadcasts):
    #   no (CH, N, d_inner) scratches, no VMEM round trip.
    # * y is emitted per group of G=8 rows with one unmasked (G, d_inner) store:
    #   no per-step masked vst, no per-step M=1 MXU dots (C-reduce = VPU mul +
    #   sublane reduce on the otherwise-idle XLU).
    # * h is carried as a fori_loop value (vregs) within a chunk and across
    #   chunks through the small (N, d_inner) h_s scratch.
    # * d_inner is processed in <= _SCAN_LANE_TILE lane tiles so live vregs
    #   stay bounded at real model widths.
    if d_inner > _SCAN_LANE_TILE and d_inner % _SCAN_LANE_TILE == 0:
        DT = _SCAN_LANE_TILE
    else:
        DT = d_inner

    for d0 in range(0, d_inner, DT):
        dsl = slice(d0, d0 + DT)
        a_tile = -jnp.exp(alT_ref[:, dsl])                 # (N, DT)

        def group_body(g, h, dsl=dsl, a_tile=a_tile):
            base = pl.multiple_of(g * G, G)
            dlt_g = dlt_s[pl.ds(base, G), dsl]             # (G, DT)
            dx_g = dx_s[pl.ds(base, G), dsl]               # (G, DT)
            bc_g = bc_s[pl.ds(base, G), :]                 # (G, 2N)
            b_col = bc_g[:, 0:N][:, :, None]               # (G, N, 1): N->sublanes
            c_col = bc_g[:, N:2 * N][:, :, None]           # (G, N, 1)
            rows = []
            for t in range(G):                             # static unroll
                dA_t = jnp.exp(dlt_g[t:t + 1, :] * a_tile)          # (N, DT) EUP
                h = dA_t * h + b_col[t] * dx_g[t:t + 1, :]          # (N, DT) VPU
                rows.append(jnp.sum(c_col[t] * h, axis=0, keepdims=True))  # XLU
            y_s[pl.ds(base, G), dsl] = jnp.concatenate(rows, axis=0)
            return h

        h_s[:, dsl] = lax.fori_loop(0, n_groups, group_body, h_s[:, dsl])

    y = y_s[...] + dp_ref[...] * xs_s[...]                 # (CH, d_inner)

    # ---- gate branch (z), out_proj, residual -----------------------------------
    # xn is recomputed (cheap, bit-identical) instead of keeping xn/z live
    # across the scan.
    x2 = x_ref[0].astype(jnp.float32)
    ms2 = jnp.mean(x2 * x2, axis=-1, keepdims=True)
    xn2_b = (x2 * lax.rsqrt(ms2 + 1e-5) * nw_ref[...]).astype(winz_ref.dtype)
    z = jnp.dot(xn2_b, winz_ref[...], preferred_element_type=jnp.float32)
    zz = z * jax.nn.sigmoid(z)
    out = jnp.dot((y * zz).astype(wout_ref.dtype), wout_ref[...],
                  preferred_element_type=jnp.float32)
    o_ref[0] = (x2 + out).astype(o_ref.dtype)


# ----------------------------------------------------------------------------
# Wrapper for one layer
# ----------------------------------------------------------------------------
PARAM_ORDER = ("norm_w", "w_in_x", "w_in_z", "w_conv", "b_conv", "w_delta",
               "b_dt", "w_bc", "A_logT", "D", "w_out")


def _vmem_capacity_bytes():
    try:
        return int(pltpu.get_tpu_info().vmem_capacity_bytes)
    except Exception:
        return 128 * 1024 * 1024


def _vmem_budget_bytes():
    cap = _vmem_capacity_bytes()
    if cap >= 96 * 1024 * 1024:          # v5e / v6e: 128 MiB physical
        return 100 * 1024 * 1024
    return 48 * 1024 * 1024              # v7x: 64 MiB physical -> keep headroom


def _default_chunk(L):
    # 256 rows feed the 256-row MXU (v6e) and amortize per-grid-step overhead;
    # stay at 128 on 64 MiB parts (v7x) to leave room for resident weights.
    target = 256 if _vmem_capacity_bytes() >= 96 * 1024 * 1024 else 128
    return L if L <= target else target


def mamba_layer(x, kp, *, chunk=None):
    B, L, DIM = x.shape
    d_inner = kp["w_in_x"].shape[1]
    N = kp["A_logT"].shape[0]
    K = kp["w_conv"].shape[0]

    if chunk is None:
        chunk = _default_chunk(L)
    assert L % chunk == 0, "sequence length must be a multiple of the time chunk"
    assert chunk % _SCAN_GROUP == 0, "time chunk must be a multiple of 8"
    assert chunk >= K

    weights = [kp[k] for k in PARAM_ORDER]

    def _run(single_buffer_weights):
        wspecs = []
        for w in weights:
            idx = (lambda b, c, _nd=w.ndim: (0,) * _nd)
            if single_buffer_weights:
                # Constant-index weight blocks do not need double buffering;
                # halves their VMEM footprint (critical for v7x / large d_inner).
                spec = pl.BlockSpec(w.shape, idx, pipeline_mode=pl.Buffered(1))
            else:
                spec = pl.BlockSpec(w.shape, idx)
            wspecs.append(spec)

        in_specs = [pl.BlockSpec((1, chunk, DIM), lambda b, c: (b, c, 0))] + wspecs

        return pl.pallas_call(
            mamba_layer_kernel,
            out_shape=jax.ShapeDtypeStruct((B, L, DIM), jnp.float32),
            grid=(B, L // chunk),
            in_specs=in_specs,
            out_specs=pl.BlockSpec((1, chunk, DIM), lambda b, c: (b, c, 0)),
            scratch_shapes=[
                pltpu.VMEM((chunk, d_inner), jnp.float32),   # delta
                pltpu.VMEM((chunk, d_inner), jnp.float32),   # delta * xs
                pltpu.VMEM((chunk, d_inner), jnp.float32),   # xs (conv + SiLU)
                pltpu.VMEM((chunk, 2 * N), jnp.float32),     # [B | C]
                pltpu.VMEM((chunk, d_inner), jnp.float32),   # y
                pltpu.VMEM((N, d_inner), jnp.float32),       # h carried across chunks
                pltpu.VMEM((K - 1, d_inner), jnp.float32),   # conv tail carried
            ],
            compiler_params=pltpu.CompilerParams(
                # Batch axis is 'parallel' (megacore / v7x 2-TC split); keep
                # B >= 2 on v7x, the chunk axis carries state and is 'arbitrary'.
                dimension_semantics=("parallel", "arbitrary"),
                vmem_limit_bytes=_vmem_budget_bytes()),
        )(x, *weights)

    if hasattr(pl, "Buffered"):
        try:
            return _run(True)
        except Exception:
            pass  # fall back to default double-buffered weight pipelining
    return _run(False)


def mamba_forward(x, layer_params, *, chunk=None):
    for p in layer_params:
        x = mamba_layer(x, p, chunk=chunk)
    return x


# ----------------------------------------------------------------------------
# Parameter init (mirrors MambaBlock.__init__) + conversion to kernel form
# ----------------------------------------------------------------------------
def init_layer_params(key, dim, d_inner, d_state, d_conv, dt_rank,
                      dt_min=0.001, dt_max=0.1, dt_scale=1.0,
                      dt_init_floor=1e-4):
    ks = jax.random.split(key, 7)
    u = lambda k, shp, b: jax.random.uniform(k, shp, jnp.float32, -b, b)

    norm_w = jnp.ones((1, dim), jnp.float32)
    w_in = u(ks[0], (dim, 2 * d_inner), 1.0 / math.sqrt(dim))
    w_conv = u(ks[1], (d_conv, d_inner), 1.0 / math.sqrt(d_conv))
    b_conv = u(ks[2], (1, d_inner), 1.0 / math.sqrt(d_conv))
    w_x = u(ks[3], (d_inner, dt_rank + 2 * d_state), 1.0 / math.sqrt(d_inner))

    dt_init_std = dt_rank ** (-0.5) * dt_scale
    w_dt = u(ks[4], (dt_rank, d_inner), dt_init_std)
    dt = jnp.exp(jax.random.uniform(ks[5], (d_inner,), jnp.float32)
                 * (math.log(dt_max) - math.log(dt_min)) + math.log(dt_min))
    dt = jnp.maximum(dt, dt_init_floor)
    b_dt = (dt + jnp.log(-jnp.expm1(-dt))).reshape(1, d_inner)

    A = jnp.tile(jnp.arange(1, d_state + 1, dtype=jnp.float32)[None, :],
                 (d_inner, 1))
    A_log = jnp.log(A)
    D = jnp.ones((1, d_inner), jnp.float32)
    w_out = u(ks[6], (d_inner, dim), 1.0 / math.sqrt(d_inner))

    return dict(norm_w=norm_w, w_in=w_in, w_conv=w_conv, b_conv=b_conv,
                w_x=w_x, w_dt=w_dt, b_dt=b_dt, A_log=A_log, D=D, w_out=w_out)


def prepare_layer_params(p, matmul_dtype=jnp.bfloat16):
    """Torch-form params -> kernel form (fused dt_proj, fused B|C, bf16 weights)."""
    d_inner = p["w_in"].shape[1] // 2
    R = p["w_dt"].shape[0]
    N = p["A_log"].shape[1]
    w_delta = p["w_x"][:, :R] @ p["w_dt"]                  # (d_inner, d_inner)
    return dict(
        norm_w=p["norm_w"],
        w_in_x=p["w_in"][:, :d_inner].astype(matmul_dtype),
        w_in_z=p["w_in"][:, d_inner:].astype(matmul_dtype),
        w_conv=p["w_conv"], b_conv=p["b_conv"],
        w_delta=w_delta.astype(matmul_dtype), b_dt=p["b_dt"],
        w_bc=p["w_x"][:, R:R + 2 * N].astype(matmul_dtype),   # [B | C]
        A_logT=p["A_log"].T,                               # (N, d_inner)
        D=p["D"],
        w_out=p["w_out"].astype(matmul_dtype),
    )


# ----------------------------------------------------------------------------
# Pure-JAX references
# ----------------------------------------------------------------------------
def _scan_ssm(dA, dBx):
    """dA, dBx: (B, L, d_inner, N) -> hs (B, L, d_inner, N)."""
    def fn(h, inp):
        a, bx = inp
        h = a * h + bx
        return h, h
    B = dA.shape[0]
    h0 = jnp.zeros((B,) + dA.shape[2:], jnp.float32)
    _, hs = lax.scan(fn, h0, (jnp.moveaxis(dA, 1, 0), jnp.moveaxis(dBx, 1, 0)))
    return jnp.moveaxis(hs, 0, 1)


def ref_layer_kernelmath(x, kp):
    """Same math as the Pallas kernel (bf16 matmul operands, fused dt_proj/B|C)."""
    B, L, DIM = x.shape
    K = kp["w_conv"].shape[0]
    N = kp["A_logT"].shape[0]
    md = kp["w_in_x"].dtype

    ms = jnp.mean(x * x, axis=-1, keepdims=True)
    xn = (x * lax.rsqrt(ms + 1e-5) * kp["norm_w"][0]).astype(md)
    xc = jnp.dot(xn, kp["w_in_x"], preferred_element_type=jnp.float32)
    z = jnp.dot(xn, kp["w_in_z"], preferred_element_type=jnp.float32)

    xp = jnp.pad(xc, ((0, 0), (K - 1, 0), (0, 0)))
    acc = kp["w_conv"][0][None, None, :] * xp[:, 0:L, :]
    for k in range(1, K):
        acc = acc + kp["w_conv"][k][None, None, :] * xp[:, k:k + L, :]
    conv = acc + kp["b_conv"][0]
    xs = conv * jax.nn.sigmoid(conv)
    xs_m = xs.astype(md)

    pre = jnp.dot(xs_m, kp["w_delta"], preferred_element_type=jnp.float32) \
        + kp["b_dt"][0]
    delta = jnp.maximum(pre, 0.0) + jnp.log1p(jnp.exp(-jnp.abs(pre)))
    BC = jnp.dot(xs_m, kp["w_bc"], preferred_element_type=jnp.float32)
    Bm, Cm = BC[..., :N], BC[..., N:]

    A = -jnp.exp(kp["A_logT"].T)                           # (d_inner, N)
    dA = jnp.exp(delta[..., None] * A)
    dBx = (delta * xs)[..., None] * Bm[:, :, None, :]
    hs = _scan_ssm(dA, dBx)
    y = jnp.sum(hs * Cm[:, :, None, :], axis=-1) + kp["D"][0] * xs

    zz = z * jax.nn.sigmoid(z)
    out = jnp.dot((y * zz).astype(md), kp["w_out"],
                  preferred_element_type=jnp.float32)
    return x + out


def ref_layer_fp32(x, p):
    """Original fp32, unfused MambaBlock math (matches the PyTorch module)."""
    B, L, DIM = x.shape
    d_inner = p["w_in"].shape[1] // 2
    N = p["A_log"].shape[1]
    K = p["w_conv"].shape[0]
    R = p["w_dt"].shape[0]

    ms = jnp.mean(x * x, axis=-1, keepdims=True)
    xn = x * lax.rsqrt(ms + 1e-5) * p["norm_w"][0]
    xz = xn @ p["w_in"]
    xc, z = xz[..., :d_inner], xz[..., d_inner:]

    xp = jnp.pad(xc, ((0, 0), (K - 1, 0), (0, 0)))
    acc = p["w_conv"][0][None, None, :] * xp[:, 0:L, :]
    for k in range(1, K):
        acc = acc + p["w_conv"][k][None, None, :] * xp[:, k:k + L, :]
    conv = acc + p["b_conv"][0]
    xs = conv * jax.nn.sigmoid(conv)

    dbc = xs @ p["w_x"]
    dlt_r, Bm, Cm = dbc[..., :R], dbc[..., R:R + N], dbc[..., R + N:]
    pre = dlt_r @ p["w_dt"] + p["b_dt"][0]
    delta = jnp.maximum(pre, 0.0) + jnp.log1p(jnp.exp(-jnp.abs(pre)))

    A = -jnp.exp(p["A_log"])
    dA = jnp.exp(delta[..., None] * A)
    dBx = (delta * xs)[..., None] * Bm[:, :, None, :]
    hs = _scan_ssm(dA, dBx)
    y = jnp.sum(hs * Cm[:, :, None, :], axis=-1) + p["D"][0] * xs
    zz = z * jax.nn.sigmoid(z)
    return x + (y * zz) @ p["w_out"]


def ref_forward(x, params, layer_fn):
    for p in params:
        x = layer_fn(x, p)
    return x


# ----------------------------------------------------------------------------
if __name__ == "__main__":
    # Small config: dim=32, depth=2 -> d_inner=64, dt_rank=2, d_state=16, d_conv=4
    B, L, DIM, DEPTH = 2, 8, 32, 2
    D_STATE, D_CONV = 16, 4
    D_INNER = 2 * DIM
    DT_RANK = math.ceil(DIM / 16)

    root = jax.random.PRNGKey(0)
    kx, *layer_keys = jax.random.split(root, DEPTH + 1)

    x = jax.random.normal(kx, (B, L, DIM), jnp.float32)
    raw_params = [init_layer_params(k, DIM, D_INNER, D_STATE, D_CONV, DT_RANK)
                  for k in layer_keys]
    kernel_params = [prepare_layer_params(p) for p in raw_params]

    out = jax.block_until_ready(mamba_forward(x, kernel_params))
    assert out.shape == (B, L, DIM)

    # Check 1: pure-JAX reference doing the exact same math
    # (bf16 matmul operands, f32 accumulation, fused dt_proj and B|C).
    ref_same = jax.block_until_ready(
        ref_forward(x, kernel_params, ref_layer_kernelmath))
    err_same = float(jnp.max(jnp.abs(out - ref_same)))
    assert jnp.allclose(out, ref_same, rtol=1e-2, atol=2e-3), (
        f"kernel vs matched reference: max abs diff {err_same}")

    # Check 2 (loose): original fp32 unfused module math — the only difference
    # is bf16 rounding of matmul operands.
    ref_f32 = jax.block_until_ready(ref_forward(x, raw_params, ref_layer_fp32))
    err_f32 = float(jnp.max(jnp.abs(out - ref_f32)))
    assert err_f32 < 0.1, f"kernel (bf16 matmuls) vs fp32 reference: {err_f32}"

    print("KERNEL_OK")
</pallas_src>

<mosaic_0001>
module attributes {stable_mosaic.version = 11 : i64} {
  func.func @mamba_layer_kernel(%arg0: i32, %arg1: i32, %arg2: memref<1x8x32xf32, #tpu.memory_space<vmem>>, %arg3: memref<1x32xf32, #tpu.memory_space<vmem>>, %arg4: memref<32x64xbf16, #tpu.memory_space<vmem>>, %arg5: memref<32x64xbf16, #tpu.memory_space<vmem>>, %arg6: memref<4x64xf32, #tpu.memory_space<vmem>>, %arg7: memref<1x64xf32, #tpu.memory_space<vmem>>, %arg8: memref<64x64xbf16, #tpu.memory_space<vmem>>, %arg9: memref<1x64xf32, #tpu.memory_space<vmem>>, %arg10: memref<64x32xbf16, #tpu.memory_space<vmem>>, %arg11: memref<16x64xf32, #tpu.memory_space<vmem>>, %arg12: memref<1x64xf32, #tpu.memory_space<vmem>>, %arg13: memref<64x32xbf16, #tpu.memory_space<vmem>>, %arg14: memref<1x8x32xf32, #tpu.memory_space<vmem>>, %arg15: memref<8x64xf32, #tpu.memory_space<vmem>>, %arg16: memref<8x64xf32, #tpu.memory_space<vmem>>, %arg17: memref<8x64xf32, #tpu.memory_space<vmem>>, %arg18: memref<8x32xf32, #tpu.memory_space<vmem>>, %arg19: memref<8x64xf32, #tpu.memory_space<vmem>>, %arg20: memref<16x64xf32, #tpu.memory_space<vmem>>, %arg21: memref<3x64xf32, #tpu.memory_space<vmem>>) attributes {dimension_semantics = [#tpu.dimension_semantics<parallel>, #tpu.dimension_semantics<arbitrary>], iteration_bounds = array<i64: 2, 1>, scalar_prefetch = 0 : i64, scratch_operands = 7 : i64, tpu.core_type = #tpu.core_type<tc>, window_params = [{transform_indices = @transform_0, window_bounds = array<i64: 1, 8, 32>}, {pipeline_mode = #tpu.pipeline_mode<synchronous>, transform_indices = @transform_1, window_bounds = array<i64: 1, 32>}, {pipeline_mode = #tpu.pipeline_mode<synchronous>, transform_indices = @transform_2, window_bounds = array<i64: 32, 64>}, {pipeline_mode = #tpu.pipeline_mode<synchronous>, transform_indices = @transform_3, window_bounds = array<i64: 32, 64>}, {pipeline_mode = #tpu.pipeline_mode<synchronous>, transform_indices = @transform_4, window_bounds = array<i64: 4, 64>}, {pipeline_mode = #tpu.pipeline_mode<synchronous>, transform_indices = @transform_5, window_bounds = array<i64: 1, 64>}, {pipeline_mode = #tpu.pipeline_mode<synchronous>, transform_indices = @transform_6, window_bounds = array<i64: 64, 64>}, {pipeline_mode = #tpu.pipeline_mode<synchronous>, transform_indices = @transform_7, window_bounds = array<i64: 1, 64>}, {pipeline_mode = #tpu.pipeline_mode<synchronous>, transform_indices = @transform_8, window_bounds = array<i64: 64, 32>}, {pipeline_mode = #tpu.pipeline_mode<synchronous>, transform_indices = @transform_9, window_bounds = array<i64: 16, 64>}, {pipeline_mode = #tpu.pipeline_mode<synchronous>, transform_indices = @transform_10, window_bounds = array<i64: 1, 64>}, {pipeline_mode = #tpu.pipeline_mode<synchronous>, transform_indices = @transform_11, window_bounds = array<i64: 64, 32>}, {transform_indices = @transform_12, window_bounds = array<i64: 1, 8, 32>}]} {
    %c0_i32 = arith.constant 0 : i32
    %0 = arith.cmpi eq, %arg1, %c0_i32 : i32
    %1 = arith.extui %0 : i1 to i32
    %c0_i32_0 = arith.constant 0 : i32
    %2 = arith.cmpi ne, %1, %c0_i32_0 : i32
    scf.if %2 {
      %cst_84 = arith.constant 0.000000e+00 : f32
      %277 = vector.broadcast %cst_84 : f32 to vector<16x64xf32>
      %c0_85 = arith.constant 0 : index
      %c0_86 = arith.constant 0 : index
      %278 = vector.load %arg20[%c0_85, %c0_86] : memref<16x64xf32, #tpu.memory_space<vmem>>, vector<16x64xf32>
      tpu.vector_store %arg20[%c0_85, %c0_86], %277 {strides = array<i32>} : memref<16x64xf32, #tpu.memory_space<vmem>>, vector<16x64xf32>,
      %cst_87 = arith.constant 0.000000e+00 : f32
      %279 = vector.broadcast %cst_87 : f32 to vector<3x64xf32>
      %c0_88 = arith.constant 0 : index
      %c0_89 = arith.constant 0 : index
      %280 = vector.load %arg21[%c0_88, %c0_89] : memref<3x64xf32, #tpu.memory_space<vmem>>, vector<3x64xf32>
      tpu.vector_store %arg21[%c0_88, %c0_89], %279 {strides = array<i32>} : memref<3x64xf32, #tpu.memory_space<vmem>>, vector<3x64xf32>,
    } else {
    }
    %c0 = arith.constant 0 : index
    %c0_1 = arith.constant 0 : index
    %c0_2 = arith.constant 0 : index
    %3 = vector.load %arg2[%c0, %c0_1, %c0_2] : memref<1x8x32xf32, #tpu.memory_space<vmem>>, vector<1x8x32xf32>
    %4 = vector.shape_cast %3 : vector<1x8x32xf32> to vector<8x32xf32>
    %5 = arith.mulf %4, %4 : vector<8x32xf32>
    %cst = arith.constant dense<0.000000e+00> : vector<8xf32>
    %6 = vector.multi_reduction <add>, %5, %cst [1] : vector<8x32xf32> to vector<8xf32>
    %7 = vector.shape_cast %6 : vector<8xf32> to vector<8x1xf32>
    %cst_3 = arith.constant 3.200000e+01 : f32
    %8 = vector.broadcast %cst_3 : f32 to vector<8x1xf32>
    %9 = arith.divf %7, %8 : vector<8x1xf32>
    %cst_4 = arith.constant 9.99999974E-6 : f32
    %10 = vector.broadcast %cst_4 : f32 to vector<8x1xf32>
    %11 = arith.addf %9, %10 : vector<8x1xf32>
    %12 = math.rsqrt %11 : vector<8x1xf32>
    %13 = vector.broadcast %12 : vector<8x1xf32> to vector<8x32xf32>
    %14 = arith.mulf %4, %13 : vector<8x32xf32>
    %c0_5 = arith.constant 0 : index
    %c0_6 = arith.constant 0 : index
    %15 = vector.load %arg3[%c0_5, %c0_6] : memref<1x32xf32, #tpu.memory_space<vmem>>, vector<1x32xf32>
    %16 = vector.broadcast %15 : vector<1x32xf32> to vector<8x32xf32>
    %17 = arith.mulf %14, %16 : vector<8x32xf32>
    %18 = arith.truncf %17 : vector<8x32xf32> to vector<8x32xbf16>
    %c0_7 = arith.constant 0 : index
    %c0_8 = arith.constant 0 : index
    %19 = vector.load %arg4[%c0_7, %c0_8] : memref<32x64xbf16, #tpu.memory_space<vmem>>, vector<32x64xbf16>
    %cst_9 = arith.constant dense<0.000000e+00> : vector<8x64xf32>
    %20 = tpu.matmul %18, %19, %cst_9 {dimension_numbers = #tpu.dot_dimension_numbers<[1], [0], [0], [1], [0, 0, 1, 1], [], []>} : vector<8x32xbf16>, vector<32x64xbf16>, vector<8x64xf32> -> vector<8x64xf32>
    %c0_10 = arith.constant 0 : index
    %c0_11 = arith.constant 0 : index
    %21 = vector.load %arg21[%c0_10, %c0_11] : memref<3x64xf32, #tpu.memory_space<vmem>>, vector<3x64xf32>
    %22 = tpu.concatenate %21, %20 in 0 : vector<3x64xf32>, vector<8x64xf32> -> vector<11x64xf32>
    %c0_12 = arith.constant 0 : index
    %c0_13 = arith.constant 0 : index
    %23 = vector.load %arg6[%c0_12, %c0_13] : memref<4x64xf32, #tpu.memory_space<vmem>>, vector<1x64xf32>
    %24 = vector.extract_strided_slice %22 {offsets = [0, 0], sizes = [8, 64], strides = [1, 1]} : vector<11x64xf32> to vector<8x64xf32>
    %25 = vector.broadcast %23 : vector<1x64xf32> to vector<8x64xf32>
    %26 = arith.mulf %25, %24 : vector<8x64xf32>
    %c1 = arith.constant 1 : index
    %c0_14 = arith.constant 0 : index
    %27 = vector.load %arg6[%c1, %c0_14] : memref<4x64xf32, #tpu.memory_space<vmem>>, vector<1x64xf32>
    %28 = vector.extract_strided_slice %22 {offsets = [1, 0], sizes = [8, 64], strides = [1, 1]} : vector<11x64xf32> to vector<8x64xf32>
    %29 = vector.broadcast %27 : vector<1x64xf32> to vector<8x64xf32>
    %30 = arith.mulf %29, %28 : vector<8x64xf32>
    %31 = arith.addf %26, %30 : vector<8x64xf32>
    %c2 = arith.constant 2 : index
    %c0_15 = arith.constant 0 : index
    %32 = vector.load %arg6[%c2, %c0_15] : memref<4x64xf32, #tpu.memory_space<vmem>>, vector<1x64xf32>
    %33 = vector.extract_strided_slice %22 {offsets = [2, 0], sizes = [8, 64], strides = [1, 1]} : vector<11x64xf32> to vector<8x64xf32>
    %34 = vector.broadcast %32 : vector<1x64xf32> to vector<8x64xf32>
    %35 = arith.mulf %34, %33 : vector<8x64xf32>
    %36 = arith.addf %31, %35 : vector<8x64xf32>
    %c3 = arith.constant 3 : index
    %c0_16 = arith.constant 0 : index
    %37 = vector.load %arg6[%c3, %c0_16] : memref<4x64xf32, #tpu.memory_space<vmem>>, vector<1x64xf32>
    %38 = vector.extract_strided_slice %22 {offsets = [3, 0], sizes = [8, 64], strides = [1, 1]} : vector<11x64xf32> to vector<8x64xf32>
    %39 = vector.broadcast %37 : vector<1x64xf32> to vector<8x64xf32>
    %40 = arith.mulf %39, %38 : vector<8x64xf32>
    %41 = arith.addf %36, %40 : vector<8x64xf32>
    %42 = vector.extract_strided_slice %20 {offsets = [5, 0], sizes = [3, 64], strides = [1, 1]} : vector<8x64xf32> to vector<3x64xf32>
    %c0_17 = arith.constant 0 : index
    %c0_18 = arith.constant 0 : index
    %43 = vector.load %arg21[%c0_17, %c0_18] : memref<3x64xf32, #tpu.memory_space<vmem>>, vector<3x64xf32>
    tpu.vector_store %arg21[%c0_17, %c0_18], %42 {strides = array<i32>} : memref<3x64xf32, #tpu.memory_space<vmem>>, vector<3x64xf32>,
    %c0_19 = arith.constant 0 : index
    %c0_20 = arith.constant 0 : index
    %44 = vector.load %arg7[%c0_19, %c0_20] : memref<1x64xf32, #tpu.memory_space<vmem>>, vector<1x64xf32>
    %45 = vector.broadcast %44 : vector<1x64xf32> to vector<8x64xf32>
    %46 = arith.addf %41, %45 : vector<8x64xf32>
    %47 = arith.negf %46 : vector<8x64xf32>
    %48 = math.exp %47 : vector<8x64xf32>
    %cst_21 = arith.constant 1.000000e+00 : f32
    %49 = vector.broadcast %cst_21 : f32 to vector<8x64xf32>
    %50 = arith.addf %49, %48 : vector<8x64xf32>
    %51 = arith.divf %49, %50 : vector<8x64xf32>
    %52 = arith.mulf %46, %51 : vector<8x64xf32>
    %c0_22 = arith.constant 0 : index
    %c0_23 = arith.constant 0 : index
    %53 = vector.load %arg17[%c0_22, %c0_23] : memref<8x64xf32, #tpu.memory_space<vmem>>, vector<8x64xf32>
    tpu.vector_store %arg17[%c0_22, %c0_23], %52 {strides = array<i32>} : memref<8x64xf32, #tpu.memory_space<vmem>>, vector<8x64xf32>,
    %54 = arith.truncf %52 : vector<8x64xf32> to vector<8x64xbf16>
    %c0_24 = arith.constant 0 : index
    %c0_25 = arith.constant 0 : index
    %55 = vector.load %arg8[%c0_24, %c0_25] : memref<64x64xbf16, #tpu.memory_space<vmem>>, vector<64x64xbf16>
    %cst_26 = arith.constant dense<0.000000e+00> : vector<8x64xf32>
    %56 = tpu.matmul %54, %55, %cst_26 {dimension_numbers = #tpu.dot_dimension_numbers<[1], [0], [0], [1], [0, 0, 1, 1], [], []>} : vector<8x64xbf16>, vector<64x64xbf16>, vector<8x64xf32> -> vector<8x64xf32>
    %c0_27 = arith.constant 0 : index
    %c0_28 = arith.constant 0 : index
    %57 = vector.load %arg9[%c0_27, %c0_28] : memref<1x64xf32, #tpu.memory_space<vmem>>, vector<1x64xf32>
    %58 = vector.broadcast %57 : vector<1x64xf32> to vector<8x64xf32>
    %59 = arith.addf %56, %58 : vector<8x64xf32>
    %cst_29 = arith.constant 0.000000e+00 : f32
    %60 = vector.broadcast %cst_29 : f32 to vector<8x64xf32>
    %61 = arith.maximumf %59, %60 : vector<8x64xf32>
    %62 = math.absf %59 : vector<8x64xf32>
    %cst_30 = arith.constant 0.000000e+00 : f32
    %63 = vector.broadcast %cst_30 : f32 to vector<8x64xf32>
    %64 = arith.subf %63, %62 : vector<8x64xf32>
    %65 = math.exp %64 : vector<8x64xf32>
    %66 = math.log1p %65 : vector<8x64xf32>
    %67 = arith.addf %61, %66 : vector<8x64xf32>
    %c0_31 = arith.constant 0 : index
    %c0_32 = arith.constant 0 : index
    %68 = vector.load %arg15[%c0_31, %c0_32] : memref<8x64xf32, #tpu.memory_space<vmem>>, vector<8x64xf32>
    tpu.vector_store %arg15[%c0_31, %c0_32], %67 {strides = array<i32>} : memref<8x64xf32, #tpu.memory_space<vmem>>, vector<8x64xf32>,
    %69 = arith.mulf %67, %52 : vector<8x64xf32>
    %c0_33 = arith.constant 0 : index
    %c0_34 = arith.constant 0 : index
    %70 = vector.load %arg16[%c0_33, %c0_34] : memref<8x64xf32, #tpu.memory_space<vmem>>, vector<8x64xf32>
    tpu.vector_store %arg16[%c0_33, %c0_34], %69 {strides = array<i32>} : memref<8x64xf32, #tpu.memory_space<vmem>>, vector<8x64xf32>,
    %c0_35 = arith.constant 0 : index
    %c0_36 = arith.constant 0 : index
    %71 = vector.load %arg10[%c0_35, %c0_36] : memref<64x32xbf16, #tpu.memory_space<vmem>>, vector<64x32xbf16>
    %cst_37 = arith.constant dense<0.000000e+00> : vector<8x32xf32>
    %72 = tpu.matmul %54, %71, %cst_37 {dimension_numbers = #tpu.dot_dimension_numbers<[1], [0], [0], [1], [0, 0, 1, 1], [], []>} : vector<8x64xbf16>, vector<64x32xbf16>, vector<8x32xf32> -> vector<8x32xf32>
    %c0_38 = arith.constant 0 : index
    %c0_39 = arith.constant 0 : index
    %73 = vector.load %arg18[%c0_38, %c0_39] : memref<8x32xf32, #tpu.memory_space<vmem>>, vector<8x32xf32>
    tpu.vector_store %arg18[%c0_38, %c0_39], %72 {strides = array<i32>} : memref<8x32xf32, #tpu.memory_space<vmem>>, vector<8x32xf32>,
    %c0_40 = arith.constant 0 : index
    %c0_41 = arith.constant 0 : index
    %74 = vector.load %arg11[%c0_40, %c0_41] : memref<16x64xf32, #tpu.memory_space<vmem>>, vector<16x64xf32>
    %75 = math.exp %74 : vector<16x64xf32>
    %cst_42 = arith.constant 0.000000e+00 : f32
    %76 = vector.broadcast %cst_42 : f32 to vector<16x64xf32>
    %77 = arith.subf %76, %75 : vector<16x64xf32>
    %c0_43 = arith.constant 0 : index
    %c0_44 = arith.constant 0 : index
    %78 = vector.load %arg20[%c0_43, %c0_44] : memref<16x64xf32, #tpu.memory_space<vmem>>, vector<16x64xf32>
    %c0_i32_45 = arith.constant 0 : i32
    %c8_i32 = arith.constant 8 : i32
    %79 = arith.muli %c0_i32_45, %c8_i32 : i32
    %80 = tpu.assume_multiple %79, 8 : i32
    %81 = arith.index_cast %80 : i32 to index
    %c0_46 = arith.constant 0 : index
    %82 = vector.load %arg15[%81, %c0_46] : memref<8x64xf32, #tpu.memory_space<vmem>>, vector<8x64xf32>
    %83 = arith.index_cast %80 : i32 to index
    %c0_47 = arith.constant 0 : index
    %84 = vector.load %arg16[%83, %c0_47] : memref<8x64xf32, #tpu.memory_space<vmem>>, vector<8x64xf32>
    %85 = arith.index_cast %80 : i32 to index
    %c0_48 = arith.constant 0 : index
    %86 = vector.load %arg18[%85, %c0_48] : memref<8x32xf32, #tpu.memory_space<vmem>>, vector<8x32xf32>
    %87 = vector.extract_strided_slice %86 {offsets = [0, 0], sizes = [8, 16], strides = [1, 1]} : vector<8x32xf32> to vector<8x16xf32>
    %88 = vector.shape_cast %87 : vector<8x16xf32> to vector<8x16x1xf32>
    %89 = vector.extract_strided_slice %86 {offsets = [0, 16], sizes = [8, 16], strides = [1, 1]} : vector<8x32xf32> to vector<8x16xf32>
    %90 = vector.shape_cast %89 : vector<8x16xf32> to vector<8x16x1xf32>
    %91 = vector.extract_strided_slice %82 {offsets = [0, 0], sizes = [1, 64], strides = [1, 1]} : vector<8x64xf32> to vector<1x64xf32>
    %92 = vector.broadcast %91 : vector<1x64xf32> to vector<16x64xf32>
    %93 = arith.mulf %92, %77 : vector<16x64xf32>
    %94 = math.exp %93 : vector<16x64xf32>
    %95 = arith.mulf %94, %78 : vector<16x64xf32>
    %96 = vector.extract_strided_slice %88 {offsets = [0, 0, 0], sizes = [1, 16, 1], strides = [1, 1, 1]} : vector<8x16x1xf32> to vector<1x16x1xf32>
    %97 = vector.shape_cast %96 : vector<1x16x1xf32> to vector<16x1xf32>
    %98 = vector.extract_strided_slice %84 {offsets = [0, 0], sizes = [1, 64], strides = [1, 1]} : vector<8x64xf32> to vector<1x64xf32>
    %99 = vector.broadcast %97 : vector<16x1xf32> to vector<16x64xf32>
    %100 = vector.broadcast %98 : vector<1x64xf32> to vector<16x64xf32>
    %101 = arith.mulf %99, %100 : vector<16x64xf32>
    %102 = arith.addf %95, %101 : vector<16x64xf32>
    %103 = vector.extract_strided_slice %90 {offsets = [0, 0, 0], sizes = [1, 16, 1], strides = [1, 1, 1]} : vector<8x16x1xf32> to vector<1x16x1xf32>
    %104 = vector.shape_cast %103 : vector<1x16x1xf32> to vector<16x1xf32>
    %105 = vector.broadcast %104 : vector<16x1xf32> to vector<16x64xf32>
    %106 = arith.mulf %105, %102 : vector<16x64xf32>
    %cst_49 = arith.constant dense<0.000000e+00> : vector<64xf32>
    %107 = vector.multi_reduction <add>, %106, %cst_49 [0] : vector<16x64xf32> to vector<64xf32>
    %108 = vector.shape_cast %107 : vector<64xf32> to vector<1x64xf32>
    %109 = vector.extract_strided_slice %82 {offsets = [1, 0], sizes = [1, 64], strides = [1, 1]} : vector<8x64xf32> to vector<1x64xf32>
    %110 = vector.broadcast %109 : vector<1x64xf32> to vector<16x64xf32>
    %111 = arith.mulf %110, %77 : vector<16x64xf32>
    %112 = math.exp %111 : vector<16x64xf32>
    %113 = arith.mulf %112, %102 : vector<16x64xf32>
    %114 = vector.extract_strided_slice %88 {offsets = [1, 0, 0], sizes = [1, 16, 1], strides = [1, 1, 1]} : vector<8x16x1xf32> to vector<1x16x1xf32>
    %115 = vector.shape_cast %114 : vector<1x16x1xf32> to vector<16x1xf32>
    %116 = vector.extract_strided_slice %84 {offsets = [1, 0], sizes = [1, 64], strides = [1, 1]} : vector<8x64xf32> to vector<1x64xf32>
    %117 = vector.broadcast %115 : vector<16x1xf32> to vector<16x64xf32>
    %118 = vector.broadcast %116 : vector<1x64xf32> to vector<16x64xf32>
    %119 = arith.mulf %117, %118 : vector<16x64xf32>
    %120 = arith.addf %113, %119 : vector<16x64xf32>
    %121 = vector.extract_strided_slice %90 {offsets = [1, 0, 0], sizes = [1, 16, 1], strides = [1, 1, 1]} : vector<8x16x1xf32> to vector<1x16x1xf32>
    %122 = vector.shape_cast %121 : vector<1x16x1xf32> to vector<16x1xf32>
    %123 = vector.broadcast %122 : vector<16x1xf32> to vector<16x64xf32>
    %124 = arith.mulf %123, %120 : vector<16x64xf32>
    %cst_50 = arith.constant dense<0.000000e+00> : vector<64xf32>
    %125 = vector.multi_reduction <add>, %124, %cst_50 [0] : vector<16x64xf32> to vector<64xf32>
    %126 = vector.shape_cast %125 : vector<64xf32> to vector<1x64xf32>
    %127 = vector.extract_strided_slice %82 {offsets = [2, 0], sizes = [1, 64], strides = [1, 1]} : vector<8x64xf32> to vector<1x64xf32>
    %128 = vector.broadcast %127 : vector<1x64xf32> to vector<16x64xf32>
    %129 = arith.mulf %128, %77 : vector<16x64xf32>
    %130 = math.exp %129 : vector<16x64xf32>
    %131 = arith.mulf %130, %120 : vector<16x64xf32>
    %132 = vector.extract_strided_slice %88 {offsets = [2, 0, 0], sizes = [1, 16, 1], strides = [1, 1, 1]} : vector<8x16x1xf32> to vector<1x16x1xf32>
    %133 = vector.shape_cast %132 : vector<1x16x1xf32> to vector<16x1xf32>
    %134 = vector.extract_strided_slice %84 {offsets = [2, 0], sizes = [1, 64], strides = [1, 1]} : vector<8x64xf32> to vector<1x64xf32>
    %135 = vector.broadcast %133 : vector<16x1xf32> to vector<16x64xf32>
    %136 = vector.broadcast %134 : vector<1x64xf32> to vector<16x64xf32>
    %137 = arith.mulf %135, %136 : vector<16x64xf32>
    %138 = arith.addf %131, %137 : vector<16x64xf32>
    %139 = vector.extract_strided_slice %90 {offsets = [2, 0, 0], sizes = [1, 16, 1], strides = [1, 1, 1]} : vector<8x16x1xf32> to vector<1x16x1xf32>
    %140 = vector.shape_cast %139 : vector<1x16x1xf32> to vector<16x1xf32>
    %141 = vector.broadcast %140 : vector<16x1xf32> to vector<16x64xf32>
    %142 = arith.mulf %141, %138 : vector<16x64xf32>
    %cst_51 = arith.constant dense<0.000000e+00> : vector<64xf32>
    %143 = vector.multi_reduction <add>, %142, %cst_51 [0] : vector<16x64xf32> to vector<64xf32>
    %144 = vector.shape_cast %143 : vector<64xf32> to vector<1x64xf32>
    %145 = vector.extract_strided_slice %82 {offsets = [3, 0], sizes = [1, 64], strides = [1, 1]} : vector<8x64xf32> to vector<1x64xf32>
    %146 = vector.broadcast %145 : vector<1x64xf32> to vector<16x64xf32>
    %147 = arith.mulf %146, %77 : vector<16x64xf32>
    %148 = math.exp %147 : vector<16x64xf32>
    %149 = arith.mulf %148, %138 : vector<16x64xf32>
    %150 = vector.extract_strided_slice %88 {offsets = [3, 0, 0], sizes = [1, 16, 1], strides = [1, 1, 1]} : vector<8x16x1xf32> to vector<1x16x1xf32>
    %151 = vector.shape_cast %150 : vector<1x16x1xf32> to vector<16x1xf32>
    %152 = vector.extract_strided_slice %84 {offsets = [3, 0], sizes = [1, 64], strides = [1, 1]} : vector<8x64xf32> to vector<1x64xf32>
    %153 = vector.broadcast %151 : vector<16x1xf32> to vector<16x64xf32>
    %154 = vector.broadcast %152 : vector<1x64xf32> to vector<16x64xf32>
    %155 = arith.mulf %153, %154 : vector<16x64xf32>
    %156 = arith.addf %149, %155 : vector<16x64xf32>
    %157 = vector.extract_strided_slice %90 {offsets = [3, 0, 0], sizes = [1, 16, 1], strides = [1, 1, 1]} : vector<8x16x1xf32> to vector<1x16x1xf32>
    %158 = vector.shape_cast %157 : vector<1x16x1xf32> to vector<16x1xf32>
    %159 = vector.broadcast %158 : vector<16x1xf32> to vector<16x64xf32>
    %160 = arith.mulf %159, %156 : vector<16x64xf32>
    %cst_52 = arith.constant dense<0.000000e+00> : vector<64xf32>
    %161 = vector.multi_reduction <add>, %160, %cst_52 [0] : vector<16x64xf32> to vector<64xf32>
    %162 = vector.shape_cast %161 : vector<64xf32> to vector<1x64xf32>
    %163 = vector.extract_strided_slice %82 {offsets = [4, 0], sizes = [1, 64], strides = [1, 1]} : vector<8x64xf32> to vector<1x64xf32>
    %164 = vector.broadcast %163 : vector<1x64xf32> to vector<16x64xf32>
    %165 = arith.mulf %164, %77 : vector<16x64xf32>
    %166 = math.exp %165 : vector<16x64xf32>
    %167 = arith.mulf %166, %156 : vector<16x64xf32>
    %168 = vector.extract_strided_slice %88 {offsets = [4, 0, 0], sizes = [1, 16, 1], strides = [1, 1, 1]} : vector<8x16x1xf32> to vector<1x16x1xf32>
    %169 = vector.shape_cast %168 : vector<1x16x1xf32> to vector<16x1xf32>
    %170 = vector.extract_strided_slice %84 {offsets = [4, 0], sizes = [1, 64], strides = [1, 1]} : vector<8x64xf32> to vector<1x64xf32>
    %171 = vector.broadcast %169 : vector<16x1xf32> to vector<16x64xf32>
    %172 = vector.broadcast %170 : vector<1x64xf32> to vector<16x64xf32>
    %173 = arith.mulf %171, %172 : vector<16x64xf32>
    %174 = arith.addf %167, %173 : vector<16x64xf32>
    %175 = vector.extract_strided_slice %90 {offsets = [4, 0, 0], sizes = [1, 16, 1], strides = [1, 1, 1]} : vector<8x16x1xf32> to vector<1x16x1xf32>
    %176 = vector.shape_cast %175 : vector<1x16x1xf32> to vector<16x1xf32>
    %177 = vector.broadcast %176 : vector<16x1xf32> to vector<16x64xf32>
    %178 = arith.mulf %177, %174 : vector<16x64xf32>
    %cst_53 = arith.constant dense<0.000000e+00> : vector<64xf32>
    %179 = vector.multi_reduction <add>, %178, %cst_53 [0] : vector<16x64xf32> to vector<64xf32>
    %180 = vector.shape_cast %179 : vector<64xf32> to vector<1x64xf32>
    %181 = vector.extract_strided_slice %82 {offsets = [5, 0], sizes = [1, 64], strides = [1, 1]} : vector<8x64xf32> to vector<1x64xf32>
    %182 = vector.broadcast %181 : vector<1x64xf32> to vector<16x64xf32>
    %183 = arith.mulf %182, %77 : vector<16x64xf32>
    %184 = math.exp %183 : vector<16x64xf32>
    %185 = arith.mulf %184, %174 : vector<16x64xf32>
    %186 = vector.extract_strided_slice %88 {offsets = [5, 0, 0], sizes = [1, 16, 1], strides = [1, 1, 1]} : vector<8x16x1xf32> to vector<1x16x1xf32>
    %187 = vector.shape_cast %186 : vector<1x16x1xf32> to vector<16x1xf32>
    %188 = vector.extract_strided_slice %84 {offsets = [5, 0], sizes = [1, 64], strides = [1, 1]} : vector<8x64xf32> to vector<1x64xf32>
    %189 = vector.broadcast %187 : vector<16x1xf32> to vector<16x64xf32>
    %190 = vector.broadcast %188 : vector<1x64xf32> to vector<16x64xf32>
    %191 = arith.mulf %189, %190 : vector<16x64xf32>
    %192 = arith.addf %185, %191 : vector<16x64xf32>
    %193 = vector.extract_strided_slice %90 {offsets = [5, 0, 0], sizes = [1, 16, 1], strides = [1, 1, 1]} : vector<8x16x1xf32> to vector<1x16x1xf32>
    %194 = vector.shape_cast %193 : vector<1x16x1xf32> to vector<16x1xf32>
    %195 = vector.broadcast %194 : vector<16x1xf32> to vector<16x64xf32>
    %196 = arith.mulf %195, %192 : vector<16x64xf32>
    %cst_54 = arith.constant dense<0.000000e+00> : vector<64xf32>
    %197 = vector.multi_reduction <add>, %196, %cst_54 [0] : vector<16x64xf32> to vector<64xf32>
    %198 = vector.shape_cast %197 : vector<64xf32> to vector<1x64xf32>
    %199 = vector.extract_strided_slice %82 {offsets = [6, 0], sizes = [1, 64], strides = [1, 1]} : vector<8x64xf32> to vector<1x64xf32>
    %200 = vector.broadcast %199 : vector<1x64xf32> to vector<16x64xf32>
    %201 = arith.mulf %200, %77 : vector<16x64xf32>
    %202 = math.exp %201 : vector<16x64xf32>
    %203 = arith.mulf %202, %192 : vector<16x64xf32>
    %204 = vector.extract_strided_slice %88 {offsets = [6, 0, 0], sizes = [1, 16, 1], strides = [1, 1, 1]} : vector<8x16x1xf32> to vector<1x16x1xf32>
    %205 = vector.shape_cast %204 : vector<1x16x1xf32> to vector<16x1xf32>
    %206 = vector.extract_strided_slice %84 {offsets = [6, 0], sizes = [1, 64], strides = [1, 1]} : vector<8x64xf32> to vector<1x64xf32>
    %207 = vector.broadcast %205 : vector<16x1xf32> to vector<16x64xf32>
    %208 = vector.broadcast %206 : vector<1x64xf32> to vector<16x64xf32>
    %209 = arith.mulf %207, %208 : vector<16x64xf32>
    %210 = arith.addf %203, %209 : vector<16x64xf32>
    %211 = vector.extract_strided_slice %90 {offsets = [6, 0, 0], sizes = [1, 16, 1], strides = [1, 1, 1]} : vector<8x16x1xf32> to vector<1x16x1xf32>
    %212 = vector.shape_cast %211 : vector<1x16x1xf32> to vector<16x1xf32>
    %213 = vector.broadcast %212 : vector<16x1xf32> to vector<16x64xf32>
    %214 = arith.mulf %213, %210 : vector<16x64xf32>
    %cst_55 = arith.constant dense<0.000000e+00> : vector<64xf32>
    %215 = vector.multi_reduction <add>, %214, %cst_55 [0] : vector<16x64xf32> to vector<64xf32>
    %216 = vector.shape_cast %215 : vector<64xf32> to vector<1x64xf32>
    %217 = vector.extract_strided_slice %82 {offsets = [7, 0], sizes = [1, 64], strides = [1, 1]} : vector<8x64xf32> to vector<1x64xf32>
    %218 = vector.broadcast %217 : vector<1x64xf32> to vector<16x64xf32>
    %219 = arith.mulf %218, %77 : vector<16x64xf32>
    %220 = math.exp %219 : vector<16x64xf32>
    %221 = arith.mulf %220, %210 : vector<16x64xf32>
    %222 = vector.extract_strided_slice %88 {offsets = [7, 0, 0], sizes = [1, 16, 1], strides = [1, 1, 1]} : vector<8x16x1xf32> to vector<1x16x1xf32>
    %223 = vector.shape_cast %222 : vector<1x16x1xf32> to vector<16x1xf32>
    %224 = vector.extract_strided_slice %84 {offsets = [7, 0], sizes = [1, 64], strides = [1, 1]} : vector<8x64xf32> to vector<1x64xf32>
    %225 = vector.broadcast %223 : vector<16x1xf32> to vector<16x64xf32>
    %226 = vector.broadcast %224 : vector<1x64xf32> to vector<16x64xf32>
    %227 = arith.mulf %225, %226 : vector<16x64xf32>
    %228 = arith.addf %221, %227 : vector<16x64xf32>
    %229 = vector.extract_strided_slice %90 {offsets = [7, 0, 0], sizes = [1, 16, 1], strides = [1, 1, 1]} : vector<8x16x1xf32> to vector<1x16x1xf32>
    %230 = vector.shape_cast %229 : vector<1x16x1xf32> to vector<16x1xf32>
    %231 = vector.broadcast %230 : vector<16x1xf32> to vector<16x64xf32>
    %232 = arith.mulf %231, %228 : vector<16x64xf32>
    %cst_56 = arith.constant dense<0.000000e+00> : vector<64xf32>
    %233 = vector.multi_reduction <add>, %232, %cst_56 [0] : vector<16x64xf32> to vector<64xf32>
    %234 = vector.shape_cast %233 : vector<64xf32> to vector<1x64xf32>
    %235 = tpu.concatenate %108, %126, %144, %162, %180, %198, %216, %234 in 0 : vector<1x64xf32>, vector<1x64xf32>, vector<1x64xf32>, vector<1x64xf32>, vector<1x64xf32>, vector<1x64xf32>, vector<1x64xf32>, vector<1x64xf32> -> vector<8x64xf32>
    %236 = arith.index_cast %80 : i32 to index
    %c0_57 = arith.constant 0 : index
    %237 = vector.load %arg19[%236, %c0_57] : memref<8x64xf32, #tpu.memory_space<vmem>>, vector<8x64xf32>
    tpu.vector_store %arg19[%236, %c0_57], %235 {strides = array<i32>} : memref<8x64xf32, #tpu.memory_space<vmem>>, vector<8x64xf32>,
    %c1_i32 = arith.constant 1 : i32
    %c0_58 = arith.constant 0 : index
    %c0_59 = arith.constant 0 : index
    %238 = vector.load %arg20[%c0_58, %c0_59] : memref<16x64xf32, #tpu.memory_space<vmem>>, vector<16x64xf32>
    tpu.vector_store %arg20[%c0_58, %c0_59], %228 {strides = array<i32>} : memref<16x64xf32, #tpu.memory_space<vmem>>, vector<16x64xf32>,
    %c0_60 = arith.constant 0 : index
    %c0_61 = arith.constant 0 : index
    %239 = vector.load %arg19[%c0_60, %c0_61] : memref<8x64xf32, #tpu.memory_space<vmem>>, vector<8x64xf32>
    %c0_62 = arith.constant 0 : index
    %c0_63 = arith.constant 0 : index
    %240 = vector.load %arg12[%c0_62, %c0_63] : memref<1x64xf32, #tpu.memory_space<vmem>>, vector<1x64xf32>
    %c0_64 = arith.constant 0 : index
    %c0_65 = arith.constant 0 : index
    %241 = vector.load %arg17[%c0_64, %c0_65] : memref<8x64xf32, #tpu.memory_space<vmem>>, vector<8x64xf32>
    %242 = vector.broadcast %240 : vector<1x64xf32> to vector<8x64xf32>
    %243 = arith.mulf %242, %241 : vector<8x64xf32>
    %244 = arith.addf %239, %243 : vector<8x64xf32>
    %c0_66 = arith.constant 0 : index
    %c0_67 = arith.constant 0 : index
    %c0_68 = arith.constant 0 : index
    %245 = vector.load %arg2[%c0_66, %c0_67, %c0_68] : memref<1x8x32xf32, #tpu.memory_space<vmem>>, vector<1x8x32xf32>
    %246 = vector.shape_cast %245 : vector<1x8x32xf32> to vector<8x32xf32>
    %247 = arith.mulf %246, %246 : vector<8x32xf32>
    %cst_69 = arith.constant dense<0.000000e+00> : vector<8xf32>
    %248 = vector.multi_reduction <add>, %247, %cst_69 [1] : vector<8x32xf32> to vector<8xf32>
    %249 = vector.shape_cast %248 : vector<8xf32> to vector<8x1xf32>
    %cst_70 = arith.constant 3.200000e+01 : f32
    %250 = vector.broadcast %cst_70 : f32 to vector<8x1xf32>
    %251 = arith.divf %249, %250 : vector<8x1xf32>
    %cst_71 = arith.constant 9.99999974E-6 : f32
    %252 = vector.broadcast %cst_71 : f32 to vector<8x1xf32>
    %253 = arith.addf %251, %252 : vector<8x1xf32>
    %254 = math.rsqrt %253 : vector<8x1xf32>
    %255 = vector.broadcast %254 : vector<8x1xf32> to vector<8x32xf32>
    %256 = arith.mulf %246, %255 : vector<8x32xf32>
    %c0_72 = arith.constant 0 : index
    %c0_73 = arith.constant 0 : index
    %257 = vector.load %arg3[%c0_72, %c0_73] : memref<1x32xf32, #tpu.memory_space<vmem>>, vector<1x32xf32>
    %258 = vector.broadcast %257 : vector<1x32xf32> to vector<8x32xf32>
    %259 = arith.mulf %256, %258 : vector<8x32xf32>
    %260 = arith.truncf %259 : vector<8x32xf32> to vector<8x32xbf16>
    %c0_74 = arith.constant 0 : index
    %c0_75 = arith.constant 0 : index
    %261 = vector.load %arg5[%c0_74, %c0_75] : memref<32x64xbf16, #tpu.memory_space<vmem>>, vector<32x64xbf16>
    %cst_76 = arith.constant dense<0.000000e+00> : vector<8x64xf32>
    %262 = tpu.matmul %260, %261, %cst_76 {dimension_numbers = #tpu.dot_dimension_numbers<[1], [0], [0], [1], [0, 0, 1, 1], [], []>} : vector<8x32xbf16>, vector<32x64xbf16>, vector<8x64xf32> -> vector<8x64xf32>
    %263 = arith.negf %262 : vector<8x64xf32>
    %264 = math.exp %263 : vector<8x64xf32>
    %cst_77 = arith.constant 1.000000e+00 : f32
    %265 = vector.broadcast %cst_77 : f32 to vector<8x64xf32>
    %266 = arith.addf %265, %264 : vector<8x64xf32>
    %267 = arith.divf %265, %266 : vector<8x64xf32>
    %268 = arith.mulf %262, %267 : vector<8x64xf32>
    %269 = arith.mulf %244, %268 : vector<8x64xf32>
    %270 = arith.truncf %269 : vector<8x64xf32> to vector<8x64xbf16>
    %c0_78 = arith.constant 0 : index
    %c0_79 = arith.constant 0 : index
    %271 = vector.load %arg13[%c0_78, %c0_79] : memref<64x32xbf16, #tpu.memory_space<vmem>>, vector<64x32xbf16>
    %cst_80 = arith.constant dense<0.000000e+00> : vector<8x32xf32>
    %272 = tpu.matmul %270, %271, %cst_80 {dimension_numbers = #tpu.dot_dimension_numbers<[1], [0], [0], [1], [0, 0, 1, 1], [], []>} : vector<8x64xbf16>, vector<64x32xbf16>, vector<8x32xf32> -> vector<8x32xf32>
    %273 = arith.addf %246, %272 : vector<8x32xf32>
    %c0_81 = arith.constant 0 : index
    %c0_82 = arith.constant 0 : index
    %c0_83 = arith.constant 0 : index
    %274 = vector.load %arg14[%c0_81, %c0_82, %c0_83] : memref<1x8x32xf32, #tpu.memory_space<vmem>>, vector<1x8x32xf32>
    %275 = vector.shape_cast %274 : vector<1x8x32xf32> to vector<8x32xf32>
    %276 = vector.shape_cast %273 : vector<8x32xf32> to vector<1x8x32xf32>
    tpu.vector_store %arg14[%c0_81, %c0_82, %c0_83], %276 {strides = array<i32>} : memref<1x8x32xf32, #tpu.memory_space<vmem>>, vector<1x8x32xf32>,
    return
  }
  func.func @transform_0(%arg0: i32, %arg1: i32) -> (i32, i32, i32) {
    %c0_i32 = arith.constant 0 : i32
    %c0_i32_0 = arith.constant 0 : i32
    return %arg0, %arg1, %c0_i32 : i32, i32, i32
  }
  func.func @transform_1(%arg0: i32, %arg1: i32) -> (i32, i32) {
    %c0_i32 = arith.constant 0 : i32
    %c0_i32_0 = arith.constant 0 : i32
    %c0_i32_1 = arith.constant 0 : i32
    return %c0_i32, %c0_i32_0 : i32, i32
  }
  func.func @transform_2(%arg0: i32, %arg1: i32) -> (i32, i32) {
    %c0_i32 = arith.constant 0 : i32
    %c0_i32_0 = arith.constant 0 : i32
    %c0_i32_1 = arith.constant 0 : i32
    return %c0_i32, %c0_i32_0 : i32, i32
  }
  func.func @transform_3(%arg0: i32, %arg1: i32) -> (i32, i32) {
    %c0_i32 = arith.constant 0 : i32
    %c0_i32_0 = arith.constant 0 : i32
    %c0_i32_1 = arith.constant 0 : i32
    return %c0_i32, %c0_i32_0 : i32, i32
  }
  func.func @transform_4(%arg0: i32, %arg1: i32) -> (i32, i32) {
    %c0_i32 = arith.constant 0 : i32
    %c0_i32_0 = arith.constant 0 : i32
    %c0_i32_1 = arith.constant 0 : i32
    return %c0_i32, %c0_i32_0 : i32, i32
  }
  func.func @transform_5(%arg0: i32, %arg1: i32) -> (i32, i32) {
    %c0_i32 = arith.constant 0 : i32
    %c0_i32_0 = arith.constant 0 : i32
    %c0_i32_1 = arith.constant 0 : i32
    return %c0_i32, %c0_i32_0 : i32, i32
  }
  func.func @transform_6(%arg0: i32, %arg1: i32) -> (i32, i32) {
    %c0_i32 = arith.constant 0 : i32
    %c0_i32_0 = arith.constant 0 : i32
    %c0_i32_1 = arith.constant 0 : i32
    return %c0_i32, %c0_i32_0 : i32, i32
  }
  func.func @transform_7(%arg0: i32, %arg1: i32) -> (i32, i32) {
    %c0_i32 = arith.constant 0 : i32
    %c0_i32_0 = arith.constant 0 : i32
    %c0_i32_1 = arith.constant 0 : i32
    return %c0_i32, %c0_i32_0 : i32, i32
  }
  func.func @transform_8(%arg0: i32, %arg1: i32) -> (i32, i32) {
    %c0_i32 = arith.constant 0 : i32
    %c0_i32_0 = arith.constant 0 : i32
    %c0_i32_1 = arith.constant 0 : i32
    return %c0_i32, %c0_i32_0 : i32, i32
  }
  func.func @transform_9(%arg0: i32, %arg1: i32) -> (i32, i32) {
    %c0_i32 = arith.constant 0 : i32
    %c0_i32_0 = arith.constant 0 : i32
    %c0_i32_1 = arith.constant 0 : i32
    return %c0_i32, %c0_i32_0 : i32, i32
  }
  func.func @transform_10(%arg0: i32, %arg1: i32) -> (i32, i32) {
    %c0_i32 = arith.constant 0 : i32
    %c0_i32_0 = arith.constant 0 : i32
    %c0_i32_1 = arith.constant 0 : i32
    return %c0_i32, %c0_i32_0 : i32, i32
  }
  func.func @transform_11(%arg0: i32, %arg1: i32) -> (i32, i32) {
    %c0_i32 = arith.constant 0 : i32
    %c0_i32_0 = arith.constant 0 : i32
    %c0_i32_1 = arith.constant 0 : i32
    return %c0_i32, %c0_i32_0 : i32, i32
  }
  func.func @transform_12(%arg0: i32, %arg1: i32) -> (i32, i32, i32) {
    %c0_i32 = arith.constant 0 : i32
    %c0_i32_0 = arith.constant 0 : i32
    return %arg0, %arg1, %c0_i32 : i32, i32, i32
  }
}

module attributes {stable_mosaic.version = 11 : i64} {
  func.func @mamba_layer_kernel(%arg0: i32, %arg1: i32, %arg2: memref<1x8x32xf32, #tpu.memory_space<vmem>>, %arg3: memref<1x32xf32, #tpu.memory_space<vmem>>, %arg4: memref<32x64xbf16, #tpu.memory_space<vmem>>, %arg5: memref<32x64xbf16, #tpu.memory_space<vmem>>, %arg6: memref<4x64xf32, #tpu.memory_space<vmem>>, %arg7: memref<1x64xf32, #tpu.memory_space<vmem>>, %arg8: memref<64x64xbf16, #tpu.memory_space<vmem>>, %arg9: memref<1x64xf32, #tpu.memory_space<vmem>>, %arg10: memref<64x32xbf16, #tpu.memory_space<vmem>>, %arg11: memref<16x64xf32, #tpu.memory_space<vmem>>, %arg12: memref<1x64xf32, #tpu.memory_space<vmem>>, %arg13: memref<64x32xbf16, #tpu.memory_space<vmem>>, %arg14: memref<1x8x32xf32, #tpu.memory_space<vmem>>, %arg15: memref<8x64xf32, #tpu.memory_space<vmem>>, %arg16: memref<8x64xf32, #tpu.memory_space<vmem>>, %arg17: memref<8x64xf32, #tpu.memory_space<vmem>>, %arg18: memref<8x32xf32, #tpu.memory_space<vmem>>, %arg19: memref<8x64xf32, #tpu.memory_space<vmem>>, %arg20: memref<16x64xf32, #tpu.memory_space<vmem>>, %arg21: memref<3x64xf32, #tpu.memory_space<vmem>>) attributes {dimension_semantics = [#tpu.dimension_semantics<parallel>, #tpu.dimension_semantics<arbitrary>], iteration_bounds = array<i64: 2, 1>, scalar_prefetch = 0 : i64, scratch_operands = 7 : i64, tpu.core_type = #tpu.core_type<tc>, window_params = [{transform_indices = @transform_0, window_bounds = array<i64: 1, 8, 32>}, {pipeline_mode = #tpu.pipeline_mode<synchronous>, transform_indices = @transform_1, window_bounds = array<i64: 1, 32>}, {pipeline_mode = #tpu.pipeline_mode<synchronous>, transform_indices = @transform_2, window_bounds = array<i64: 32, 64>}, {pipeline_mode = #tpu.pipeline_mode<synchronous>, transform_indices = @transform_3, window_bounds = array<i64: 32, 64>}, {pipeline_mode = #tpu.pipeline_mode<synchronous>, transform_indices = @transform_4, window_bounds = array<i64: 4, 64>}, {pipeline_mode = #tpu.pipeline_mode<synchronous>, transform_indices = @transform_5, window_bounds = array<i64: 1, 64>}, {pipeline_mode = #tpu.pipeline_mode<synchronous>, transform_indices = @transform_6, window_bounds = array<i64: 64, 64>}, {pipeline_mode = #tpu.pipeline_mode<synchronous>, transform_indices = @transform_7, window_bounds = array<i64: 1, 64>}, {pipeline_mode = #tpu.pipeline_mode<synchronous>, transform_indices = @transform_8, window_bounds = array<i64: 64, 32>}, {pipeline_mode = #tpu.pipeline_mode<synchronous>, transform_indices = @transform_9, window_bounds = array<i64: 16, 64>}, {pipeline_mode = #tpu.pipeline_mode<synchronous>, transform_indices = @transform_10, window_bounds = array<i64: 1, 64>}, {pipeline_mode = #tpu.pipeline_mode<synchronous>, transform_indices = @transform_11, window_bounds = array<i64: 64, 32>}, {transform_indices = @transform_12, window_bounds = array<i64: 1, 8, 32>}]} {
    %c0_i32 = arith.constant 0 : i32
    %0 = arith.cmpi eq, %arg1, %c0_i32 : i32
    %1 = arith.extui %0 : i1 to i32
    %c0_i32_0 = arith.constant 0 : i32
    %2 = arith.cmpi ne, %1, %c0_i32_0 : i32
    scf.if %2 {
      %cst_84 = arith.constant 0.000000e+00 : f32
      %277 = vector.broadcast %cst_84 : f32 to vector<16x64xf32>
      %c0_85 = arith.constant 0 : index
      %c0_86 = arith.constant 0 : index
      %278 = vector.load %arg20[%c0_85, %c0_86] : memref<16x64xf32, #tpu.memory_space<vmem>>, vector<16x64xf32>
      tpu.vector_store %arg20[%c0_85, %c0_86], %277 {strides = array<i32>} : memref<16x64xf32, #tpu.memory_space<vmem>>, vector<16x64xf32>,
      %cst_87 = arith.constant 0.000000e+00 : f32
      %279 = vector.broadcast %cst_87 : f32 to vector<3x64xf32>
      %c0_88 = arith.constant 0 : index
      %c0_89 = arith.constant 0 : index
      %280 = vector.load %arg21[%c0_88, %c0_89] : memref<3x64xf32, #tpu.memory_space<vmem>>, vector<3x64xf32>
      tpu.vector_store %arg21[%c0_88, %c0_89], %279 {strides = array<i32>} : memref<3x64xf32, #tpu.memory_space<vmem>>, vector<3x64xf32>,
    } else {
    }
    %c0 = arith.constant 0 : index
    %c0_1 = arith.constant 0 : index
    %c0_2 = arith.constant 0 : index
    %3 = vector.load %arg2[%c0, %c0_1, %c0_2] : memref<1x8x32xf32, #tpu.memory_space<vmem>>, vector<1x8x32xf32>
    %4 = vector.shape_cast %3 : vector<1x8x32xf32> to vector<8x32xf32>
    %5 = arith.mulf %4, %4 : vector<8x32xf32>
    %cst = arith.constant dense<0.000000e+00> : vector<8xf32>
    %6 = vector.multi_reduction <add>, %5, %cst [1] : vector<8x32xf32> to vector<8xf32>
    %7 = vector.shape_cast %6 : vector<8xf32> to vector<8x1xf32>
    %cst_3 = arith.constant 3.200000e+01 : f32
    %8 = vector.broadcast %cst_3 : f32 to vector<8x1xf32>
    %9 = arith.divf %7, %8 : vector<8x1xf32>
    %cst_4 = arith.constant 9.99999974E-6 : f32
    %10 = vector.broadcast %cst_4 : f32 to vector<8x1xf32>
    %11 = arith.addf %9, %10 : vector<8x1xf32>
    %12 = math.rsqrt %11 : vector<8x1xf32>
    %13 = vector.broadcast %12 : vector<8x1xf32> to vector<8x32xf32>
    %14 = arith.mulf %4, %13 : vector<8x32xf32>
    %c0_5 = arith.constant 0 : index
    %c0_6 = arith.constant 0 : index
    %15 = vector.load %arg3[%c0_5, %c0_6] : memref<1x32xf32, #tpu.memory_space<vmem>>, vector<1x32xf32>
    %16 = vector.broadcast %15 : vector<1x32xf32> to vector<8x32xf32>
    %17 = arith.mulf %14, %16 : vector<8x32xf32>
    %18 = arith.truncf %17 : vector<8x32xf32> to vector<8x32xbf16>
    %c0_7 = arith.constant 0 : index
    %c0_8 = arith.constant 0 : index
    %19 = vector.load %arg4[%c0_7, %c0_8] : memref<32x64xbf16, #tpu.memory_space<vmem>>, vector<32x64xbf16>
    %cst_9 = arith.constant dense<0.000000e+00> : vector<8x64xf32>
    %20 = tpu.matmul %18, %19, %cst_9 {dimension_numbers = #tpu.dot_dimension_numbers<[1], [0], [0], [1], [0, 0, 1, 1], [], []>} : vector<8x32xbf16>, vector<32x64xbf16>, vector<8x64xf32> -> vector<8x64xf32>
    %c0_10 = arith.constant 0 : index
    %c0_11 = arith.constant 0 : index
    %21 = vector.load %arg21[%c0_10, %c0_11] : memref<3x64xf32, #tpu.memory_space<vmem>>, vector<3x64xf32>
    %22 = tpu.concatenate %21, %20 in 0 : vector<3x64xf32>, vector<8x64xf32> -> vector<11x64xf32>
    %c0_12 = arith.constant 0 : index
    %c0_13 = arith.constant 0 : index
    %23 = vector.load %arg6[%c0_12, %c0_13] : memref<4x64xf32, #tpu.memory_space<vmem>>, vector<1x64xf32>
    %24 = vector.extract_strided_slice %22 {offsets = [0, 0], sizes = [8, 64], strides = [1, 1]} : vector<11x64xf32> to vector<8x64xf32>
    %25 = vector.broadcast %23 : vector<1x64xf32> to vector<8x64xf32>
    %26 = arith.mulf %25, %24 : vector<8x64xf32>
    %c1 = arith.constant 1 : index
    %c0_14 = arith.constant 0 : index
    %27 = vector.load %arg6[%c1, %c0_14] : memref<4x64xf32, #tpu.memory_space<vmem>>, vector<1x64xf32>
    %28 = vector.extract_strided_slice %22 {offsets = [1, 0], sizes = [8, 64], strides = [1, 1]} : vector<11x64xf32> to vector<8x64xf32>
    %29 = vector.broadcast %27 : vector<1x64xf32> to vector<8x64xf32>
    %30 = arith.mulf %29, %28 : vector<8x64xf32>
    %31 = arith.addf %26, %30 : vector<8x64xf32>
    %c2 = arith.constant 2 : index
    %c0_15 = arith.constant 0 : index
    %32 = vector.load %arg6[%c2, %c0_15] : memref<4x64xf32, #tpu.memory_space<vmem>>, vector<1x64xf32>
    %33 = vector.extract_strided_slice %22 {offsets = [2, 0], sizes = [8, 64], strides = [1, 1]} : vector<11x64xf32> to vector<8x64xf32>
    %34 = vector.broadcast %32 : vector<1x64xf32> to vector<8x64xf32>
    %35 = arith.mulf %34, %33 : vector<8x64xf32>
    %36 = arith.addf %31, %35 : vector<8x64xf32>
    %c3 = arith.constant 3 : index
    %c0_16 = arith.constant 0 : index
    %37 = vector.load %arg6[%c3, %c0_16] : memref<4x64xf32, #tpu.memory_space<vmem>>, vector<1x64xf32>
    %38 = vector.extract_strided_slice %22 {offsets = [3, 0], sizes = [8, 64], strides = [1, 1]} : vector<11x64xf32> to vector<8x64xf32>
    %39 = vector.broadcast %37 : vector<1x64xf32> to vector<8x64xf32>
    %40 = arith.mulf %39, %38 : vector<8x64xf32>
    %41 = arith.addf %36, %40 : vector<8x64xf32>
    %42 = vector.extract_strided_slice %20 {offsets = [5, 0], sizes = [3, 64], strides = [1, 1]} : vector<8x64xf32> to vector<3x64xf32>
    %c0_17 = arith.constant 0 : index
    %c0_18 = arith.constant 0 : index
    %43 = vector.load %arg21[%c0_17, %c0_18] : memref<3x64xf32, #tpu.memory_space<vmem>>, vector<3x64xf32>
    tpu.vector_store %arg21[%c0_17, %c0_18], %42 {strides = array<i32>} : memref<3x64xf32, #tpu.memory_space<vmem>>, vector<3x64xf32>,
    %c0_19 = arith.constant 0 : index
    %c0_20 = arith.constant 0 : index
    %44 = vector.load %arg7[%c0_19, %c0_20] : memref<1x64xf32, #tpu.memory_space<vmem>>, vector<1x64xf32>
    %45 = vector.broadcast %44 : vector<1x64xf32> to vector<8x64xf32>
    %46 = arith.addf %41, %45 : vector<8x64xf32>
    %47 = arith.negf %46 : vector<8x64xf32>
    %48 = math.exp %47 : vector<8x64xf32>
    %cst_21 = arith.constant 1.000000e+00 : f32
    %49 = vector.broadcast %cst_21 : f32 to vector<8x64xf32>
    %50 = arith.addf %49, %48 : vector<8x64xf32>
    %51 = arith.divf %49, %50 : vector<8x64xf32>
    %52 = arith.mulf %46, %51 : vector<8x64xf32>
    %c0_22 = arith.constant 0 : index
    %c0_23 = arith.constant 0 : index
    %53 = vector.load %arg17[%c0_22, %c0_23] : memref<8x64xf32, #tpu.memory_space<vmem>>, vector<8x64xf32>
    tpu.vector_store %arg17[%c0_22, %c0_23], %52 {strides = array<i32>} : memref<8x64xf32, #tpu.memory_space<vmem>>, vector<8x64xf32>,
    %54 = arith.truncf %52 : vector<8x64xf32> to vector<8x64xbf16>
    %c0_24 = arith.constant 0 : index
    %c0_25 = arith.constant 0 : index
    %55 = vector.load %arg8[%c0_24, %c0_25] : memref<64x64xbf16, #tpu.memory_space<vmem>>, vector<64x64xbf16>
    %cst_26 = arith.constant dense<0.000000e+00> : vector<8x64xf32>
    %56 = tpu.matmul %54, %55, %cst_26 {dimension_numbers = #tpu.dot_dimension_numbers<[1], [0], [0], [1], [0, 0, 1, 1], [], []>} : vector<8x64xbf16>, vector<64x64xbf16>, vector<8x64xf32> -> vector<8x64xf32>
    %c0_27 = arith.constant 0 : index
    %c0_28 = arith.constant 0 : index
    %57 = vector.load %arg9[%c0_27, %c0_28] : memref<1x64xf32, #tpu.memory_space<vmem>>, vector<1x64xf32>
    %58 = vector.broadcast %57 : vector<1x64xf32> to vector<8x64xf32>
    %59 = arith.addf %56, %58 : vector<8x64xf32>
    %cst_29 = arith.constant 0.000000e+00 : f32
    %60 = vector.broadcast %cst_29 : f32 to vector<8x64xf32>
    %61 = arith.maximumf %59, %60 : vector<8x64xf32>
    %62 = math.absf %59 : vector<8x64xf32>
    %cst_30 = arith.constant 0.000000e+00 : f32
    %63 = vector.broadcast %cst_30 : f32 to vector<8x64xf32>
    %64 = arith.subf %63, %62 : vector<8x64xf32>
    %65 = math.exp %64 : vector<8x64xf32>
    %66 = math.log1p %65 : vector<8x64xf32>
    %67 = arith.addf %61, %66 : vector<8x64xf32>
    %c0_31 = arith.constant 0 : index
    %c0_32 = arith.constant 0 : index
    %68 = vector.load %arg15[%c0_31, %c0_32] : memref<8x64xf32, #tpu.memory_space<vmem>>, vector<8x64xf32>
    tpu.vector_store %arg15[%c0_31, %c0_32], %67 {strides = array<i32>} : memref<8x64xf32, #tpu.memory_space<vmem>>, vector<8x64xf32>,
    %69 = arith.mulf %67, %52 : vector<8x64xf32>
    %c0_33 = arith.constant 0 : index
    %c0_34 = arith.constant 0 : index
    %70 = vector.load %arg16[%c0_33, %c0_34] : memref<8x64xf32, #tpu.memory_space<vmem>>, vector<8x64xf32>
    tpu.vector_store %arg16[%c0_33, %c0_34], %69 {strides = array<i32>} : memref<8x64xf32, #tpu.memory_space<vmem>>, vector<8x64xf32>,
    %c0_35 = arith.constant 0 : index
    %c0_36 = arith.constant 0 : index
    %71 = vector.load %arg10[%c0_35, %c0_36] : memref<64x32xbf16, #tpu.memory_space<vmem>>, vector<64x32xbf16>
    %cst_37 = arith.constant dense<0.000000e+00> : vector<8x32xf32>
    %72 = tpu.matmul %54, %71, %cst_37 {dimension_numbers = #tpu.dot_dimension_numbers<[1], [0], [0], [1], [0, 0, 1, 1], [], []>} : vector<8x64xbf16>, vector<64x32xbf16>, vector<8x32xf32> -> vector<8x32xf32>
    %c0_38 = arith.constant 0 : index
    %c0_39 = arith.constant 0 : index
    %73 = vector.load %arg18[%c0_38, %c0_39] : memref<8x32xf32, #tpu.memory_space<vmem>>, vector<8x32xf32>
    tpu.vector_store %arg18[%c0_38, %c0_39], %72 {strides = array<i32>} : memref<8x32xf32, #tpu.memory_space<vmem>>, vector<8x32xf32>,
    %c0_40 = arith.constant 0 : index
    %c0_41 = arith.constant 0 : index
    %74 = vector.load %arg11[%c0_40, %c0_41] : memref<16x64xf32, #tpu.memory_space<vmem>>, vector<16x64xf32>
    %75 = math.exp %74 : vector<16x64xf32>
    %cst_42 = arith.constant 0.000000e+00 : f32
    %76 = vector.broadcast %cst_42 : f32 to vector<16x64xf32>
    %77 = arith.subf %76, %75 : vector<16x64xf32>
    %c0_43 = arith.constant 0 : index
    %c0_44 = arith.constant 0 : index
    %78 = vector.load %arg20[%c0_43, %c0_44] : memref<16x64xf32, #tpu.memory_space<vmem>>, vector<16x64xf32>
    %c0_i32_45 = arith.constant 0 : i32
    %c8_i32 = arith.constant 8 : i32
    %79 = arith.muli %c0_i32_45, %c8_i32 : i32
    %80 = tpu.assume_multiple %79, 8 : i32
    %81 = arith.index_cast %80 : i32 to index
    %c0_46 = arith.constant 0 : index
    %82 = vector.load %arg15[%81, %c0_46] : memref<8x64xf32, #tpu.memory_space<vmem>>, vector<8x64xf32>
    %83 = arith.index_cast %80 : i32 to index
    %c0_47 = arith.constant 0 : index
    %84 = vector.load %arg16[%83, %c0_47] : memref<8x64xf32, #tpu.memory_space<vmem>>, vector<8x64xf32>
    %85 = arith.index_cast %80 : i32 to index
    %c0_48 = arith.constant 0 : index
    %86 = vector.load %arg18[%85, %c0_48] : memref<8x32xf32, #tpu.memory_space<vmem>>, vector<8x32xf32>
    %87 = vector.extract_strided_slice %86 {offsets = [0, 0], sizes = [8, 16], strides = [1, 1]} : vector<8x32xf32> to vector<8x16xf32>
    %88 = vector.shape_cast %87 : vector<8x16xf32> to vector<8x16x1xf32>
    %89 = vector.extract_strided_slice %86 {offsets = [0, 16], sizes = [8, 16], strides = [1, 1]} : vector<8x32xf32> to vector<8x16xf32>
    %90 = vector.shape_cast %89 : vector<8x16xf32> to vector<8x16x1xf32>
    %91 = vector.extract_strided_slice %82 {offsets = [0, 0], sizes = [1, 64], strides = [1, 1]} : vector<8x64xf32> to vector<1x64xf32>
    %92 = vector.broadcast %91 : vector<1x64xf32> to vector<16x64xf32>
    %93 = arith.mulf %92, %77 : vector<16x64xf32>
    %94 = math.exp %93 : vector<16x64xf32>
    %95 = arith.mulf %94, %78 : vector<16x64xf32>
    %96 = vector.extract_strided_slice %88 {offsets = [0, 0, 0], sizes = [1, 16, 1], strides = [1, 1, 1]} : vector<8x16x1xf32> to vector<1x16x1xf32>
    %97 = vector.shape_cast %96 : vector<1x16x1xf32> to vector<16x1xf32>
    %98 = vector.extract_strided_slice %84 {offsets = [0, 0], sizes = [1, 64], strides = [1, 1]} : vector<8x64xf32> to vector<1x64xf32>
    %99 = vector.broadcast %97 : vector<16x1xf32> to vector<16x64xf32>
    %100 = vector.broadcast %98 : vector<1x64xf32> to vector<16x64xf32>
    %101 = arith.mulf %99, %100 : vector<16x64xf32>
    %102 = arith.addf %95, %101 : vector<16x64xf32>
    %103 = vector.extract_strided_slice %90 {offsets = [0, 0, 0], sizes = [1, 16, 1], strides = [1, 1, 1]} : vector<8x16x1xf32> to vector<1x16x1xf32>
    %104 = vector.shape_cast %103 : vector<1x16x1xf32> to vector<16x1xf32>
    %105 = vector.broadcast %104 : vector<16x1xf32> to vector<16x64xf32>
    %106 = arith.mulf %105, %102 : vector<16x64xf32>
    %cst_49 = arith.constant dense<0.000000e+00> : vector<64xf32>
    %107 = vector.multi_reduction <add>, %106, %cst_49 [0] : vector<16x64xf32> to vector<64xf32>
    %108 = vector.shape_cast %107 : vector<64xf32> to vector<1x64xf32>
    %109 = vector.extract_strided_slice %82 {offsets = [1, 0], sizes = [1, 64], strides = [1, 1]} : vector<8x64xf32> to vector<1x64xf32>
    %110 = vector.broadcast %109 : vector<1x64xf32> to vector<16x64xf32>
    %111 = arith.mulf %110, %77 : vector<16x64xf32>
    %112 = math.exp %111 : vector<16x64xf32>
    %113 = arith.mulf %112, %102 : vector<16x64xf32>
    %114 = vector.extract_strided_slice %88 {offsets = [1, 0, 0], sizes = [1, 16, 1], strides = [1, 1, 1]} : vector<8x16x1xf32> to vector<1x16x1xf32>
    %115 = vector.shape_cast %114 : vector<1x16x1xf32> to vector<16x1xf32>
    %116 = vector.extract_strided_slice %84 {offsets = [1, 0], sizes = [1, 64], strides = [1, 1]} : vector<8x64xf32> to vector<1x64xf32>
    %117 = vector.broadcast %115 : vector<16x1xf32> to vector<16x64xf32>
    %118 = vector.broadcast %116 : vector<1x64xf32> to vector<16x64xf32>
    %119 = arith.mulf %117, %118 : vector<16x64xf32>
    %120 = arith.addf %113, %119 : vector<16x64xf32>
    %121 = vector.extract_strided_slice %90 {offsets = [1, 0, 0], sizes = [1, 16, 1], strides = [1, 1, 1]} : vector<8x16x1xf32> to vector<1x16x1xf32>
    %122 = vector.shape_cast %121 : vector<1x16x1xf32> to vector<16x1xf32>
    %123 = vector.broadcast %122 : vector<16x1xf32> to vector<16x64xf32>
    %124 = arith.mulf %123, %120 : vector<16x64xf32>
    %cst_50 = arith.constant dense<0.000000e+00> : vector<64xf32>
    %125 = vector.multi_reduction <add>, %124, %cst_50 [0] : vector<16x64xf32> to vector<64xf32>
    %126 = vector.shape_cast %125 : vector<64xf32> to vector<1x64xf32>
    %127 = vector.extract_strided_slice %82 {offsets = [2, 0], sizes = [1, 64], strides = [1, 1]} : vector<8x64xf32> to vector<1x64xf32>
    %128 = vector.broadcast %127 : vector<1x64xf32> to vector<16x64xf32>
    %129 = arith.mulf %128, %77 : vector<16x64xf32>
    %130 = math.exp %129 : vector<16x64xf32>
    %131 = arith.mulf %130, %120 : vector<16x64xf32>
    %132 = vector.extract_strided_slice %88 {offsets = [2, 0, 0], sizes = [1, 16, 1], strides = [1, 1, 1]} : vector<8x16x1xf32> to vector<1x16x1xf32>
    %133 = vector.shape_cast %132 : vector<1x16x1xf32> to vector<16x1xf32>
    %134 = vector.extract_strided_slice %84 {offsets = [2, 0], sizes = [1, 64], strides = [1, 1]} : vector<8x64xf32> to vector<1x64xf32>
    %135 = vector.broadcast %133 : vector<16x1xf32> to vector<16x64xf32>
    %136 = vector.broadcast %134 : vector<1x64xf32> to vector<16x64xf32>
    %137 = arith.mulf %135, %136 : vector<16x64xf32>
    %138 = arith.addf %131, %137 : vector<16x64xf32>
    %139 = vector.extract_strided_slice %90 {offsets = [2, 0, 0], sizes = [1, 16, 1], strides = [1, 1, 1]} : vector<8x16x1xf32> to vector<1x16x1xf32>
    %140 = vector.shape_cast %139 : vector<1x16x1xf32> to vector<16x1xf32>
    %141 = vector.broadcast %140 : vector<16x1xf32> to vector<16x64xf32>
    %142 = arith.mulf %141, %138 : vector<16x64xf32>
    %cst_51 = arith.constant dense<0.000000e+00> : vector<64xf32>
    %143 = vector.multi_reduction <add>, %142, %cst_51 [0] : vector<16x64xf32> to vector<64xf32>
    %144 = vector.shape_cast %143 : vector<64xf32> to vector<1x64xf32>
    %145 = vector.extract_strided_slice %82 {offsets = [3, 0], sizes = [1, 64], strides = [1, 1]} : vector<8x64xf32> to vector<1x64xf32>
    %146 = vector.broadcast %145 : vector<1x64xf32> to vector<16x64xf32>
    %147 = arith.mulf %146, %77 : vector<16x64xf32>
    %148 = math.exp %147 : vector<16x64xf32>
    %149 = arith.mulf %148, %138 : vector<16x64xf32>
    %150 = vector.extract_strided_slice %88 {offsets = [3, 0, 0], sizes = [1, 16, 1], strides = [1, 1, 1]} : vector<8x16x1xf32> to vector<1x16x1xf32>
    %151 = vector.shape_cast %150 : vector<1x16x1xf32> to vector<16x1xf32>
    %152 = vector.extract_strided_slice %84 {offsets = [3, 0], sizes = [1, 64], strides = [1, 1]} : vector<8x64xf32> to vector<1x64xf32>
    %153 = vector.broadcast %151 : vector<16x1xf32> to vector<16x64xf32>
    %154 = vector.broadcast %152 : vector<1x64xf32> to vector<16x64xf32>
    %155 = arith.mulf %153, %154 : vector<16x64xf32>
    %156 = arith.addf %149, %155 : vector<16x64xf32>
    %157 = vector.extract_strided_slice %90 {offsets = [3, 0, 0], sizes = [1, 16, 1], strides = [1, 1, 1]} : vector<8x16x1xf32> to vector<1x16x1xf32>
    %158 = vector.shape_cast %157 : vector<1x16x1xf32> to vector<16x1xf32>
    %159 = vector.broadcast %158 : vector<16x1xf32> to vector<16x64xf32>
    %160 = arith.mulf %159, %156 : vector<16x64xf32>
    %cst_52 = arith.constant dense<0.000000e+00> : vector<64xf32>
    %161 = vector.multi_reduction <add>, %160, %cst_52 [0] : vector<16x64xf32> to vector<64xf32>
    %162 = vector.shape_cast %161 : vector<64xf32> to vector<1x64xf32>
    %163 = vector.extract_strided_slice %82 {offsets = [4, 0], sizes = [1, 64], strides = [1, 1]} : vector<8x64xf32> to vector<1x64xf32>
    %164 = vector.broadcast %163 : vector<1x64xf32> to vector<16x64xf32>
    %165 = arith.mulf %164, %77 : vector<16x64xf32>
    %166 = math.exp %165 : vector<16x64xf32>
    %167 = arith.mulf %166, %156 : vector<16x64xf32>
    %168 = vector.extract_strided_slice %88 {offsets = [4, 0, 0], sizes = [1, 16, 1], strides = [1, 1, 1]} : vector<8x16x1xf32> to vector<1x16x1xf32>
    %169 = vector.shape_cast %168 : vector<1x16x1xf32> to vector<16x1xf32>
    %170 = vector.extract_strided_slice %84 {offsets = [4, 0], sizes = [1, 64], strides = [1, 1]} : vector<8x64xf32> to vector<1x64xf32>
    %171 = vector.broadcast %169 : vector<16x1xf32> to vector<16x64xf32>
    %172 = vector.broadcast %170 : vector<1x64xf32> to vector<16x64xf32>
    %173 = arith.mulf %171, %172 : vector<16x64xf32>
    %174 = arith.addf %167, %173 : vector<16x64xf32>
    %175 = vector.extract_strided_slice %90 {offsets = [4, 0, 0], sizes = [1, 16, 1], strides = [1, 1, 1]} : vector<8x16x1xf32> to vector<1x16x1xf32>
    %176 = vector.shape_cast %175 : vector<1x16x1xf32> to vector<16x1xf32>
    %177 = vector.broadcast %176 : vector<16x1xf32> to vector<16x64xf32>
    %178 = arith.mulf %177, %174 : vector<16x64xf32>
    %cst_53 = arith.constant dense<0.000000e+00> : vector<64xf32>
    %179 = vector.multi_reduction <add>, %178, %cst_53 [0] : vector<16x64xf32> to vector<64xf32>
    %180 = vector.shape_cast %179 : vector<64xf32> to vector<1x64xf32>
    %181 = vector.extract_strided_slice %82 {offsets = [5, 0], sizes = [1, 64], strides = [1, 1]} : vector<8x64xf32> to vector<1x64xf32>
    %182 = vector.broadcast %181 : vector<1x64xf32> to vector<16x64xf32>
    %183 = arith.mulf %182, %77 : vector<16x64xf32>
    %184 = math.exp %183 : vector<16x64xf32>
    %185 = arith.mulf %184, %174 : vector<16x64xf32>
    %186 = vector.extract_strided_slice %88 {offsets = [5, 0, 0], sizes = [1, 16, 1], strides = [1, 1, 1]} : vector<8x16x1xf32> to vector<1x16x1xf32>
    %187 = vector.shape_cast %186 : vector<1x16x1xf32> to vector<16x1xf32>
    %188 = vector.extract_strided_slice %84 {offsets = [5, 0], sizes = [1, 64], strides = [1, 1]} : vector<8x64xf32> to vector<1x64xf32>
    %189 = vector.broadcast %187 : vector<16x1xf32> to vector<16x64xf32>
    %190 = vector.broadcast %188 : vector<1x64xf32> to vector<16x64xf32>
    %191 = arith.mulf %189, %190 : vector<16x64xf32>
    %192 = arith.addf %185, %191 : vector<16x64xf32>
    %193 = vector.extract_strided_slice %90 {offsets = [5, 0, 0], sizes = [1, 16, 1], strides = [1, 1, 1]} : vector<8x16x1xf32> to vector<1x16x1xf32>
    %194 = vector.shape_cast %193 : vector<1x16x1xf32> to vector<16x1xf32>
    %195 = vector.broadcast %194 : vector<16x1xf32> to vector<16x64xf32>
    %196 = arith.mulf %195, %192 : vector<16x64xf32>
    %cst_54 = arith.constant dense<0.000000e+00> : vector<64xf32>
    %197 = vector.multi_reduction <add>, %196, %cst_54 [0] : vector<16x64xf32> to vector<64xf32>
    %198 = vector.shape_cast %197 : vector<64xf32> to vector<1x64xf32>
    %199 = vector.extract_strided_slice %82 {offsets = [6, 0], sizes = [1, 64], strides = [1, 1]} : vector<8x64xf32> to vector<1x64xf32>
    %200 = vector.broadcast %199 : vector<1x64xf32> to vector<16x64xf32>
    %201 = arith.mulf %200, %77 : vector<16x64xf32>
    %202 = math.exp %201 : vector<16x64xf32>
    %203 = arith.mulf %202, %192 : vector<16x64xf32>
    %204 = vector.extract_strided_slice %88 {offsets = [6, 0, 0], sizes = [1, 16, 1], strides = [1, 1, 1]} : vector<8x16x1xf32> to vector<1x16x1xf32>
    %205 = vector.shape_cast %204 : vector<1x16x1xf32> to vector<16x1xf32>
    %206 = vector.extract_strided_slice %84 {offsets = [6, 0], sizes = [1, 64], strides = [1, 1]} : vector<8x64xf32> to vector<1x64xf32>
    %207 = vector.broadcast %205 : vector<16x1xf32> to vector<16x64xf32>
    %208 = vector.broadcast %206 : vector<1x64xf32> to vector<16x64xf32>
    %209 = arith.mulf %207, %208 : vector<16x64xf32>
    %210 = arith.addf %203, %209 : vector<16x64xf32>
    %211 = vector.extract_strided_slice %90 {offsets = [6, 0, 0], sizes = [1, 16, 1], strides = [1, 1, 1]} : vector<8x16x1xf32> to vector<1x16x1xf32>
    %212 = vector.shape_cast %211 : vector<1x16x1xf32> to vector<16x1xf32>
    %213 = vector.broadcast %212 : vector<16x1xf32> to vector<16x64xf32>
    %214 = arith.mulf %213, %210 : vector<16x64xf32>
    %cst_55 = arith.constant dense<0.000000e+00> : vector<64xf32>
    %215 = vector.multi_reduction <add>, %214, %cst_55 [0] : vector<16x64xf32> to vector<64xf32>
    %216 = vector.shape_cast %215 : vector<64xf32> to vector<1x64xf32>
    %217 = vector.extract_strided_slice %82 {offsets = [7, 0], sizes = [1, 64], strides = [1, 1]} : vector<8x64xf32> to vector<1x64xf32>
    %218 = vector.broadcast %217 : vector<1x64xf32> to vector<16x64xf32>
    %219 = arith.mulf %218, %77 : vector<16x64xf32>
    %220 = math.exp %219 : vector<16x64xf32>
    %221 = arith.mulf %220, %210 : vector<16x64xf32>
    %222 = vector.extract_strided_slice %88 {offsets = [7, 0, 0], sizes = [1, 16, 1], strides = [1, 1, 1]} : vector<8x16x1xf32> to vector<1x16x1xf32>
    %223 = vector.shape_cast %222 : vector<1x16x1xf32> to vector<16x1xf32>
    %224 = vector.extract_strided_slice %84 {offsets = [7, 0], sizes = [1, 64], strides = [1, 1]} : vector<8x64xf32> to vector<1x64xf32>
    %225 = vector.broadcast %223 : vector<16x1xf32> to vector<16x64xf32>
    %226 = vector.broadcast %224 : vector<1x64xf32> to vector<16x64xf32>
    %227 = arith.mulf %225, %226 : vector<16x64xf32>
    %228 = arith.addf %221, %227 : vector<16x64xf32>
    %229 = vector.extract_strided_slice %90 {offsets = [7, 0, 0], sizes = [1, 16, 1], strides = [1, 1, 1]} : vector<8x16x1xf32> to vector<1x16x1xf32>
    %230 = vector.shape_cast %229 : vector<1x16x1xf32> to vector<16x1xf32>
    %231 = vector.broadcast %230 : vector<16x1xf32> to vector<16x64xf32>
    %232 = arith.mulf %231, %228 : vector<16x64xf32>
    %cst_56 = arith.constant dense<0.000000e+00> : vector<64xf32>
    %233 = vector.multi_reduction <add>, %232, %cst_56 [0] : vector<16x64xf32> to vector<64xf32>
    %234 = vector.shape_cast %233 : vector<64xf32> to vector<1x64xf32>
    %235 = tpu.concatenate %108, %126, %144, %162, %180, %198, %216, %234 in 0 : vector<1x64xf32>, vector<1x64xf32>, vector<1x64xf32>, vector<1x64xf32>, vector<1x64xf32>, vector<1x64xf32>, vector<1x64xf32>, vector<1x64xf32> -> vector<8x64xf32>
    %236 = arith.index_cast %80 : i32 to index
    %c0_57 = arith.constant 0 : index
    %237 = vector.load %arg19[%236, %c0_57] : memref<8x64xf32, #tpu.memory_space<vmem>>, vector<8x64xf32>
    tpu.vector_store %arg19[%236, %c0_57], %235 {strides = array<i32>} : memref<8x64xf32, #tpu.memory_space<vmem>>, vector<8x64xf32>,
    %c1_i32 = arith.constant 1 : i32
    %c0_58 = arith.constant 0 : index
    %c0_59 = arith.constant 0 : index
    %238 = vector.load %arg20[%c0_58, %c0_59] : memref<16x64xf32, #tpu.memory_space<vmem>>, vector<16x64xf32>
    tpu.vector_store %arg20[%c0_58, %c0_59], %228 {strides = array<i32>} : memref<16x64xf32, #tpu.memory_space<vmem>>, vector<16x64xf32>,
    %c0_60 = arith.constant 0 : index
    %c0_61 = arith.constant 0 : index
    %239 = vector.load %arg19[%c0_60, %c0_61] : memref<8x64xf32, #tpu.memory_space<vmem>>, vector<8x64xf32>
    %c0_62 = arith.constant 0 : index
    %c0_63 = arith.constant 0 : index
    %240 = vector.load %arg12[%c0_62, %c0_63] : memref<1x64xf32, #tpu.memory_space<vmem>>, vector<1x64xf32>
    %c0_64 = arith.constant 0 : index
    %c0_65 = arith.constant 0 : index
    %241 = vector.load %arg17[%c0_64, %c0_65] : memref<8x64xf32, #tpu.memory_space<vmem>>, vector<8x64xf32>
    %242 = vector.broadcast %240 : vector<1x64xf32> to vector<8x64xf32>
    %243 = arith.mulf %242, %241 : vector<8x64xf32>
    %244 = arith.addf %239, %243 : vector<8x64xf32>
    %c0_66 = arith.constant 0 : index
    %c0_67 = arith.constant 0 : index
    %c0_68 = arith.constant 0 : index
    %245 = vector.load %arg2[%c0_66, %c0_67, %c0_68] : memref<1x8x32xf32, #tpu.memory_space<vmem>>, vector<1x8x32xf32>
    %246 = vector.shape_cast %245 : vector<1x8x32xf32> to vector<8x32xf32>
    %247 = arith.mulf %246, %246 : vector<8x32xf32>
    %cst_69 = arith.constant dense<0.000000e+00> : vector<8xf32>
    %248 = vector.multi_reduction <add>, %247, %cst_69 [1] : vector<8x32xf32> to vector<8xf32>
    %249 = vector.shape_cast %248 : vector<8xf32> to vector<8x1xf32>
    %cst_70 = arith.constant 3.200000e+01 : f32
    %250 = vector.broadcast %cst_70 : f32 to vector<8x1xf32>
    %251 = arith.divf %249, %250 : vector<8x1xf32>
    %cst_71 = arith.constant 9.99999974E-6 : f32
    %252 = vector.broadcast %cst_71 : f32 to vector<8x1xf32>
    %253 = arith.addf %251, %252 : vector<8x1xf32>
    %254 = math.rsqrt %253 : vector<8x1xf32>
    %255 = vector.broadcast %254 : vector<8x1xf32> to vector<8x32xf32>
    %256 = arith.mulf %246, %255 : vector<8x32xf32>
    %c0_72 = arith.constant 0 : index
    %c0_73 = arith.constant 0 : index
    %257 = vector.load %arg3[%c0_72, %c0_73] : memref<1x32xf32, #tpu.memory_space<vmem>>, vector<1x32xf32>
    %258 = vector.broadcast %257 : vector<1x32xf32> to vector<8x32xf32>
    %259 = arith.mulf %256, %258 : vector<8x32xf32>
    %260 = arith.truncf %259 : vector<8x32xf32> to vector<8x32xbf16>
    %c0_74 = arith.constant 0 : index
    %c0_75 = arith.constant 0 : index
    %261 = vector.load %arg5[%c0_74, %c0_75] : memref<32x64xbf16, #tpu.memory_space<vmem>>, vector<32x64xbf16>
    %cst_76 = arith.constant dense<0.000000e+00> : vector<8x64xf32>
    %262 = tpu.matmul %260, %261, %cst_76 {dimension_numbers = #tpu.dot_dimension_numbers<[1], [0], [0], [1], [0, 0, 1, 1], [], []>} : vector<8x32xbf16>, vector<32x64xbf16>, vector<8x64xf32> -> vector<8x64xf32>
    %263 = arith.negf %262 : vector<8x64xf32>
    %264 = math.exp %263 : vector<8x64xf32>
    %cst_77 = arith.constant 1.000000e+00 : f32
    %265 = vector.broadcast %cst_77 : f32 to vector<8x64xf32>
    %266 = arith.addf %265, %264 : vector<8x64xf32>
    %267 = arith.divf %265, %266 : vector<8x64xf32>
    %268 = arith.mulf %262, %267 : vector<8x64xf32>
    %269 = arith.mulf %244, %268 : vector<8x64xf32>
    %270 = arith.truncf %269 : vector<8x64xf32> to vector<8x64xbf16>
    %c0_78 = arith.constant 0 : index
    %c0_79 = arith.constant 0 : index
    %271 = vector.load %arg13[%c0_78, %c0_79] : memref<64x32xbf16, #tpu.memory_space<vmem>>, vector<64x32xbf16>
    %cst_80 = arith.constant dense<0.000000e+00> : vector<8x32xf32>
    %272 = tpu.matmul %270, %271, %cst_80 {dimension_numbers = #tpu.dot_dimension_numbers<[1], [0], [0], [1], [0, 0, 1, 1], [], []>} : vector<8x64xbf16>, vector<64x32xbf16>, vector<8x32xf32> -> vector<8x32xf32>
    %273 = arith.addf %246, %272 : vector<8x32xf32>
    %c0_81 = arith.constant 0 : index
    %c0_82 = arith.constant 0 : index
    %c0_83 = arith.constant 0 : index
    %274 = vector.load %arg14[%c0_81, %c0_82, %c0_83] : memref<1x8x32xf32, #tpu.memory_space<vmem>>, vector<1x8x32xf32>
    %275 = vector.shape_cast %274 : vector<1x8x32xf32> to vector<8x32xf32>
    %276 = vector.shape_cast %273 : vector<8x32xf32> to vector<1x8x32xf32>
    tpu.vector_store %arg14[%c0_81, %c0_82, %c0_83], %276 {strides = array<i32>} : memref<1x8x32xf32, #tpu.memory_space<vmem>>, vector<1x8x32xf32>,
    return
  }
  func.func @transform_0(%arg0: i32, %arg1: i32) -> (i32, i32, i32) {
    %c0_i32 = arith.constant 0 : i32
    %c0_i32_0 = arith.constant 0 : i32
    return %arg0, %arg1, %c0_i32 : i32, i32, i32
  }
  func.func @transform_1(%arg0: i32, %arg1: i32) -> (i32, i32) {
    %c0_i32 = arith.constant 0 : i32
    %c0_i32_0 = arith.constant 0 : i32
    %c0_i32_1 = arith.constant 0 : i32
    return %c0_i32, %c0_i32_0 : i32, i32
  }
  func.func @transform_2(%arg0: i32, %arg1: i32) -> (i32, i32) {
    %c0_i32 = arith.constant 0 : i32
    %c0_i32_0 = arith.constant 0 : i32
    %c0_i32_1 = arith.constant 0 : i32
    return %c0_i32, %c0_i32_0 : i32, i32
  }
  func.func @transform_3(%arg0: i32, %arg1: i32) -> (i32, i32) {
    %c0_i32 = arith.constant 0 : i32
    %c0_i32_0 = arith.constant 0 : i32
    %c0_i32_1 = arith.constant 0 : i32
    return %c0_i32, %c0_i32_0 : i32, i32
  }
  func.func @transform_4(%arg0: i32, %arg1: i32) -> (i32, i32) {
    %c0_i32 = arith.constant 0 : i32
    %c0_i32_0 = arith.constant 0 : i32
    %c0_i32_1 = arith.constant 0 : i32
    return %c0_i32, %c0_i32_0 : i32, i32
  }
  func.func @transform_5(%arg0: i32, %arg1: i32) -> (i32, i32) {
    %c0_i32 = arith.constant 0 : i32
    %c0_i32_0 = arith.constant 0 : i32
    %c0_i32_1 = arith.constant 0 : i32
    return %c0_i32, %c0_i32_0 : i32, i32
  }
  func.func @transform_6(%arg0: i32, %arg1: i32) -> (i32, i32) {
    %c0_i32 = arith.constant 0 : i32
    %c0_i32_0 = arith.constant 0 : i32
    %c0_i32_1 = arith.constant 0 : i32
    return %c0_i32, %c0_i32_0 : i32, i32
  }
  func.func @transform_7(%arg0: i32, %arg1: i32) -> (i32, i32) {
    %c0_i32 = arith.constant 0 : i32
    %c0_i32_0 = arith.constant 0 : i32
    %c0_i32_1 = arith.constant 0 : i32
    return %c0_i32, %c0_i32_0 : i32, i32
  }
  func.func @transform_8(%arg0: i32, %arg1: i32) -> (i32, i32) {
    %c0_i32 = arith.constant 0 : i32
    %c0_i32_0 = arith.constant 0 : i32
    %c0_i32_1 = arith.constant 0 : i32
    return %c0_i32, %c0_i32_0 : i32, i32
  }
  func.func @transform_9(%arg0: i32, %arg1: i32) -> (i32, i32) {
    %c0_i32 = arith.constant 0 : i32
    %c0_i32_0 = arith.constant 0 : i32
    %c0_i32_1 = arith.constant 0 : i32
    return %c0_i32, %c0_i32_0 : i32, i32
  }
  func.func @transform_10(%arg0: i32, %arg1: i32) -> (i32, i32) {
    %c0_i32 = arith.constant 0 : i32
    %c0_i32_0 = arith.constant 0 : i32
    %c0_i32_1 = arith.constant 0 : i32
    return %c0_i32, %c0_i32_0 : i32, i32
  }
  func.func @transform_11(%arg0: i32, %arg1: i32) -> (i32, i32) {
    %c0_i32 = arith.constant 0 : i32
    %c0_i32_0 = arith.constant 0 : i32
    %c0_i32_1 = arith.constant 0 : i32
    return %c0_i32, %c0_i32_0 : i32, i32
  }
  func.func @transform_12(%arg0: i32, %arg1: i32) -> (i32, i32, i32) {
    %c0_i32 = arith.constant 0 : i32
    %c0_i32_0 = arith.constant 0 : i32
    return %arg0, %arg1, %c0_i32 : i32, i32, i32
  }
}

</mosaic_0001>

<bundles_post_ra>
// kernel: tpu_custom_call.1
= control target key start
LH: loop header
LB: loop body
LE: loop exit
PB: predicated region body
PF: predicated region fallthrough
CT: control target
= control target key end

     0   :  { %s2435_s0 = inlined_call_operand.vmem [shape: f32[2,8,32], index: 0, kind: input, shape index: {}]   ;;  %s2436_s1 = inlined_call_operand.hbm [shape: f32[1,32], index: 1, kind: input, shape index: {}]   ;;  %s2437_s2 = inlined_call_operand.vmem [shape: bf16[32,64], index: 2, kind: input, shape index: {}]   ;;  %s2438_s3 = inlined_call_operand.vmem [shape: bf16[32,64], index: 3, kind: input, shape index: {}]   ;;  %s2439_s4 = inlined_call_operand.hbm [shape: f32[4,64], index: 4, kind: input, shape index: {}]   ;;  %s2440_s5 = inlined_call_operand.vmem [shape: f32[1,64], index: 5, kind: input, shape index: {}]   ;;  %s2441_s6 = inlined_call_operand.vmem [shape: bf16[64,64], index: 6, kind: input, shape index: {}]   ;;  %s2442_s7 = inlined_call_operand.vmem [shape: f32[1,64], index: 7, kind: input, shape index: {}]   ;;  %s2443_s8 = inlined_call_operand.vmem [shape: bf16[64,32], index: 8, kind: input, shape index: {}]   ;;  %s2444_s9 = inlined_call_operand.hbm [shape: f32[16,64], index: 9, kind: input, shape index: {}]   ;;  %s2445_s10 = inlined_call_operand.vmem [shape: f32[1,64], index: 10, kind: input, shape index: {}]   ;;  %s2446_s11 = inlined_call_operand.vmem [shape: bf16[64,32], index: 11, kind: input, shape index: {}]   ;;  %s2447_s12 = inlined_call_operand.hbm [shape: f32[2,8,32], index: 12, kind: output, shape index: {}]  }
   0x1   :  { %2457 = sst [smem:[#allocation27_spill]] %s2439_s4 }
   0x2   :  { %17 = vsyncpa [#allocation10], 0 }
   0x3   :  { %18 = vsyncpa [#allocation13], 0 }
   0x4   :  { %19 = vsyncpa [#allocation11], 0 }
   0x5   :  { %21 = vsyncpa [#allocation11 + $0x1], 0  ;;  %s1954_s21 = smov 0   ;;  %s1956_s22 = smov 0  }
   0x6   :  { %s1958_s23 = smov 0   ;;  %s1960_s24 = smov 0  }
   0x7   :  { %s1962_s25 = smov 0   ;;  %s1964_s26 = smov 0  }
   0x8 LB: > { %2458 = sst [smem:[#allocation19_spill]] %s1860_s21  ;;  %s1426_s27 = sadd.s32 4294967295, %s1880_s26   ;;  %s1880_s26 = sphi %s1964_s26, %s27_s26   ;;  %s1876_s25 = sphi %s1962_s25, %s2479_s25   ;;  %s1872_s24 = sphi %s1960_s24, %s2478_s24   ;;  %s1868_s23 = sphi %s1958_s23, %s2477_s23   ;;  %s1864_s22 = sphi %s1956_s22, %s2481_s22   ;;  %s1860_s21 = sphi %s1954_s21, %s2480_s21  }
   0x9   : > { %2459 = sst [smem:[#allocation20_spill]] %s1868_s23  ;;  %s1427_s28 = sadd.s32 4294967294, %s1880_s26  }
   0xa   : > { %2460 = sst [smem:[#allocation21_spill]] %s1876_s25  ;;  %s39_s29 = sadd.s32 1, %s1876_s25 }
   0xb   : > { %2461 = sst [smem:[#allocation22_spill]] %s1880_s26  ;;  %s307_s30 = sadd.s32 1, %s1868_s23 }
   0xc   : > { %p41_p0 = scmp.ge.s32.totalorder %s39_s29, 2  ;;  %p317_p1 = scmp.ne.s32.totalorder %s1868_s23, %s1864_s22 }
   0xd   : > { %p318_p2 = scmp.eq.s32.totalorder %s1426_s27, 1  ;;  %p323_p3 = scmp.ne.s32.totalorder %s1864_s22, %s1860_s21 }
   0xe   : > { %s2483_s29 = smov (%p41_p0, %s39_s29), 0  ;;  %p324_p5 = scmp.eq.s32.totalorder %s1427_s28, 1 }
   0xf   : > { %2462 = sst [smem:[#allocation23_spill]] %s2483_s29  ;;  %p1994_p4 = por %p318_p2, %p317_p1 }
  0x10   : > { %s302_s14 = ssub.s32 %s1876_s25, %s2483_s29  ;;  %p1428_p6 = scmp.ge.s32.totalorder %s1880_s26, 1 }
  0x11   : > { %s2463_s13 = scalar_select %p1994_p4, 1, 0 }
  0x12   : > { %p305_p7 = scmp.eq.s32.totalorder %s302_s14, 0  ;;  %p2001_p8 = por %p324_p5, %p323_p3 }
  0x13   : > { %2464 = sst [smem:[#allocation24_spill]] %s2463_s13  ;;  %p331_p9 = scmp.lt.s32.totalorder %s1880_s26, 3 }
  0x14   : > { %s2465_s15 = scalar_select %p2001_p8, 1, 0 }
  0x15   : > { %s2007_s16 = scalar_select %p305_p7, %s1868_s23, %s307_s30  }
  0x16   : > { %2466 = sst [smem:[#allocation25_spill]] %s2465_s15  ;;  %p2009_p10 = pnand %p1428_p6, %p331_p9 }
  0x17   : > { %2467 = sst [smem:[#allocation26_spill]] %s2007_s16  ;;  %p2013_p11 = scmp.eq.s32.totalorder %s1426_s27, 0 }
  0x18   : > { %s2470_s4 = sld [smem:[#allocation27_spill]]  ;;  %p1544_p12 = pneg %p2009_p10 }
  0x19   : > { %s1882_s14 = smov [#allocation12]   ;;  %s343_s19 = sshll.u32 %s2436_s1, 4  ;;  %s344_s19 = int_to_ptr.hbm [resolvable:$true] %s343_s19 }
  0x1a   : > { %s363_s30 = sshll.u32 %s1882_s14, 4  ;;  %p2024_p13 = pnand %p2013_p11, %p1544_p12  ;;  %s364_s30 = int_to_ptr.vmem [resolvable:$true] %s363_s30 }
  0x1b   : > { %s384_s14 = sshll.u32 %s2444_s9, 4  ;;  %s1883_s16 = smov [#allocation9]   ;;  %s385_s14 = int_to_ptr.hbm [resolvable:$true] %s384_s14 }
  0x1c   : > { %s345_s23 = sshll.u32 %s1883_s16, 4  ;;  %s1884_s15 = smov [#allocation14]   ;;  %s346_s23 = int_to_ptr.vmem [resolvable:$true] %s345_s23 }
  0x1d   : > { %1547 = dma.hbm_to_vmem [thread:$0]  (!%p2024_p13), %s344_s19, 16, %s346_s23, [#allocation10]  }
  0x1e   : > { %s361_s28 = sshll.u32 %s2470_s4, 4  ;;  %s386_s21 = sshll.u32 %s1884_s15, 4  ;;  %s362_s28 = int_to_ptr.hbm [resolvable:$true] %s361_s28  ;;  %s387_s21 = int_to_ptr.vmem [resolvable:$true] %s386_s21 }
  0x1f   : > { %1550 = dma.hbm_to_vmem [thread:$0]  (!%p2024_p13), %s362_s28, 64, %s364_s30, [#allocation13]  }
  0x20   : > { %s1885_s26 = smov 128   ;;  %s1886_s13 = smov 8  }
  0x21   : > { %1553 = dma.hbm_to_vmem [thread:$0]  (!%p2024_p13), %s385_s14, 256, %s387_s21, [#allocation13], %s1885_s26, %s1885_s26, %s1886_s13  }
  0x22   : > { %418 = sbr.rel (%p2009_p10) target bundleno = 946 (0x3b2), region = 68 }
  0x27   : > { %1847 = dma.done.wait (%p2013_p11), [#allocation10], 16  }
  0x28   : > { %1849 = vsyncadd (%p2013_p11), [#allocation10], 4294967280 }
  0x29   : > { %1851 = dma.done.wait (%p2013_p11), [#allocation13], 320  }
  0x2a   : > { %1853 = vsyncadd (%p2013_p11), [#allocation13], 4294966976  ;;  %p473_p0 = scmp.lt.s32.totalorder %s1872_s24, 1  ;;  %vm492_vm0 = vcmask 261120   ;;  %v1887_v3 = vmov 32.0   ;;  %v1515_v7 = vld [vmem:[%s2437_s2 + $0x8] sm:$0xff] }
  0x2b   : > { %1649 = vrcp.f32 %v1887_v3  ;;  %547 = vmatpush.bf16.msra.mxu0 %v1515_v7  ;;  %v1514_v9 = vld [vmem:[%s2437_s2] sm:$0xff]  ;;  %vm485_vm2 = vcmask 523264   ;;  %vm488_vm3 = vcmask 518144   ;;  %v1888_v12 = vmov 0.0   ;;  %v1640_v22 = vld [vmem:[#allocation9] ss:$0 sm:$0xff] }
  0x2c   : > { %s474_s4 = scalar_select %p473_p0, %s1872_s24, 1  ;;  %486 = vst.msk [vmem:[#allocation7] sm:$0xff] %vm485_vm2, %v1888_v12  ;;  %v1519_v27 = vld [vmem:[%s2441_s6 + $0x18] sm:$0xff]  ;;  %v1518_v29 = vld [vmem:[%s2441_s6 + $0x10] sm:$0xff]  ;;  %v1517_v31 = vld [vmem:[%s2441_s6 + $0x8] sm:$0xff]  ;;  %vm599_vm7 = vcmask 523269  }
  0x2d   : > { %487 = vst.msk [vmem:[#allocation7 + $0x8] sm:$0xff] %vm485_vm2, %v1888_v12  ;;  %v1523_v28 = vld [vmem:[%s2443_s8 + $0x18] sm:$0xff]  ;;  %672 = vmatpush.bf16.msra.mxu1 %v1519_v27  ;;  %v1522_v30 = vld [vmem:[%s2443_s8 + $0x10] sm:$0xff]  ;;  %v1521_v32 = vld [vmem:[%s2443_s8 + $0x8] sm:$0xff]  ;;  %vm558_vm8 = vcmask 1042432   ;;  %vm569_vm9 = vcmask 1046528  }
  0x2e   : > { %s1438_s21 = sshll.u32 %s474_s4, 3  ;;  %489 = vst.msk [vmem:[#allocation8] sm:$0x7] %vm488_vm3, %v1888_v12  ;;  %735 = vmatpush.bf16.msra.mxu2 %v1523_v28  ;;  %v1516_v33 = vld [vmem:[%s2441_s6] sm:$0xff]  ;;  %v1642_v36 = vld [vmem:[#allocation12 + $0x1] ss:$0 sm:$0xff] }
  0x2f   : > { %s2055_s26 = scalar_lea.vmem %s2435_s0, %s1438_s21  ;;  %548 = vmatpush.bf16.msra.mxu0 %v1514_v9  ;;  %v1520_v34 = vld [vmem:[%s2443_s8] sm:$0xff]  ;;  %v1641_v42 = vld [vmem:[#allocation12] ss:$0 sm:$0xff]  ;;  %vm581_vm10 = vcmask 1045504   ;;  %vm593_vm11 = vcmask 1044480   ;;  %s470_s28 = sand.u32 1, %s1864_s22  }
  0x30   : > { %v2058_v0 = vld [vmem:[%s2055_s26] sm:$0xff]  ;;  %s1511_s30 = sshll.u32 %s1872_s24, 3  ;;  %s1437_s27 = sshll.u32 %s470_s28, 3 }
  0x31   : > { %v491_v1 = vmul.f32 %v2058_v0, %v2058_v0  ;;  %v1650_v4 = vpop.eup %1649  ;;  %673 = vmatpush.bf16.msra.mxu1 %v1518_v29  ;;  %v1643_v37 = vld [vmem:[#allocation12 + $0x2] ss:$0 sm:$0xff]  ;;  %v1644_v39 = vld [vmem:[#allocation12 + $0x3] ss:$0 sm:$0xff]  ;;  %s1319_s4 = scalar_lea.hbm %s2447_s12, %s1511_s30  ;;  %s472_s21 = scalar_lea.vmem [#allocation15], %s1437_s27 }
  0x32   : > { %v497_v5 = vmul.f32 32.0, %v1650_v4  ;;  %vm501_vm1 = vweird.f32 %v1650_v4  ;;  %736 = vmatpush.bf16.msra.mxu2 %v1522_v30  ;;  %v1645_v61 = vld [vmem:[%s2440_s5] ss:$0 sm:$0xff]  ;;  %s1321_s23 = sshll.u32 %s472_s21, 4  ;;  %s1323_s25 = sshll.u32 %s1319_s4, 4  ;;  %s1322_s23 = int_to_ptr.vmem [resolvable:$true] %s1321_s23  ;;  %s1324_s25 = int_to_ptr.hbm [resolvable:$true] %s1323_s25 }
  0x33   : > { %v493_v2 = vsel %vm492_vm0, %v491_v1, 0.0  ;;  %s1308_s29 = scalar_lea.sflag [#allocation11], %s470_s28  ;;  %s1808_s13 = sshra.s32 %s1324_s25, 4  ;;  %s1809_s13 = int_to_ptr.hbm [resolvable:$true] %s1808_s13 }
  0x34   : > { %494 = vadd.xlane.f32.xlu0 %v493_v2  ;;  %v498_v6 = vsub.f32 1.0, %v497_v5  ;;  %s1810_s24 = scalar_lea.hbm %s1809_s13, 8  ;;  %s1814_s17 = scalar_lea.hbm %s2447_s12, 16 }
  0x35   : > { %674 = vmatpush.bf16.msra.mxu1 %v1517_v31  ;;  %v554_v35 = vld [vmem:[#allocation8] sm:$0x7]  ;;  %p1811_p1 = scmp.ne.s32.totalorder %s1809_s13, %s1810_s24  ;;  %p1815_p5 = scmp.lt.s32.totalorder %s1809_s13, %s2447_s12 }
  0x36   : > { %v499_v8 = vmul.f32 %v1650_v4, %v498_v6  ;;  %737 = vmatpush.bf16.msra.mxu2 %v1521_v32  ;;  %p1816_p6 = scmp.lt.s32.totalorder %s1814_s17, %s1810_s24 }
  0x37   : > { %p1812_p2 = pnand %p1811_p1, %p1994_p4 }
  0x38   : > { %v500_v10 = vadd.f32 %v1650_v4, %v499_v8  ;;  %p1817_p7 = por %p1816_p6, %p1815_p5 }
  0x39   : > { %675 = vmatpush.bf16.msra.mxu1 %v1516_v33  ;;  %p1813_p3 = pneg %p1812_p2 }
  0x3a   : > { %v2069_v11 = vsel %vm501_vm1, %v1650_v4, %v500_v10  ;;  %738 = vmatpush.bf16.msra.mxu2 %v1520_v34 }
  0x3b   : > { %p1818_p9 = pnand %p1817_p7, %p1813_p3 }
  0x3c   : > { %1182 = vadd.xlane.f32.xlu0 %v493_v2 }
  0xa7   : > { %v495_v13 = vpop.xlane.xlu0 %494 }
  0xa8   : > { %v503_v14 = vmul.f32 %v2069_v11, %v495_v13 }
  0xaa   : > { %v504_v15 = vadd.f32 1e-05, %v503_v14 }
  0xac   : > { %1651 = vrsqrt.f32 %v504_v15  ;;  %vm511_vm5 = vweird.f32 %v504_v15 }
  0xb2   : > { %v1652_v16 = vpop.eup %1651 }
  0xb3   : > { %v506_v17 = vmul.f32 %v1652_v16, %v504_v15  ;;  %vm512_vm4 = vweird.f32 %v1652_v16 }
  0xb4   : > { %vm513_vm6 = vmor %vm511_vm5, %vm512_vm4 }
  0xb5   : > { %v507_v18 = vmul.f32 %v1652_v16, %v506_v17 }
  0xb7   : > { %v508_v19 = vmul.f32 0.5, %v507_v18  ;;  %v759_v18 = vlaneseq }
  0xb9   : > { %v509_v20 = vsub.f32 1.5, %v508_v19  ;;  %v2110_v19 = vshrl.u32 %v759_v18, 7 }
  0xbb   : > { %v510_v21 = vmul.f32 %v1652_v16, %v509_v20  ;;  %1624 = vset.pattern.permute.xlu0 %v2110_v19  ;;  %1622 = vset.pattern.permute.xlu2 %v2110_v19  ;;  %v1646_v20 = vld [vmem:[%s2442_s7] ss:$0 sm:$0xff] }
  0xbc   : > { %1620 = vset.pattern.permute.xlu1 %v2110_v19 }
  0xbd   : > { %v514_v23 = vsel %vm513_vm6, %v1652_v16, %v510_v21  ;;  %vm1158_vm6 = vcmask 1040384  }
  0xbe   : > { %v515_v24 = vmul.f32 %v514_v23, %v2058_v0 }
  0xc0   : > { %v520_v25 = vmul.f32 %v1640_v22, %v515_v24 }
  0xc2   : > { %v521_v26 = vpack.c.bf16 %v520_v25, %v520_v25 }
  0xc4   : > { %1447 = vmatmul.msk.bf16.vlgmr.msra.gmra.mxu0 %vm492_vm0, %v521_v26 }
 0x141   : > { %v550_v38 = vpop.f32.mrf.mxu0 }
 0x142   : > { %v556_v40 = vrot.slane %v550_v38, 5  ;;  %600 = vst.msk [vmem:[#allocation8 - $0x5] sm:$0xe0] %vm599_vm7, %v550_v38  ;;  %v2137_v38 = vadd.s32 8, %v2110_v19  ;;  %vm1160_vm7 = vcmask 1041408  }
 0x144   : > { %v559_v41 = vsel %vm558_vm8, %v554_v35, %v556_v40  ;;  %v566_v43 = vmul.f32 %v1642_v36, %v556_v40  ;;  %v578_v44 = vmul.f32 %v1643_v37, %v556_v40  ;;  %v590_v48 = vmul.f32 %v1644_v39, %v556_v40 }
 0x145   : > { %v565_v45 = vmul.f32 %v1642_v36, %v559_v41  ;;  %v577_v46 = vmul.f32 %v1643_v37, %v559_v41  ;;  %v589_v47 = vmul.f32 %v1644_v39, %v559_v41  ;;  %v562_v53 = vmul.f32 %v1641_v42, %v559_v41 }
 0x146   : > { %v571_v49 = vrot.slane %v566_v43, 1  ;;  %v583_v52 = vrot.slane %v578_v44, 2  ;;  %v595_v56 = vrot.slane %v590_v48, 3  ;;  %v2134_v37 = vadd.s32 24, %v2110_v19 }
 0x147   : > { %v570_v50 = vrot.slane %v565_v45, 1  ;;  %v582_v51 = vrot.slane %v577_v46, 2  ;;  %v594_v55 = vrot.slane %v589_v47, 3  ;;  %v1183_v47 = vpop.xlane.xlu0 %1182 }
 0x148   : > { %v1184_v48 = vmul.f32 %v1183_v47, %v2069_v11 }
 0x149   : > { %v572_v54 = vsel %vm569_vm9, %v570_v50, %v571_v49  ;;  %v552_v57 = vpop.f32.mrf.mxu0  ;;  %v584_v59 = vsel %vm581_vm10, %v582_v51, %v583_v52  ;;  %v596_v62 = vsel %vm593_vm11, %v594_v55, %v595_v56 }
 0x14a   : > { %v574_v58 = vadd.f32 %v572_v54, %v562_v53  ;;  %v1185_v49 = vadd.f32 1e-05, %v1184_v48 }
 0x14c   : > { %v586_v60 = vadd.f32 %v584_v59, %v574_v58  ;;  %vm1192_vm3 = vweird.f32 %v1185_v49  ;;  %v1525_v59 = vld [vmem:[%s2438_s3 + $0x8] sm:$0xff] }
 0x14d   : > { %1228 = vmatpush.bf16.msra.mxu3 %v1525_v59 }
 0x14e   : > { %v598_v63 = vadd.f32 %v596_v62, %v586_v60  ;;  %v1524_v60 = vld [vmem:[%s2438_s3] sm:$0xff] }
 0x150   : > { %v605_v1 = vadd.f32 %v1645_v61, %v598_v63  ;;  %v2179_v61 = vadd.s32 16, %v2110_v19 }
 0x151   : > { %1229 = vmatpush.bf16.msra.mxu3 %v1524_v60 }
 0x152   : > { %v1448_v2 = vmul.f32 -1.442695, %v605_v1 }
 0x154   : > { %1653 = vpow2.f32 %v1448_v2  ;;  %v1647_v2 = vld [vmem:[#allocation9] ss:$0 sm:$0xff] }
 0x15a   : > { %v1654_v3 = vpop.eup %1653 }
 0x15b   : > { %v609_v4 = vadd.f32 1.0, %v1654_v3 }
 0x15d   : > { %1655 = vrcp.f32 %v609_v4  ;;  %v621_v8 = vand.u32 2147483648, %v609_v4  ;;  %v619_v10 = vand.u32 2147483647, %v609_v4  ;;  %vm615_vm13 = vweird.f32 %v609_v4 }
 0x15f   : > { %v622_v13 = vor.u32 1.1754944e-38, %v621_v8  ;;  %vm620_vm15 = vcmp.eq.f32.partialorder %v619_v10, 8.507059e+37  ;;  %v746_v10 = vld [vmem:[#allocation14 + $0x8] sm:$0xff] }
 0x163   : > { %v1656_v5 = vpop.eup %1655 }
 0x164   : > { %v611_v6 = vmul.f32 %v1656_v5, %v609_v4  ;;  %vm616_vm12 = vweird.f32 %v1656_v5 }
 0x165   : > { %vm617_vm14 = vmor %vm615_vm13, %vm616_vm12  ;;  %vm1163_vm12 = vcmask 1043456  }
 0x166   : > { %v612_v7 = vsub.f32 1.0, %v611_v6 }
 0x168   : > { %v613_v9 = vmul.f32 %v1656_v5, %v612_v7 }
 0x16a   : > { %v614_v12 = vadd.f32 %v1656_v5, %v613_v9 }
 0x16c   : > { %v618_v14 = vsel %vm617_vm14, %v1656_v5, %v614_v12  ;;  %v749_v12 = vmul.f32 1.442695, %v746_v10 }
 0x16d   : > { %v623_v15 = vsel %vm620_vm15, %v622_v13, %v618_v14 }
 0x16e   : > { %v625_v16 = vmul.f32 %v623_v15, %v605_v1 }
 0x170   : > { %627 = vst.msk [vmem:[#allocation4] sm:$0xff] %vm485_vm2, %v625_v16  ;;  %v628_v17 = vpack.c.bf16 %v625_v16, %v625_v16 }
 0x172   : > { %1465 = vmatmul.msk.bf16.vlgmr.msra.gmra.mxu1 %vm485_vm2, %v628_v17  ;;  %1482 = vmatmul.msk.bf16.vlgmr.msra.gmra.mxu2 %vm485_vm2, %v628_v17 }
 0x1ef   : > { %v677_v21 = vpop.f32.mrf.mxu1 }
 0x1f0   : > { %v678_v22 = vadd.f32 %v1646_v20, %v677_v21 }
 0x1f2   : > { %v682_v23 = vand.u32 2147483647, %v678_v22  ;;  %v681_v43 = vmax.f32 %v678_v22, 0.0 }
 0x1f4   : > { %v683_v24 = vsub.f32 0.0, %v682_v23 }
 0x1f5   : > { %v740_v25 = vpop.f32.mrf.mxu2 }
 0x1f6   : > { %v684_v26 = vmul.f32 1.442695, %v683_v24  ;;  %744 = vst.msk [vmem:[#allocation5] sm:$0xff] %vm492_vm0, %v740_v25 }
 0x1f7   : > { %v679_v27 = vpop.f32.mrf.mxu1 }
 0x1f8   : > { %1657 = vpow2.f32 %v684_v26  ;;  %v753_v26 = vld [vmem:[#allocation7] sm:$0xff] }
 0x1fd   : > { %v742_v28 = vpop.f32.mrf.mxu2  ;;  %v2119_v29 = vld [vmem:[#allocation5] sm:$0xff] }
 0x1fe   : > { %v1658_v30 = vpop.eup %1657  ;;  %v2122_v31 = vperm.slane %v2119_v29, 2  ;;  %v2125_v32 = vperm.slane %v2119_v29, 1  ;;  %v2128_v33 = vperm.slane %v2119_v29, 0  ;;  %v2152_v50 = vperm.slane %v2119_v29, 3 }
 0x1ff   : > { %v686_v34 = vadd.f32 1.0, %v1658_v30  ;;  %v689_v35 = vmul.f32 -0.5, %v1658_v30  ;;  %v692_v39 = vand.u32 2147483647, %v1658_v30  ;;  %v2155_v51 = vperm.slane %v2119_v29, 7 }
 0x200   : > { %789 = vperm.xlu0 %1624, %v2122_v31   ;;  %776 = vperm.xlu2 %1622, %v2125_v32   ;;  %v2161_v54 = vperm.slane %v2119_v29, 4  ;;  %v2167_v57 = vperm.slane %v2119_v29, 5  ;;  %v2182_v63 = vperm.slane %v2119_v29, 6 }
 0x201   : > { %1659 = vlog2.f32 %v686_v34  ;;  %763 = vperm.xlu1 %1620, %v2128_v33   ;;  %v690_v36 = vadd.f32 1.0, %v689_v35  ;;  %vm693_vm1 = vcmp.lt.f32.partialorder %v692_v39, 0.0004427343 }
 0x202   : > { %1661 = vrsqrt.f32 %v1185_v49 }
 0x203   : > { %v691_v42 = vmul.f32 %v1658_v30, %v690_v36 }
 0x207   : > { %v1660_v40 = vpop.eup %1659 }
 0x208   : > { %v688_v41 = vmul.f32 0.6931472, %v1660_v40  ;;  %1627 = vset.pattern.permute.xlu0 %v2134_v37  ;;  %1623 = vset.pattern.permute.xlu2 %v2137_v38  ;;  %v1662_v52 = vpop.eup %1661 }
 0x209   : > { %1621 = vset.pattern.permute.xlu1 %v2137_v38  ;;  %v1187_v53 = vmul.f32 %v1662_v52, %v1185_v49  ;;  %vm1193_vm4 = vweird.f32 %v1662_v52 }
 0x20a   : > { %v694_v44 = vsel %vm693_vm1, %v691_v42, %v688_v41  ;;  %vm1194_vm5 = vmor %vm1192_vm3, %vm1193_vm4 }
 0x20b   : > { %v695_v45 = vadd.f32 %v694_v44, %v681_v43  ;;  %v1188_v11 = vmul.f32 %v1662_v52, %v1187_v53 }
 0x20d   : > { %696 = vst.msk [vmem:[#allocation2] sm:$0xff] %vm485_vm2, %v695_v45  ;;  %v697_v46 = vmul.f32 %v695_v45, %v625_v16  ;;  %v1189_v55 = vmul.f32 0.5, %v1188_v11 }
 0x20f   : > { %698 = vst.msk [vmem:[#allocation3] sm:$0xff] %vm485_vm2, %v697_v46  ;;  %v1190_v56 = vsub.f32 1.5, %v1189_v55 }
 0x210   : > { %782 = vperm.xlu2 %1623, %v2125_v32   ;;  %872 = vperm.xlu0 %1627, %v2128_v33  }
 0x211   : > { %769 = vperm.xlu1 %1621, %v2128_v33   ;;  %v1191_v58 = vmul.f32 %v1662_v52, %v1190_v56 }
 0x213   : > { %v1195_v62 = vsel %vm1194_vm5, %v1662_v52, %v1191_v58 }
 0x214   : > { %v1196_v1 = vmul.f32 %v1195_v62, %v2058_v0  ;;  %v745_v0 = vld [vmem:[#allocation14] sm:$0xff] }
 0x215   : > { %v747_v5 = vmul.f32 1.442695, %v745_v0  ;;  %v2199_v7 = vld [vmem:[#allocation2] sm:$0xff] }
 0x216   : > { %v1201_v3 = vmul.f32 %v1647_v2, %v1196_v1  ;;  %v958_v9 = vperm.slane %v2199_v7, 0  ;;  %v983_v14 = vperm.slane %v2199_v7, 1  ;;  %v1008_v17 = vperm.slane %v2199_v7, 2  ;;  %v2218_v23 = vld [vmem:[#allocation3] sm:$0xff]  ;;  %v754_v1 = vld [vmem:[#allocation7 + $0x8] sm:$0xff] }
 0x217   : > { %1663 = vpow2.f32 %v747_v5  ;;  %v1033_v22 = vperm.slane %v2199_v7, 3  ;;  %v967_v30 = vperm.slane %v2218_v23, 0  ;;  %v1017_v46 = vperm.slane %v2218_v23, 2 }
 0x218   : > { %1625 = vset.pattern.permute.xlu2 %v2110_v19  ;;  %1630 = vset.pattern.permute.xlu0 %v2110_v19  ;;  %v1202_v4 = vpack.c.bf16 %v1201_v3, %v1201_v3  ;;  %1665 = vpow2.f32 %v749_v12  ;;  %v1042_v55 = vperm.slane %v2218_v23, 3  ;;  %v1067_v0 = vperm.slane %v2218_v23, 4 }
 0x219   : > { %795 = vperm.xlu1 %1621, %v2122_v31  }
 0x21a   : > { %1491 = vmatmul.msk.bf16.vlgmr.msra.gmra.mxu3 %vm492_vm0, %v1202_v4 }
 0x21d   : > { %v1664_v6 = vpop.eup %1663 }
 0x21e   : > { %v2201_v8 = vsub.f32 0.0, %v1664_v6  ;;  %v1666_v19 = vpop.eup %1665 }
 0x21f   : > { %v2220_v24 = vsub.f32 0.0, %v1666_v19 }
 0x220   : > { %802 = vperm.xlu2 %1625, %v2152_v50   ;;  %854 = vperm.xlu0 %1630, %v2155_v51   ;;  %v959_v13 = vmul.f32 %v958_v9, %v2201_v8  ;;  %v984_v16 = vmul.f32 %v983_v14, %v2201_v8  ;;  %v1009_v21 = vmul.f32 %v1008_v17, %v2201_v8 }
 0x221   : > { %808 = vperm.xlu1 %1621, %v2152_v50   ;;  %v1034_v28 = vmul.f32 %v1033_v22, %v2201_v8 }
 0x222   : > { %v961_v15 = vmul.f32 1.442695, %v959_v13  ;;  %v986_v20 = vmul.f32 1.442695, %v984_v16  ;;  %v1011_v27 = vmul.f32 1.442695, %v1009_v21 }
 0x223   : > { %v1036_v36 = vmul.f32 1.442695, %v1034_v28  ;;  %v1133_v13 = vperm.slane %v2199_v7, 7 }
 0x224   : > { %1667 = vpow2.f32 %v961_v15 }
 0x225   : > { %1669 = vpow2.f32 %v986_v20 }
 0x226   : > { %1671 = vpow2.f32 %v1011_v27  ;;  %v1092_v27 = vperm.slane %v2218_v23, 5 }
 0x227   : > { %1673 = vpow2.f32 %v1036_v36 }
 0x228   : > { %815 = vperm.xlu2 %1625, %v2161_v54   ;;  %1634 = vset.pattern.permute.xlu0 %v2134_v37 }
 0x229   : > { %821 = vperm.xlu1 %1621, %v2161_v54  }
 0x22a   : > { %v1668_v25 = vpop.eup %1667 }
 0x22b   : > { %v965_v34 = vmul.f32 %v1668_v25, %v753_v26  ;;  %v1670_v41 = vpop.eup %1669  ;;  %v1134_v25 = vmul.f32 %v1133_v13, %v2201_v8 }
 0x22c   : > { %v1672_v52 = vpop.eup %1671 }
 0x22d   : > { %v1674_v58 = vpop.eup %1673 }
 0x230   : > { %828 = vperm.xlu2 %1625, %v2167_v57   ;;  %920 = vperm.xlu0 %1634, %v2161_v54  }
 0x231   : > { %834 = vperm.xlu1 %1621, %v2167_v57  }
 0x238   : > { %841 = vperm.xlu2 %1625, %v2182_v63   ;;  %1637 = vset.pattern.permute.xlu0 %v2179_v61 }
 0x239   : > { %847 = vperm.xlu1 %1621, %v2182_v63  }
 0x240   : > { %1626 = vset.pattern.permute.xlu2 %v2179_v61  ;;  %950 = vperm.xlu0 %1637, %v2155_v51  }
 0x241   : > { %1628 = vset.pattern.permute.xlu1 %v2179_v61 }
 0x248   : > { %866 = vperm.xlu2 %1626, %v2128_v33   ;;  %1639 = vset.pattern.permute.xlu0 %v2134_v37  ;;  %v960_v33 = vmul.f32 %v958_v9, %v2220_v24 }
 0x249   : > { %878 = vperm.xlu1 %1628, %v2125_v32  }
 0x24a   : > { %v963_v42 = vmul.f32 1.442695, %v960_v33 }
 0x24c   : > { %1675 = vpow2.f32 %v963_v42 }
 0x250   : > { %1629 = vset.pattern.permute.xlu2 %v2134_v37 }
 0x251   : > { %890 = vperm.xlu1 %1628, %v2122_v31  }
 0x252   : > { %v1676_v62 = vpop.eup %1675 }
 0x253   : > { %v966_v9 = vmul.f32 %v1676_v62, %v754_v1 }
 0x258   : > { %884 = vperm.xlu2 %1629, %v2125_v32  }
 0x259   : > { %1631 = vset.pattern.permute.xlu1 %v2137_v38  ;;  %v992_v38 = vperm.slane %v2218_v23, 1 }
 0x25a   : > { %v777_v18 = vpop.permute.xlu2 %776 }
 0x25b   : > { %v993_v43 = vmul.f32 %v992_v38, %v777_v18 }
 0x260   : > { %896 = vperm.xlu2 %1629, %v2122_v31   ;;  %v1058_v31 = vperm.slane %v2199_v7, 4 }
 0x261   : > { %860 = vperm.xlu1 %1631, %v2155_v51  }
 0x262   : > { %v1059_v40 = vmul.f32 %v1058_v31, %v2201_v8 }
 0x264   : > { %v1061_v49 = vmul.f32 1.442695, %v1059_v40 }
 0x266   : > { %1677 = vpow2.f32 %v1061_v49 }
 0x268   : > { %1632 = vset.pattern.permute.xlu2 %v2179_v61 }
 0x269   : > { %1633 = vset.pattern.permute.xlu1 %v2134_v37 }
 0x26a   : > { %v2227_v29 = vpop.permute.xlu2 %782 }
 0x26c   : > { %v1678_v6 = vpop.eup %1677 }
 0x270   : > { %902 = vperm.xlu2 %1632, %v2152_v50  }
 0x271   : > { %908 = vperm.xlu1 %1633, %v2152_v50   ;;  %v1083_v50 = vperm.slane %v2199_v7, 5 }
 0x272   : > { %v790_v45 = vpop.permute.xlu0 %789 }
 0x273   : > { %v764_v32 = vpop.permute.xlu1 %763  ;;  %v1018_v53 = vmul.f32 %v1017_v46, %v790_v45  ;;  %v1084_v56 = vmul.f32 %v1083_v50, %v2201_v8  ;;  %v1142_v45 = vperm.slane %v2218_v23, 7 }
 0x274   : > { %v968_v35 = vmul.f32 %v967_v30, %v764_v32 }
 0x275   : > { %v1086_v4 = vmul.f32 1.442695, %v1084_v56 }
 0x276   : > { %v2233_v39 = vadd.f32 %v968_v35, %v965_v34  ;;  %v1136_v34 = vmul.f32 1.442695, %v1134_v25 }
 0x277   : > { %1679 = vpow2.f32 %v1086_v4 }
 0x278   : > { %v990_v44 = vmul.f32 %v1670_v41, %v2233_v39  ;;  %914 = vperm.xlu2 %1632, %v2161_v54  }
 0x279   : > { %1635 = vset.pattern.permute.xlu1 %v2179_v61  ;;  %v1108_v61 = vperm.slane %v2199_v7, 6 }
 0x27a   : > { %v2244_v47 = vadd.f32 %v993_v43, %v990_v44  ;;  %v803_v48 = vpop.permute.xlu2 %802 }
 0x27b   : > { %v1043_v60 = vmul.f32 %v1042_v55, %v803_v48  ;;  %v1109_v12 = vmul.f32 %v1108_v61, %v2201_v8  ;;  %v1117_v8 = vperm.slane %v2218_v23, 6 }
 0x27c   : > { %v1015_v11 = vmul.f32 %v1672_v52, %v2244_v47 }
 0x27d   : > { %v1111_v21 = vmul.f32 1.442695, %v1109_v12  ;;  %v1680_v33 = vpop.eup %1679  ;;  %v1060_v12 = vmul.f32 %v1058_v31, %v2220_v24 }
 0x27e   : > { %v2250_v54 = vadd.f32 %v1018_v53, %v1015_v11  ;;  %v985_v53 = vmul.f32 %v983_v14, %v2220_v24  ;;  %v1035_v14 = vmul.f32 %v1033_v22, %v2220_v24 }
 0x27f   : > { %1681 = vpow2.f32 %v1111_v21 }
 0x280   : > { %v1040_v59 = vmul.f32 %v1674_v58, %v2250_v54  ;;  %1636 = vset.pattern.permute.xlu2 %v2134_v37  ;;  %1683 = vpow2.f32 %v1136_v34  ;;  %v988_v56 = vmul.f32 1.442695, %v985_v53 }
 0x281   : > { %926 = vperm.xlu1 %1635, %v2167_v57  }
 0x282   : > { %v2262_v2 = vadd.f32 %v1043_v60, %v1040_v59  ;;  %v816_v3 = vpop.permute.xlu2 %815  ;;  %v873_v19 = vpop.permute.xlu0 %872  ;;  %1685 = vpow2.f32 %v988_v56  ;;  %v1010_v60 = vmul.f32 %v1008_v17, %v2220_v24  ;;  %v1038_v17 = vmul.f32 1.442695, %v1035_v14 }
 0x283   : > { %v770_v5 = vpop.permute.xlu1 %769  ;;  %v1068_v16 = vmul.f32 %v1067_v0, %v816_v3 }
 0x284   : > { %v969_v10 = vmul.f32 %v967_v30, %v770_v5  ;;  %v1065_v15 = vmul.f32 %v1678_v6, %v2262_v2  ;;  %v1013_v3 = vmul.f32 1.442695, %v1010_v60 }
 0x285   : > { %v1682_v36 = vpop.eup %1681 }
 0x286   : > { %v971_v18 = vadd.f32 %v969_v10, %v966_v9  ;;  %v2276_v26 = vadd.f32 %v1068_v16, %v1065_v15  ;;  %v1684_v49 = vpop.eup %1683  ;;  %1687 = vpow2.f32 %v1013_v3 }
 0x287   : > { %1689 = vpow2.f32 %v1038_v17 }
 0x288   : > { %v973_v20 = vmul.f32 %v971_v18, %v873_v19  ;;  %932 = vperm.xlu2 %1636, %v2167_v57   ;;  %v1090_v57 = vmul.f32 %v1680_v33, %v2276_v26  ;;  %v1686_v5 = vpop.eup %1685 }
 0x289   : > { %938 = vperm.xlu1 %1635, %v2182_v63   ;;  %v991_v6 = vmul.f32 %v1686_v5, %v971_v18 }
 0x28a   : > { %v829_v28 = vpop.permute.xlu2 %828  ;;  %v975_v62 = vsel %vm485_vm2, %v973_v20, 0.0  ;;  %v1063_v20 = vmul.f32 1.442695, %v1060_v12 }
 0x28b   : > { %v1093_v30 = vmul.f32 %v1092_v27, %v829_v28  ;;  %v796_v32 = vpop.permute.xlu1 %795 }
 0x28c   : > { %v1688_v10 = vpop.eup %1687  ;;  %v1019_v18 = vmul.f32 %v1017_v46, %v796_v32  ;;  %1691 = vpow2.f32 %v1063_v20 }
 0x28d   : > { %v2283_v35 = vadd.f32 %v1093_v30, %v1090_v57  ;;  %v1690_v28 = vpop.eup %1689 }
 0x28f   : > { %v1115_v41 = vmul.f32 %v1682_v36, %v2283_v35 }
 0x290   : > { %944 = vperm.xlu2 %1636, %v2182_v63  }
 0x291   : > { %1638 = vset.pattern.permute.xlu1 %v2134_v37 }
 0x292   : > { %v842_v40 = vpop.permute.xlu2 %841  ;;  %v855_v43 = vpop.permute.xlu0 %854 }
 0x293   : > { %v1118_v42 = vmul.f32 %v1117_v8, %v842_v40  ;;  %v809_v48 = vpop.permute.xlu1 %808  ;;  %v1143_v63 = vmul.f32 %v1142_v45, %v855_v43  ;;  %v1692_v43 = vpop.eup %1691 }
 0x295   : > { %v2291_v44 = vadd.f32 %v1118_v42, %v1115_v41 }
 0x297   : > { %v1140_v37 = vmul.f32 %v1684_v49, %v2291_v44 }
 0x299   : > { %956 = vperm.xlu1 %1638, %v2155_v51   ;;  %v2298_v52 = vadd.f32 %v1143_v63, %v1140_v37 }
 0x29b   : > { %1169 = vst.msk [vmem:[#allocation7] sm:$0xff] %vm485_vm2, %v2298_v52  ;;  %v822_v11 = vpop.permute.xlu1 %821 }
 0x29c   : > { %v1069_v42 = vmul.f32 %v1067_v0, %v822_v11 }
 0x29d   : > { %v2338_v63 = vpop.f32.mrf.mxu3 }
 0x2a2   : > { %v867_v58 = vpop.permute.xlu2 %866 }
 0x2a3   : > { %v972_v59 = vmul.f32 %v2233_v39, %v867_v58  ;;  %v835_v4 = vpop.permute.xlu1 %834  ;;  %v994_v39 = vmul.f32 %v992_v38, %v2227_v29  ;;  %v1085_v29 = vmul.f32 %v1083_v50, %v2220_v24  ;;  %v1044_v38 = vmul.f32 %v1042_v55, %v809_v48 }
 0x2a4   : > { %v1110_v55 = vmul.f32 %v1108_v61, %v2220_v24  ;;  %v1135_v61 = vmul.f32 %v1133_v13, %v2220_v24  ;;  %v1094_v0 = vmul.f32 %v1092_v27, %v835_v4 }
 0x2a5   : > { %v974_v51 = vsel %vm485_vm2, %v972_v59, 0.0  ;;  %v996_v9 = vadd.f32 %v994_v39, %v991_v6  ;;  %v1088_v32 = vmul.f32 1.442695, %v1085_v29  ;;  %v1233_v24 = vpop.f32.mrf.mxu3 }
 0x2a6   : > { %v976_v1 = vadd.f32 %v975_v62, %v974_v51  ;;  %v1113_v58 = vmul.f32 1.442695, %v1110_v55 }
 0x2a7   : > { %v1016_v16 = vmul.f32 %v1688_v10, %v996_v9  ;;  %1693 = vpow2.f32 %v1088_v32 }
 0x2a8   : > { %v977_v22 = vrot.slane %v976_v1, 4  ;;  %1695 = vpow2.f32 %v1113_v58 }
 0x2a9   : > { %v1021_v21 = vadd.f32 %v1019_v18, %v1016_v16 }
 0x2aa   : > { %v978_v31 = vadd.f32 %v977_v22, %v976_v1 }
 0x2ab   : > { %v848_v15 = vpop.permute.xlu1 %847  ;;  %v1041_v33 = vmul.f32 %v1690_v28, %v1021_v21 }
 0x2ac   : > { %v979_v40 = vrot.slane %v978_v31, 2  ;;  %v1119_v4 = vmul.f32 %v1117_v8, %v848_v15 }
 0x2ad   : > { %v2328_v34 = vadd.f32 %v1044_v38, %v1041_v33  ;;  %v1694_v1 = vpop.eup %1693 }
 0x2ae   : > { %v980_v37 = vadd.f32 %v979_v40, %v978_v31  ;;  %v1696_v12 = vpop.eup %1695  ;;  %v921_v31 = vpop.permute.xlu0 %920 }
 0x2b0   : > { %v981_v3 = vrot.slane %v980_v37, 1 }
 0x2b2   : > { %v885_v19 = vpop.permute.xlu2 %884  ;;  %v982_v13 = vadd.f32 %v981_v3, %v980_v37 }
 0x2b3   : > { %v998_v25 = vmul.f32 %v996_v9, %v885_v19  ;;  %v1138_v9 = vmul.f32 1.442695, %v1135_v61 }
 0x2b5   : > { %v1000_v57 = vsel %vm485_vm2, %v998_v25, 0.0  ;;  %1697 = vpow2.f32 %v1138_v9 }
 0x2ba   : > { %v897_v50 = vpop.permute.xlu2 %896 }
 0x2bb   : > { %v879_v30 = vpop.permute.xlu1 %878  ;;  %v1023_v49 = vmul.f32 %v1021_v21, %v897_v50  ;;  %v1698_v38 = vpop.eup %1697 }
 0x2bc   : > { %v997_v46 = vmul.f32 %v2244_v47, %v879_v30  ;;  %v1066_v47 = vmul.f32 %v1692_v43, %v2328_v34 }
 0x2bd   : > { %v1025_v11 = vsel %vm485_vm2, %v1023_v49, 0.0 }
 0x2be   : > { %v999_v36 = vsel %vm485_vm2, %v997_v46, 0.0  ;;  %v1071_v59 = vadd.f32 %v1069_v42, %v1066_v47 }
 0x2bf   : > { %v1001_v41 = vadd.f32 %v1000_v57, %v999_v36 }
 0x2c0   : > { %v1091_v14 = vmul.f32 %v1694_v1, %v1071_v59  ;;  %v1073_v32 = vmul.f32 %v1071_v59, %v921_v31  ;;  %v1526_v31 = vld [vmem:[%s2446_s11] sm:$0xff] }
 0x2c1   : > { %v1002_v48 = vrot.slane %v1001_v41, 4 }
 0x2c2   : > { %v1096_v7 = vadd.f32 %v1094_v0, %v1091_v14  ;;  %v1075_v36 = vsel %vm485_vm2, %v1073_v32, 0.0 }
 0x2c3   : > { %v1003_v53 = vadd.f32 %v1002_v48, %v1001_v41  ;;  %v891_v56 = vpop.permute.xlu1 %890 }
 0x2c4   : > { %v1022_v60 = vmul.f32 %v2250_v54, %v891_v56  ;;  %v1116_v19 = vmul.f32 %v1696_v12, %v1096_v7 }
 0x2c5   : > { %v1004_v51 = vrot.slane %v1003_v53, 2 }
 0x2c6   : > { %v1024_v62 = vsel %vm485_vm2, %v1022_v60, 0.0  ;;  %v1121_v22 = vadd.f32 %v1119_v4, %v1116_v19 }
 0x2c7   : > { %v1005_v5 = vadd.f32 %v1004_v51, %v1003_v53  ;;  %v1026_v6 = vadd.f32 %v1025_v11, %v1024_v62  ;;  %v1492_v62 = vmul.f32 -1.442695, %v2338_v63 }
 0x2c8   : > { %v1141_v33 = vmul.f32 %v1698_v38, %v1121_v22 }
 0x2c9   : > { %v1006_v39 = vrot.slane %v1005_v5, 1  ;;  %v1027_v54 = vrot.slane %v1026_v6, 4  ;;  %1699 = vpow2.f32 %v1492_v62 }
 0x2ca   : > { %v903_v17 = vpop.permute.xlu2 %902 }
 0x2cb   : > { %v1007_v10 = vadd.f32 %v1006_v39, %v1005_v5  ;;  %v1028_v27 = vadd.f32 %v1027_v54, %v1026_v6  ;;  %v1047_v41 = vmul.f32 %v2262_v2, %v903_v17 }
 0x2cd   : > { %v1159_v16 = vsel %vm1158_vm6, %v982_v13, %v1007_v10  ;;  %v1029_v18 = vrot.slane %v1028_v27, 2  ;;  %v1529_v10 = vld [vmem:[%s2446_s11 + $0x18] sm:$0xff] }
 0x2ce   : > { %1296 = vmatpush.bf16.msrb.mxu0 %v1529_v10 }
 0x2cf   : > { %v1030_v20 = vadd.f32 %v1029_v18, %v1028_v27  ;;  %v1700_v12 = vpop.eup %1699 }
 0x2d1   : > { %v1031_v21 = vrot.slane %v1030_v20, 1 }
 0x2d2   : > { %v915_v29 = vpop.permute.xlu2 %914 }
 0x2d3   : > { %v1032_v25 = vadd.f32 %v1031_v21, %v1030_v20  ;;  %v861_v28 = vpop.permute.xlu1 %860  ;;  %v1072_v8 = vmul.f32 %v2276_v26, %v915_v29  ;;  %v1049_v26 = vsel %vm485_vm2, %v1047_v41, 0.0  ;;  %v1527_v21 = vld [vmem:[%s2446_s11 + $0x8] sm:$0xff] }
 0x2d4   : > { %v1144_v30 = vmul.f32 %v1142_v45, %v861_v28 }
 0x2d5   : > { %v1161_v46 = vsel %vm1160_vm7, %v1159_v16, %v1032_v25  ;;  %v1074_v57 = vsel %vm485_vm2, %v1072_v8, 0.0  ;;  %v1528_v16 = vld [vmem:[%s2446_s11 + $0x10] sm:$0xff]  ;;  %v951_v25 = vpop.permute.xlu0 %950 }
 0x2d6   : > { %v2353_v15 = vadd.f32 %v1144_v30, %v1141_v33  ;;  %v1076_v40 = vadd.f32 %v1075_v36, %v1074_v57  ;;  %1297 = vmatpush.bf16.msrb.mxu0 %v1528_v16  ;;  %v1147_v33 = vmul.f32 %v2298_v52, %v951_v25 }
 0x2d8   : > { %1170 = vst.msk [vmem:[#allocation7 + $0x8] sm:$0xff] %vm485_vm2, %v2353_v15  ;;  %v1077_v50 = vrot.slane %v1076_v40, 4 }
 0x2da   : > { %v1078_v45 = vadd.f32 %v1077_v50, %v1076_v40  ;;  %1298 = vmatpush.bf16.msrb.mxu0 %v1527_v21  ;;  %v1149_v40 = vsel %vm485_vm2, %v1147_v33, 0.0 }
 0x2dc   : > { %v1079_v48 = vrot.slane %v1078_v45, 2 }
 0x2de   : > { %v1080_v37 = vadd.f32 %v1079_v48, %v1078_v45  ;;  %1299 = vmatpush.bf16.msrb.mxu0 %v1526_v31 }
 0x2e0   : > { %v1081_v59 = vrot.slane %v1080_v37, 1 }
 0x2e2   : > { %v933_v53 = vpop.permute.xlu2 %932  ;;  %v1082_v0 = vadd.f32 %v1081_v59, %v1080_v37  ;;  %v1648_v59 = vld [vmem:[%s2445_s10] ss:$0 sm:$0xff] }
 0x2e3   : > { %v909_v23 = vpop.permute.xlu1 %908  ;;  %v1098_v51 = vmul.f32 %v1096_v7, %v933_v53 }
 0x2e4   : > { %v1048_v55 = vmul.f32 %v2328_v34, %v909_v23 }
 0x2e5   : > { %v1100_v1 = vsel %vm485_vm2, %v1098_v51, 0.0 }
 0x2e6   : > { %v1050_v42 = vsel %vm485_vm2, %v1048_v55, 0.0 }
 0x2e7   : > { %v1051_v43 = vadd.f32 %v1050_v42, %v1049_v26 }
 0x2e9   : > { %v1052_v47 = vrot.slane %v1051_v43, 4 }
 0x2ea   : > { %v945_v6 = vpop.permute.xlu2 %944 }
 0x2eb   : > { %v1053_v49 = vadd.f32 %v1052_v47, %v1051_v43  ;;  %v1123_v54 = vmul.f32 %v1121_v22, %v945_v6 }
 0x2ed   : > { %v1054_v56 = vrot.slane %v1053_v49, 2 }
 0x2ef   : > { %v1055_v58 = vadd.f32 %v1054_v56, %v1053_v49 }
 0x2f1   : > { %v1056_v60 = vrot.slane %v1055_v58, 1 }
 0x2f3   : > { %v1057_v2 = vadd.f32 %v1056_v60, %v1055_v58  ;;  %v927_v61 = vpop.permute.xlu1 %926  ;;  %v1173_v60 = vld [vmem:[#allocation4] sm:$0xff] }
 0x2f4   : > { %v1097_v34 = vmul.f32 %v2283_v35, %v927_v61  ;;  %v1125_v35 = vsel %vm485_vm2, %v1123_v54, 0.0 }
 0x2f5   : > { %v1162_v11 = vsel %vm558_vm8, %v1161_v46, %v1057_v2  ;;  %v1177_v2 = vmul.f32 %v1648_v59, %v1173_v60 }
 0x2f6   : > { %v1099_v3 = vsel %vm485_vm2, %v1097_v34, 0.0  ;;  %v1164_v5 = vsel %vm1163_vm12, %v1162_v11, %v1082_v0 }
 0x2f7   : > { %v1101_v14 = vadd.f32 %v1100_v1, %v1099_v3  ;;  %v1703_v3 = vld [vmem:[%s2055_s26] sm:$0xff] }
 0x2f9   : > { %v1102_v39 = vrot.slane %v1101_v14, 4 }
 0x2fb   : > { %v1103_v9 = vadd.f32 %v1102_v39, %v1101_v14  ;;  %v939_v17 = vpop.permute.xlu1 %938 }
 0x2fc   : > { %v1122_v7 = vmul.f32 %v2291_v44, %v939_v17  ;;  %v1238_v44 = vadd.f32 1.0, %v1700_v12 }
 0x2fd   : > { %v1104_v24 = vrot.slane %v1103_v9, 2 }
 0x2fe   : > { %v1124_v13 = vsel %vm485_vm2, %v1122_v7, 0.0  ;;  %1701 = vrcp.f32 %v1238_v44  ;;  %vm1244_vm8 = vweird.f32 %v1238_v44  ;;  %v1248_v37 = vand.u32 2147483647, %v1238_v44 }
 0x2ff   : > { %v1105_v27 = vadd.f32 %v1104_v24, %v1103_v9  ;;  %v1126_v4 = vadd.f32 %v1125_v35, %v1124_v13 }
 0x300   : > { %vm1249_vm13 = vcmp.eq.f32.partialorder %v1248_v37, 8.507059e+37 }
 0x301   : > { %v1106_v18 = vrot.slane %v1105_v27, 1  ;;  %v1127_v19 = vrot.slane %v1126_v4, 4 }
 0x303   : > { %v1107_v20 = vadd.f32 %v1106_v18, %v1105_v27  ;;  %v1128_v22 = vadd.f32 %v1127_v19, %v1126_v4 }
 0x304   : > { %v1702_v57 = vpop.eup %1701 }
 0x305   : > { %v1165_v29 = vsel %vm593_vm11, %v1164_v5, %v1107_v20  ;;  %v1129_v38 = vrot.slane %v1128_v22, 2  ;;  %v1240_v23 = vmul.f32 %v1702_v57, %v1238_v44  ;;  %vm1245_vm11 = vweird.f32 %v1702_v57 }
 0x307   : > { %v1130_v28 = vadd.f32 %v1129_v38, %v1128_v22  ;;  %v1241_v26 = vsub.f32 1.0, %v1240_v23 }
 0x309   : > { %v1131_v30 = vrot.slane %v1130_v28, 1  ;;  %v1242_v52 = vmul.f32 %v1702_v57, %v1241_v26 }
 0x30b   : > { %v1132_v46 = vadd.f32 %v1131_v30, %v1130_v28  ;;  %v957_v8 = vpop.permute.xlu1 %956  ;;  %v1243_v49 = vadd.f32 %v1702_v57, %v1242_v52 }
 0x30c   : > { %v1148_v32 = vmul.f32 %v2353_v15, %v957_v8  ;;  %v1250_v15 = vand.u32 2147483648, %v1238_v44 }
 0x30d   : > { %v1166_v36 = vsel %vm581_vm10, %v1165_v29, %v1132_v46  ;;  %vm1246_vm10 = vmor %vm1244_vm8, %vm1245_vm11 }
 0x30e   : > { %v1150_v50 = vsel %vm485_vm2, %v1148_v32, 0.0  ;;  %v1251_v56 = vor.u32 1.1754944e-38, %v1250_v15  ;;  %v1247_v58 = vsel %vm1246_vm10, %v1702_v57, %v1243_v49 }
 0x30f   : > { %v1151_v41 = vadd.f32 %v1150_v50, %v1149_v40 }
 0x310   : > { %v1252_v51 = vsel %vm1249_vm13, %v1251_v56, %v1247_v58 }
 0x311   : > { %v1152_v45 = vrot.slane %v1151_v41, 4  ;;  %v1254_v0 = vmul.f32 %v1252_v51, %v2338_v63 }
 0x313   : > { %v1153_v55 = vadd.f32 %v1152_v45, %v1151_v41 }
 0x315   : > { %v1154_v42 = vrot.slane %v1153_v55, 2 }
 0x317   : > { %v1155_v43 = vadd.f32 %v1154_v42, %v1153_v55 }
 0x319   : > { %v1156_v48 = vrot.slane %v1155_v43, 1 }
 0x31b   : > { %v1157_v47 = vadd.f32 %v1156_v48, %v1155_v43 }
 0x31d   : > { %v1167_v53 = vsel %vm569_vm9, %v1166_v36, %v1157_v47 }
 0x31e   : > { %1168 = vst.msk [vmem:[#allocation6] sm:$0xff] %vm485_vm2, %v1167_v53 }
 0x325   : > { %v1171_v61 = vld [vmem:[#allocation6] sm:$0xff] }
 0x326   : > { %v1178_v34 = vadd.f32 %v1177_v2, %v1171_v61 }
 0x328   : > { %v1255_v11 = vmul.f32 %v1254_v0, %v1178_v34 }
 0x32a   : > { %v1256_v62 = vpack.c.bf16 %v1255_v11, %v1255_v11 }
 0x32c   : > { %1509 = vmatmul.msk.bf16.vlgmr.msrb.gmra.mxu0 %vm485_vm2, %v1256_v62 }
 0x3a9   : > { %v1301_v1 = vpop.f32.mrf.mxu0 }
 0x3aa   : > { %v1305_v5 = vadd.f32 %v1703_v3, %v1301_v1 }
 0x3ac   : > { %1306 = vst.msk [vmem:[%s472_s21] sm:$0xff] %vm492_vm0, %v1305_v5 }
 0x3ad   : > { %1821 = shalt.err (!%p1818_p9)
}
 0x3ae   : > { %1542 = dma.vmem_to_hbm [thread:$0]  (%p1994_p4), %s1322_s23, 128, %s1324_s25, %s1308_s29  }
 0x3b1   : > { %v1303_v63 = vpop.f32.mrf.mxu0 }
 0x3b2 PF: > { %s2473_s26 = sld [smem:[#allocation22_spill]] }
 0x3b3   : > { %s2474_s28 = sld [smem:[#allocation19_spill]] }
 0x3b8   : > { %p1564_p10 = scmp.ge.s32.totalorder %s2473_s26, 2 }
 0x3b9   : > { %s1335_s19 = sand.u32 1, %s2474_s28  }
 0x3ba   : > { %p1555_p11 = pnand %p1564_p10, %p2001_p8  ;;  %s1336_s20 = scalar_lea.sflag [#allocation11], %s1335_s19 }
 0x3bc   : > { %p1556_p12 = pneg %p1555_p11 }
 0x3be   : > { %1855 = dma.done.wait (%p1556_p12), %s1336_s20, 128  }
 0x3bf   : > { %1857 = vsyncadd (%p1556_p12), %s1336_s20, 4294967168  ;;  %s27_s26 = sadd.s32 1, %s2473_s26   ;;  %s2476_s4 = sld [smem:[#allocation20_spill]] }
 0x3c0   : > { %p24_p13 = scmp.ge.s32.totalorder %s27_s26, 4   ;;  %s2477_s23 = sld [smem:[#allocation26_spill]] }
 0x3c1   : > { %s2478_s24 = sld [smem:[#allocation21_spill]]  ;;  %s2480_s21 = smov %s1864_s22 }
 0x3c2   : > { %s2479_s25 = sld [smem:[#allocation23_spill]]  ;;  %26 = sbr.rel (!%p24_p13) target bundleno = 8 (0x8), region = 120 }
 0x3c5   : > { %s2481_s22 = smov %s2476_s4 }
 0x3c7   :  { %1342 = vsyncpa [#allocation10], 1 }
 0x3c8   :  { %1344 = vsyncpa [#allocation10 + $0x1], 1 }
 0x3c9   :  { %1345 = vsyncpa [#allocation13], 1 }
 0x3ca   :  { %1346 = vsyncpa [#allocation11], 1 }
 0x3cb   :  { %1348 = vsyncpa [#allocation11 + $0x1], 1 }

// kernel: tpu_custom_call.1
= control target key start
LH: loop header
LB: loop body
LE: loop exit
PB: predicated region body
PF: predicated region fallthrough
CT: control target
= control target key end

     0   :  { %s2435_s0 = inlined_call_operand.vmem [shape: f32[2,8,32], index: 0, kind: input, shape index: {}]   ;;  %s2436_s1 = inlined_call_operand.hbm [shape: f32[1,32], index: 1, kind: input, shape index: {}]   ;;  %s2437_s2 = inlined_call_operand.vmem [shape: bf16[32,64], index: 2, kind: input, shape index: {}]   ;;  %s2438_s3 = inlined_call_operand.vmem [shape: bf16[32,64], index: 3, kind: input, shape index: {}]   ;;  %s2439_s4 = inlined_call_operand.hbm [shape: f32[4,64], index: 4, kind: input, shape index: {}]   ;;  %s2440_s5 = inlined_call_operand.vmem [shape: f32[1,64], index: 5, kind: input, shape index: {}]   ;;  %s2441_s6 = inlined_call_operand.vmem [shape: bf16[64,64], index: 6, kind: input, shape index: {}]   ;;  %s2442_s7 = inlined_call_operand.vmem [shape: f32[1,64], index: 7, kind: input, shape index: {}]   ;;  %s2443_s8 = inlined_call_operand.vmem [shape: bf16[64,32], index: 8, kind: input, shape index: {}]   ;;  %s2444_s9 = inlined_call_operand.hbm [shape: f32[16,64], index: 9, kind: input, shape index: {}]   ;;  %s2445_s10 = inlined_call_operand.vmem [shape: f32[1,64], index: 10, kind: input, shape index: {}]   ;;  %s2446_s11 = inlined_call_operand.vmem [shape: bf16[64,32], index: 11, kind: input, shape index: {}]   ;;  %s2447_s12 = inlined_call_operand.hbm [shape: f32[2,8,32], index: 12, kind: output, shape index: {}]  }
   0x1   :  { %2457 = sst [smem:[#allocation27_spill]] %s2439_s4 }
   0x2   :  { %17 = vsyncpa [#allocation10], 0 }
   0x3   :  { %18 = vsyncpa [#allocation13], 0 }
   0x4   :  { %19 = vsyncpa [#allocation11], 0 }
   0x5   :  { %21 = vsyncpa [#allocation11 + $0x1], 0  ;;  %s1954_s21 = smov 0   ;;  %s1956_s22 = smov 0  }
   0x6   :  { %s1958_s23 = smov 0   ;;  %s1960_s24 = smov 0  }
   0x7   :  { %s1962_s25 = smov 0   ;;  %s1964_s26 = smov 0  }
   0x8 LB: > { %2458 = sst [smem:[#allocation19_spill]] %s1860_s21  ;;  %s1426_s27 = sadd.s32 4294967295, %s1880_s26   ;;  %s1880_s26 = sphi %s1964_s26, %s27_s26   ;;  %s1876_s25 = sphi %s1962_s25, %s2479_s25   ;;  %s1872_s24 = sphi %s1960_s24, %s2478_s24   ;;  %s1868_s23 = sphi %s1958_s23, %s2477_s23   ;;  %s1864_s22 = sphi %s1956_s22, %s2481_s22   ;;  %s1860_s21 = sphi %s1954_s21, %s2480_s21  }
   0x9   : > { %2459 = sst [smem:[#allocation20_spill]] %s1868_s23  ;;  %s1427_s28 = sadd.s32 4294967294, %s1880_s26  }
   0xa   : > { %2460 = sst [smem:[#allocation21_spill]] %s1876_s25  ;;  %s39_s29 = sadd.s32 1, %s1876_s25 }
   0xb   : > { %2461 = sst [smem:[#allocation22_spill]] %s1880_s26  ;;  %s307_s30 = sadd.s32 1, %s1868_s23 }
   0xc   : > { %p41_p0 = scmp.ge.s32.totalorder %s39_s29, 2  ;;  %p317_p1 = scmp.ne.s32.totalorder %s1868_s23, %s1864_s22 }
   0xd   : > { %p318_p2 = scmp.eq.s32.totalorder %s1426_s27, 1  ;;  %p323_p3 = scmp.ne.s32.totalorder %s1864_s22, %s1860_s21 }
   0xe   : > { %s2483_s29 = smov (%p41_p0, %s39_s29), 0  ;;  %p324_p5 = scmp.eq.s32.totalorder %s1427_s28, 1 }
   0xf   : > { %2462 = sst [smem:[#allocation23_spill]] %s2483_s29  ;;  %p1994_p4 = por %p318_p2, %p317_p1 }
  0x10   : > { %s302_s14 = ssub.s32 %s1876_s25, %s2483_s29  ;;  %p1428_p6 = scmp.ge.s32.totalorder %s1880_s26, 1 }
  0x11   : > { %s2463_s13 = scalar_select %p1994_p4, 1, 0 }
  0x12   : > { %p305_p7 = scmp.eq.s32.totalorder %s302_s14, 0  ;;  %p2001_p8 = por %p324_p5, %p323_p3 }
  0x13   : > { %2464 = sst [smem:[#allocation24_spill]] %s2463_s13  ;;  %p331_p9 = scmp.lt.s32.totalorder %s1880_s26, 3 }
  0x14   : > { %s2465_s15 = scalar_select %p2001_p8, 1, 0 }
  0x15   : > { %s2007_s16 = scalar_select %p305_p7, %s1868_s23, %s307_s30  }
  0x16   : > { %2466 = sst [smem:[#allocation25_spill]] %s2465_s15  ;;  %p2009_p10 = pnand %p1428_p6, %p331_p9 }
  0x17   : > { %2467 = sst [smem:[#allocation26_spill]] %s2007_s16  ;;  %p2013_p11 = scmp.eq.s32.totalorder %s1426_s27, 0 }
  0x18   : > { %s2470_s4 = sld [smem:[#allocation27_spill]]  ;;  %p1544_p12 = pneg %p2009_p10 }
  0x19   : > { %s1882_s14 = smov [#allocation12]   ;;  %s343_s19 = sshll.u32 %s2436_s1, 4  ;;  %s344_s19 = int_to_ptr.hbm [resolvable:$true] %s343_s19 }
  0x1a   : > { %s363_s30 = sshll.u32 %s1882_s14, 4  ;;  %p2024_p13 = pnand %p2013_p11, %p1544_p12  ;;  %s364_s30 = int_to_ptr.vmem [resolvable:$true] %s363_s30 }
  0x1b   : > { %s384_s14 = sshll.u32 %s2444_s9, 4  ;;  %s1883_s16 = smov [#allocation9]   ;;  %s385_s14 = int_to_ptr.hbm [resolvable:$true] %s384_s14 }
  0x1c   : > { %s345_s23 = sshll.u32 %s1883_s16, 4  ;;  %s1884_s15 = smov [#allocation14]   ;;  %s346_s23 = int_to_ptr.vmem [resolvable:$true] %s345_s23 }
  0x1d   : > { %1547 = dma.hbm_to_vmem [thread:$0]  (!%p2024_p13), %s344_s19, 16, %s346_s23, [#allocation10]  }
  0x1e   : > { %s361_s28 = sshll.u32 %s2470_s4, 4  ;;  %s386_s21 = sshll.u32 %s1884_s15, 4  ;;  %s362_s28 = int_to_ptr.hbm [resolvable:$true] %s361_s28  ;;  %s387_s21 = int_to_ptr.vmem [resolvable:$true] %s386_s21 }
  0x1f   : > { %1550 = dma.hbm_to_vmem [thread:$0]  (!%p2024_p13), %s362_s28, 64, %s364_s30, [#allocation13]  }
  0x20   : > { %s1885_s26 = smov 128   ;;  %s1886_s13 = smov 8  }
  0x21   : > { %1553 = dma.hbm_to_vmem [thread:$0]  (!%p2024_p13), %s385_s14, 256, %s387_s21, [#allocation13], %s1885_s26, %s1885_s26, %s1886_s13  }
  0x22   : > { %418 = sbr.rel (%p2009_p10) target bundleno = 946 (0x3b2), region = 68 }
  0x27   : > { %1847 = dma.done.wait (%p2013_p11), [#allocation10], 16  }
  0x28   : > { %1849 = vsyncadd (%p2013_p11), [#allocation10], 4294967280 }
  0x29   : > { %1851 = dma.done.wait (%p2013_p11), [#allocation13], 320  }
  0x2a   : > { %1853 = vsyncadd (%p2013_p11), [#allocation13], 4294966976  ;;  %p473_p0 = scmp.lt.s32.totalorder %s1872_s24, 1  ;;  %vm492_vm0 = vcmask 261120   ;;  %v1887_v3 = vmov 32.0   ;;  %v1515_v7 = vld [vmem:[%s2437_s2 + $0x8] sm:$0xff] }
  0x2b   : > { %1649 = vrcp.f32 %v1887_v3  ;;  %547 = vmatpush.bf16.msra.mxu0 %v1515_v7  ;;  %v1514_v9 = vld [vmem:[%s2437_s2] sm:$0xff]  ;;  %vm485_vm2 = vcmask 523264   ;;  %vm488_vm3 = vcmask 518144   ;;  %v1888_v12 = vmov 0.0   ;;  %v1640_v22 = vld [vmem:[#allocation9] ss:$0 sm:$0xff] }
  0x2c   : > { %s474_s4 = scalar_select %p473_p0, %s1872_s24, 1  ;;  %486 = vst.msk [vmem:[#allocation7] sm:$0xff] %vm485_vm2, %v1888_v12  ;;  %v1519_v27 = vld [vmem:[%s2441_s6 + $0x18] sm:$0xff]  ;;  %v1518_v29 = vld [vmem:[%s2441_s6 + $0x10] sm:$0xff]  ;;  %v1517_v31 = vld [vmem:[%s2441_s6 + $0x8] sm:$0xff]  ;;  %vm599_vm7 = vcmask 523269  }
  0x2d   : > { %487 = vst.msk [vmem:[#allocation7 + $0x8] sm:$0xff] %vm485_vm2, %v1888_v12  ;;  %v1523_v28 = vld [vmem:[%s2443_s8 + $0x18] sm:$0xff]  ;;  %672 = vmatpush.bf16.msra.mxu1 %v1519_v27  ;;  %v1522_v30 = vld [vmem:[%s2443_s8 + $0x10] sm:$0xff]  ;;  %v1521_v32 = vld [vmem:[%s2443_s8 + $0x8] sm:$0xff]  ;;  %vm558_vm8 = vcmask 1042432   ;;  %vm569_vm9 = vcmask 1046528  }
  0x2e   : > { %s1438_s21 = sshll.u32 %s474_s4, 3  ;;  %489 = vst.msk [vmem:[#allocation8] sm:$0x7] %vm488_vm3, %v1888_v12  ;;  %735 = vmatpush.bf16.msra.mxu2 %v1523_v28  ;;  %v1516_v33 = vld [vmem:[%s2441_s6] sm:$0xff]  ;;  %v1642_v36 = vld [vmem:[#allocation12 + $0x1] ss:$0 sm:$0xff] }
  0x2f   : > { %s2055_s26 = scalar_lea.vmem %s2435_s0, %s1438_s21  ;;  %548 = vmatpush.bf16.msra.mxu0 %v1514_v9  ;;  %v1520_v34 = vld [vmem:[%s2443_s8] sm:$0xff]  ;;  %v1641_v42 = vld [vmem:[#allocation12] ss:$0 sm:$0xff]  ;;  %vm581_vm10 = vcmask 1045504   ;;  %vm593_vm11 = vcmask 1044480   ;;  %s470_s28 = sand.u32 1, %s1864_s22  }
  0x30   : > { %v2058_v0 = vld [vmem:[%s2055_s26] sm:$0xff]  ;;  %s1511_s30 = sshll.u32 %s1872_s24, 3  ;;  %s1437_s27 = sshll.u32 %s470_s28, 3 }
  0x31   : > { %v491_v1 = vmul.f32 %v2058_v0, %v2058_v0  ;;  %v1650_v4 = vpop.eup %1649  ;;  %673 = vmatpush.bf16.msra.mxu1 %v1518_v29  ;;  %v1643_v37 = vld [vmem:[#allocation12 + $0x2] ss:$0 sm:$0xff]  ;;  %v1644_v39 = vld [vmem:[#allocation12 + $0x3] ss:$0 sm:$0xff]  ;;  %s1319_s4 = scalar_lea.hbm %s2447_s12, %s1511_s30  ;;  %s472_s21 = scalar_lea.vmem [#allocation15], %s1437_s27 }
  0x32   : > { %v497_v5 = vmul.f32 32.0, %v1650_v4  ;;  %vm501_vm1 = vweird.f32 %v1650_v4  ;;  %736 = vmatpush.bf16.msra.mxu2 %v1522_v30  ;;  %v1645_v61 = vld [vmem:[%s2440_s5] ss:$0 sm:$0xff]  ;;  %s1321_s23 = sshll.u32 %s472_s21, 4  ;;  %s1323_s25 = sshll.u32 %s1319_s4, 4  ;;  %s1322_s23 = int_to_ptr.vmem [resolvable:$true] %s1321_s23  ;;  %s1324_s25 = int_to_ptr.hbm [resolvable:$true] %s1323_s25 }
  0x33   : > { %v493_v2 = vsel %vm492_vm0, %v491_v1, 0.0  ;;  %s1308_s29 = scalar_lea.sflag [#allocation11], %s470_s28  ;;  %s1808_s13 = sshra.s32 %s1324_s25, 4  ;;  %s1809_s13 = int_to_ptr.hbm [resolvable:$true] %s1808_s13 }
  0x34   : > { %494 = vadd.xlane.f32.xlu0 %v493_v2  ;;  %v498_v6 = vsub.f32 1.0, %v497_v5  ;;  %s1810_s24 = scalar_lea.hbm %s1809_s13, 8  ;;  %s1814_s17 = scalar_lea.hbm %s2447_s12, 16 }
  0x35   : > { %674 = vmatpush.bf16.msra.mxu1 %v1517_v31  ;;  %v554_v35 = vld [vmem:[#allocation8] sm:$0x7]  ;;  %p1811_p1 = scmp.ne.s32.totalorder %s1809_s13, %s1810_s24  ;;  %p1815_p5 = scmp.lt.s32.totalorder %s1809_s13, %s2447_s12 }
  0x36   : > { %v499_v8 = vmul.f32 %v1650_v4, %v498_v6  ;;  %737 = vmatpush.bf16.msra.mxu2 %v1521_v32  ;;  %p1816_p6 = scmp.lt.s32.totalorder %s1814_s17, %s1810_s24 }
  0x37   : > { %p1812_p2 = pnand %p1811_p1, %p1994_p4 }
  0x38   : > { %v500_v10 = vadd.f32 %v1650_v4, %v499_v8  ;;  %p1817_p7 = por %p1816_p6, %p1815_p5 }
  0x39   : > { %675 = vmatpush.bf16.msra.mxu1 %v1516_v33  ;;  %p1813_p3 = pneg %p1812_p2 }
  0x3a   : > { %v2069_v11 = vsel %vm501_vm1, %v1650_v4, %v500_v10  ;;  %738 = vmatpush.bf16.msra.mxu2 %v1520_v34 }
  0x3b   : > { %p1818_p9 = pnand %p1817_p7, %p1813_p3 }
  0x3c   : > { %1182 = vadd.xlane.f32.xlu0 %v493_v2 }
  0xa7   : > { %v495_v13 = vpop.xlane.xlu0 %494 }
  0xa8   : > { %v503_v14 = vmul.f32 %v2069_v11, %v495_v13 }
  0xaa   : > { %v504_v15 = vadd.f32 1e-05, %v503_v14 }
  0xac   : > { %1651 = vrsqrt.f32 %v504_v15  ;;  %vm511_vm5 = vweird.f32 %v504_v15 }
  0xb2   : > { %v1652_v16 = vpop.eup %1651 }
  0xb3   : > { %v506_v17 = vmul.f32 %v1652_v16, %v504_v15  ;;  %vm512_vm4 = vweird.f32 %v1652_v16 }
  0xb4   : > { %vm513_vm6 = vmor %vm511_vm5, %vm512_vm4 }
  0xb5   : > { %v507_v18 = vmul.f32 %v1652_v16, %v506_v17 }
  0xb7   : > { %v508_v19 = vmul.f32 0.5, %v507_v18  ;;  %v759_v18 = vlaneseq }
  0xb9   : > { %v509_v20 = vsub.f32 1.5, %v508_v19  ;;  %v2110_v19 = vshrl.u32 %v759_v18, 7 }
  0xbb   : > { %v510_v21 = vmul.f32 %v1652_v16, %v509_v20  ;;  %1624 = vset.pattern.permute.xlu0 %v2110_v19  ;;  %1622 = vset.pattern.permute.xlu2 %v2110_v19  ;;  %v1646_v20 = vld [vmem:[%s2442_s7] ss:$0 sm:$0xff] }
  0xbc   : > { %1620 = vset.pattern.permute.xlu1 %v2110_v19 }
  0xbd   : > { %v514_v23 = vsel %vm513_vm6, %v1652_v16, %v510_v21  ;;  %vm1158_vm6 = vcmask 1040384  }
  0xbe   : > { %v515_v24 = vmul.f32 %v514_v23, %v2058_v0 }
  0xc0   : > { %v520_v25 = vmul.f32 %v1640_v22, %v515_v24 }
  0xc2   : > { %v521_v26 = vpack.c.bf16 %v520_v25, %v520_v25 }
  0xc4   : > { %1447 = vmatmul.msk.bf16.vlgmr.msra.gmra.mxu0 %vm492_vm0, %v521_v26 }
 0x141   : > { %v550_v38 = vpop.f32.mrf.mxu0 }
 0x142   : > { %v556_v40 = vrot.slane %v550_v38, 5  ;;  %600 = vst.msk [vmem:[#allocation8 - $0x5] sm:$0xe0] %vm599_vm7, %v550_v38  ;;  %v2137_v38 = vadd.s32 8, %v2110_v19  ;;  %vm1160_vm7 = vcmask 1041408  }
 0x144   : > { %v559_v41 = vsel %vm558_vm8, %v554_v35, %v556_v40  ;;  %v566_v43 = vmul.f32 %v1642_v36, %v556_v40  ;;  %v578_v44 = vmul.f32 %v1643_v37, %v556_v40  ;;  %v590_v48 = vmul.f32 %v1644_v39, %v556_v40 }
 0x145   : > { %v565_v45 = vmul.f32 %v1642_v36, %v559_v41  ;;  %v577_v46 = vmul.f32 %v1643_v37, %v559_v41  ;;  %v589_v47 = vmul.f32 %v1644_v39, %v559_v41  ;;  %v562_v53 = vmul.f32 %v1641_v42, %v559_v41 }
 0x146   : > { %v571_v49 = vrot.slane %v566_v43, 1  ;;  %v583_v52 = vrot.slane %v578_v44, 2  ;;  %v595_v56 = vrot.slane %v590_v48, 3  ;;  %v2134_v37 = vadd.s32 24, %v2110_v19 }
 0x147   : > { %v570_v50 = vrot.slane %v565_v45, 1  ;;  %v582_v51 = vrot.slane %v577_v46, 2  ;;  %v594_v55 = vrot.slane %v589_v47, 3  ;;  %v1183_v47 = vpop.xlane.xlu0 %1182 }
 0x148   : > { %v1184_v48 = vmul.f32 %v1183_v47, %v2069_v11 }
 0x149   : > { %v572_v54 = vsel %vm569_vm9, %v570_v50, %v571_v49  ;;  %v552_v57 = vpop.f32.mrf.mxu0  ;;  %v584_v59 = vsel %vm581_vm10, %v582_v51, %v583_v52  ;;  %v596_v62 = vsel %vm593_vm11, %v594_v55, %v595_v56 }
 0x14a   : > { %v574_v58 = vadd.f32 %v572_v54, %v562_v53  ;;  %v1185_v49 = vadd.f32 1e-05, %v1184_v48 }
 0x14c   : > { %v586_v60 = vadd.f32 %v584_v59, %v574_v58  ;;  %vm1192_vm3 = vweird.f32 %v1185_v49  ;;  %v1525_v59 = vld [vmem:[%s2438_s3 + $0x8] sm:$0xff] }
 0x14d   : > { %1228 = vmatpush.bf16.msra.mxu3 %v1525_v59 }
 0x14e   : > { %v598_v63 = vadd.f32 %v596_v62, %v586_v60  ;;  %v1524_v60 = vld [vmem:[%s2438_s3] sm:$0xff] }
 0x150   : > { %v605_v1 = vadd.f32 %v1645_v61, %v598_v63  ;;  %v2179_v61 = vadd.s32 16, %v2110_v19 }
 0x151   : > { %1229 = vmatpush.bf16.msra.mxu3 %v1524_v60 }
 0x152   : > { %v1448_v2 = vmul.f32 -1.442695, %v605_v1 }
 0x154   : > { %1653 = vpow2.f32 %v1448_v2  ;;  %v1647_v2 = vld [vmem:[#allocation9] ss:$0 sm:$0xff] }
 0x15a   : > { %v1654_v3 = vpop.eup %1653 }
 0x15b   : > { %v609_v4 = vadd.f32 1.0, %v1654_v3 }
 0x15d   : > { %1655 = vrcp.f32 %v609_v4  ;;  %v621_v8 = vand.u32 2147483648, %v609_v4  ;;  %v619_v10 = vand.u32 2147483647, %v609_v4  ;;  %vm615_vm13 = vweird.f32 %v609_v4 }
 0x15f   : > { %v622_v13 = vor.u32 1.1754944e-38, %v621_v8  ;;  %vm620_vm15 = vcmp.eq.f32.partialorder %v619_v10, 8.507059e+37  ;;  %v746_v10 = vld [vmem:[#allocation14 + $0x8] sm:$0xff] }
 0x163   : > { %v1656_v5 = vpop.eup %1655 }
 0x164   : > { %v611_v6 = vmul.f32 %v1656_v5, %v609_v4  ;;  %vm616_vm12 = vweird.f32 %v1656_v5 }
 0x165   : > { %vm617_vm14 = vmor %vm615_vm13, %vm616_vm12  ;;  %vm1163_vm12 = vcmask 1043456  }
 0x166   : > { %v612_v7 = vsub.f32 1.0, %v611_v6 }
 0x168   : > { %v613_v9 = vmul.f32 %v1656_v5, %v612_v7 }
 0x16a   : > { %v614_v12 = vadd.f32 %v1656_v5, %v613_v9 }
 0x16c   : > { %v618_v14 = vsel %vm617_vm14, %v1656_v5, %v614_v12  ;;  %v749_v12 = vmul.f32 1.442695, %v746_v10 }
 0x16d   : > { %v623_v15 = vsel %vm620_vm15, %v622_v13, %v618_v14 }
 0x16e   : > { %v625_v16 = vmul.f32 %v623_v15, %v605_v1 }
 0x170   : > { %627 = vst.msk [vmem:[#allocation4] sm:$0xff] %vm485_vm2, %v625_v16  ;;  %v628_v17 = vpack.c.bf16 %v625_v16, %v625_v16 }
 0x172   : > { %1465 = vmatmul.msk.bf16.vlgmr.msra.gmra.mxu1 %vm485_vm2, %v628_v17  ;;  %1482 = vmatmul.msk.bf16.vlgmr.msra.gmra.mxu2 %vm485_vm2, %v628_v17 }
 0x1ef   : > { %v677_v21 = vpop.f32.mrf.mxu1 }
 0x1f0   : > { %v678_v22 = vadd.f32 %v1646_v20, %v677_v21 }
 0x1f2   : > { %v682_v23 = vand.u32 2147483647, %v678_v22  ;;  %v681_v43 = vmax.f32 %v678_v22, 0.0 }
 0x1f4   : > { %v683_v24 = vsub.f32 0.0, %v682_v23 }
 0x1f5   : > { %v740_v25 = vpop.f32.mrf.mxu2 }
 0x1f6   : > { %v684_v26 = vmul.f32 1.442695, %v683_v24  ;;  %744 = vst.msk [vmem:[#allocation5] sm:$0xff] %vm492_vm0, %v740_v25 }
 0x1f7   : > { %v679_v27 = vpop.f32.mrf.mxu1 }
 0x1f8   : > { %1657 = vpow2.f32 %v684_v26  ;;  %v753_v26 = vld [vmem:[#allocation7] sm:$0xff] }
 0x1fd   : > { %v742_v28 = vpop.f32.mrf.mxu2  ;;  %v2119_v29 = vld [vmem:[#allocation5] sm:$0xff] }
 0x1fe   : > { %v1658_v30 = vpop.eup %1657  ;;  %v2122_v31 = vperm.slane %v2119_v29, 2  ;;  %v2125_v32 = vperm.slane %v2119_v29, 1  ;;  %v2128_v33 = vperm.slane %v2119_v29, 0  ;;  %v2152_v50 = vperm.slane %v2119_v29, 3 }
 0x1ff   : > { %v686_v34 = vadd.f32 1.0, %v1658_v30  ;;  %v689_v35 = vmul.f32 -0.5, %v1658_v30  ;;  %v692_v39 = vand.u32 2147483647, %v1658_v30  ;;  %v2155_v51 = vperm.slane %v2119_v29, 7 }
 0x200   : > { %789 = vperm.xlu0 %1624, %v2122_v31   ;;  %776 = vperm.xlu2 %1622, %v2125_v32   ;;  %v2161_v54 = vperm.slane %v2119_v29, 4  ;;  %v2167_v57 = vperm.slane %v2119_v29, 5  ;;  %v2182_v63 = vperm.slane %v2119_v29, 6 }
 0x201   : > { %1659 = vlog2.f32 %v686_v34  ;;  %763 = vperm.xlu1 %1620, %v2128_v33   ;;  %v690_v36 = vadd.f32 1.0, %v689_v35  ;;  %vm693_vm1 = vcmp.lt.f32.partialorder %v692_v39, 0.0004427343 }
 0x202   : > { %1661 = vrsqrt.f32 %v1185_v49 }
 0x203   : > { %v691_v42 = vmul.f32 %v1658_v30, %v690_v36 }
 0x207   : > { %v1660_v40 = vpop.eup %1659 }
 0x208   : > { %v688_v41 = vmul.f32 0.6931472, %v1660_v40  ;;  %1627 = vset.pattern.permute.xlu0 %v2134_v37  ;;  %1623 = vset.pattern.permute.xlu2 %v2137_v38  ;;  %v1662_v52 = vpop.eup %1661 }
 0x209   : > { %1621 = vset.pattern.permute.xlu1 %v2137_v38  ;;  %v1187_v53 = vmul.f32 %v1662_v52, %v1185_v49  ;;  %vm1193_vm4 = vweird.f32 %v1662_v52 }
 0x20a   : > { %v694_v44 = vsel %vm693_vm1, %v691_v42, %v688_v41  ;;  %vm1194_vm5 = vmor %vm1192_vm3, %vm1193_vm4 }
 0x20b   : > { %v695_v45 = vadd.f32 %v694_v44, %v681_v43  ;;  %v1188_v11 = vmul.f32 %v1662_v52, %v1187_v53 }
 0x20d   : > { %696 = vst.msk [vmem:[#allocation2] sm:$0xff] %vm485_vm2, %v695_v45  ;;  %v697_v46 = vmul.f32 %v695_v45, %v625_v16  ;;  %v1189_v55 = vmul.f32 0.5, %v1188_v11 }
 0x20f   : > { %698 = vst.msk [vmem:[#allocation3] sm:$0xff] %vm485_vm2, %v697_v46  ;;  %v1190_v56 = vsub.f32 1.5, %v1189_v55 }
 0x210   : > { %782 = vperm.xlu2 %1623, %v2125_v32   ;;  %872 = vperm.xlu0 %1627, %v2128_v33  }
 0x211   : > { %769 = vperm.xlu1 %1621, %v2128_v33   ;;  %v1191_v58 = vmul.f32 %v1662_v52, %v1190_v56 }
 0x213   : > { %v1195_v62 = vsel %vm1194_vm5, %v1662_v52, %v1191_v58 }
 0x214   : > { %v1196_v1 = vmul.f32 %v1195_v62, %v2058_v0  ;;  %v745_v0 = vld [vmem:[#allocation14] sm:$0xff] }
 0x215   : > { %v747_v5 = vmul.f32 1.442695, %v745_v0  ;;  %v2199_v7 = vld [vmem:[#allocation2] sm:$0xff] }
 0x216   : > { %v1201_v3 = vmul.f32 %v1647_v2, %v1196_v1  ;;  %v958_v9 = vperm.slane %v2199_v7, 0  ;;  %v983_v14 = vperm.slane %v2199_v7, 1  ;;  %v1008_v17 = vperm.slane %v2199_v7, 2  ;;  %v2218_v23 = vld [vmem:[#allocation3] sm:$0xff]  ;;  %v754_v1 = vld [vmem:[#allocation7 + $0x8] sm:$0xff] }
 0x217   : > { %1663 = vpow2.f32 %v747_v5  ;;  %v1033_v22 = vperm.slane %v2199_v7, 3  ;;  %v967_v30 = vperm.slane %v2218_v23, 0  ;;  %v1017_v46 = vperm.slane %v2218_v23, 2 }
 0x218   : > { %1625 = vset.pattern.permute.xlu2 %v2110_v19  ;;  %1630 = vset.pattern.permute.xlu0 %v2110_v19  ;;  %v1202_v4 = vpack.c.bf16 %v1201_v3, %v1201_v3  ;;  %1665 = vpow2.f32 %v749_v12  ;;  %v1042_v55 = vperm.slane %v2218_v23, 3  ;;  %v1067_v0 = vperm.slane %v2218_v23, 4 }
 0x219   : > { %795 = vperm.xlu1 %1621, %v2122_v31  }
 0x21a   : > { %1491 = vmatmul.msk.bf16.vlgmr.msra.gmra.mxu3 %vm492_vm0, %v1202_v4 }
 0x21d   : > { %v1664_v6 = vpop.eup %1663 }
 0x21e   : > { %v2201_v8 = vsub.f32 0.0, %v1664_v6  ;;  %v1666_v19 = vpop.eup %1665 }
 0x21f   : > { %v2220_v24 = vsub.f32 0.0, %v1666_v19 }
 0x220   : > { %802 = vperm.xlu2 %1625, %v2152_v50   ;;  %854 = vperm.xlu0 %1630, %v2155_v51   ;;  %v959_v13 = vmul.f32 %v958_v9, %v2201_v8  ;;  %v984_v16 = vmul.f32 %v983_v14, %v2201_v8  ;;  %v1009_v21 = vmul.f32 %v1008_v17, %v2201_v8 }
 0x221   : > { %808 = vperm.xlu1 %1621, %v2152_v50   ;;  %v1034_v28 = vmul.f32 %v1033_v22, %v2201_v8 }
 0x222   : > { %v961_v15 = vmul.f32 1.442695, %v959_v13  ;;  %v986_v20 = vmul.f32 1.442695, %v984_v16  ;;  %v1011_v27 = vmul.f32 1.442695, %v1009_v21 }
 0x223   : > { %v1036_v36 = vmul.f32 1.442695, %v1034_v28  ;;  %v1133_v13 = vperm.slane %v2199_v7, 7 }
 0x224   : > { %1667 = vpow2.f32 %v961_v15 }
 0x225   : > { %1669 = vpow2.f32 %v986_v20 }
 0x226   : > { %1671 = vpow2.f32 %v1011_v27  ;;  %v1092_v27 = vperm.slane %v2218_v23, 5 }
 0x227   : > { %1673 = vpow2.f32 %v1036_v36 }
 0x228   : > { %815 = vperm.xlu2 %1625, %v2161_v54   ;;  %1634 = vset.pattern.permute.xlu0 %v2134_v37 }
 0x229   : > { %821 = vperm.xlu1 %1621, %v2161_v54  }
 0x22a   : > { %v1668_v25 = vpop.eup %1667 }
 0x22b   : > { %v965_v34 = vmul.f32 %v1668_v25, %v753_v26  ;;  %v1670_v41 = vpop.eup %1669  ;;  %v1134_v25 = vmul.f32 %v1133_v13, %v2201_v8 }
 0x22c   : > { %v1672_v52 = vpop.eup %1671 }
 0x22d   : > { %v1674_v58 = vpop.eup %1673 }
 0x230   : > { %828 = vperm.xlu2 %1625, %v2167_v57   ;;  %920 = vperm.xlu0 %1634, %v2161_v54  }
 0x231   : > { %834 = vperm.xlu1 %1621, %v2167_v57  }
 0x238   : > { %841 = vperm.xlu2 %1625, %v2182_v63   ;;  %1637 = vset.pattern.permute.xlu0 %v2179_v61 }
 0x239   : > { %847 = vperm.xlu1 %1621, %v2182_v63  }
 0x240   : > { %1626 = vset.pattern.permute.xlu2 %v2179_v61  ;;  %950 = vperm.xlu0 %1637, %v2155_v51  }
 0x241   : > { %1628 = vset.pattern.permute.xlu1 %v2179_v61 }
 0x248   : > { %866 = vperm.xlu2 %1626, %v2128_v33   ;;  %1639 = vset.pattern.permute.xlu0 %v2134_v37  ;;  %v960_v33 = vmul.f32 %v958_v9, %v2220_v24 }
 0x249   : > { %878 = vperm.xlu1 %1628, %v2125_v32  }
 0x24a   : > { %v963_v42 = vmul.f32 1.442695, %v960_v33 }
 0x24c   : > { %1675 = vpow2.f32 %v963_v42 }
 0x250   : > { %1629 = vset.pattern.permute.xlu2 %v2134_v37 }
 0x251   : > { %890 = vperm.xlu1 %1628, %v2122_v31  }
 0x252   : > { %v1676_v62 = vpop.eup %1675 }
 0x253   : > { %v966_v9 = vmul.f32 %v1676_v62, %v754_v1 }
 0x258   : > { %884 = vperm.xlu2 %1629, %v2125_v32  }
 0x259   : > { %1631 = vset.pattern.permute.xlu1 %v2137_v38  ;;  %v992_v38 = vperm.slane %v2218_v23, 1 }
 0x25a   : > { %v777_v18 = vpop.permute.xlu2 %776 }
 0x25b   : > { %v993_v43 = vmul.f32 %v992_v38, %v777_v18 }
 0x260   : > { %896 = vperm.xlu2 %1629, %v2122_v31   ;;  %v1058_v31 = vperm.slane %v2199_v7, 4 }
 0x261   : > { %860 = vperm.xlu1 %1631, %v2155_v51  }
 0x262   : > { %v1059_v40 = vmul.f32 %v1058_v31, %v2201_v8 }
 0x264   : > { %v1061_v49 = vmul.f32 1.442695, %v1059_v40 }
 0x266   : > { %1677 = vpow2.f32 %v1061_v49 }
 0x268   : > { %1632 = vset.pattern.permute.xlu2 %v2179_v61 }
 0x269   : > { %1633 = vset.pattern.permute.xlu1 %v2134_v37 }
 0x26a   : > { %v2227_v29 = vpop.permute.xlu2 %782 }
 0x26c   : > { %v1678_v6 = vpop.eup %1677 }
 0x270   : > { %902 = vperm.xlu2 %1632, %v2152_v50  }
 0x271   : > { %908 = vperm.xlu1 %1633, %v2152_v50   ;;  %v1083_v50 = vperm.slane %v2199_v7, 5 }
 0x272   : > { %v790_v45 = vpop.permute.xlu0 %789 }
 0x273   : > { %v764_v32 = vpop.permute.xlu1 %763  ;;  %v1018_v53 = vmul.f32 %v1017_v46, %v790_v45  ;;  %v1084_v56 = vmul.f32 %v1083_v50, %v2201_v8  ;;  %v1142_v45 = vperm.slane %v2218_v23, 7 }
 0x274   : > { %v968_v35 = vmul.f32 %v967_v30, %v764_v32 }
 0x275   : > { %v1086_v4 = vmul.f32 1.442695, %v1084_v56 }
 0x276   : > { %v2233_v39 = vadd.f32 %v968_v35, %v965_v34  ;;  %v1136_v34 = vmul.f32 1.442695, %v1134_v25 }
 0x277   : > { %1679 = vpow2.f32 %v1086_v4 }
 0x278   : > { %v990_v44 = vmul.f32 %v1670_v41, %v2233_v39  ;;  %914 = vperm.xlu2 %1632, %v2161_v54  }
 0x279   : > { %1635 = vset.pattern.permute.xlu1 %v2179_v61  ;;  %v1108_v61 = vperm.slane %v2199_v7, 6 }
 0x27a   : > { %v2244_v47 = vadd.f32 %v993_v43, %v990_v44  ;;  %v803_v48 = vpop.permute.xlu2 %802 }
 0x27b   : > { %v1043_v60 = vmul.f32 %v1042_v55, %v803_v48  ;;  %v1109_v12 = vmul.f32 %v1108_v61, %v2201_v8  ;;  %v1117_v8 = vperm.slane %v2218_v23, 6 }
 0x27c   : > { %v1015_v11 = vmul.f32 %v1672_v52, %v2244_v47 }
 0x27d   : > { %v1111_v21 = vmul.f32 1.442695, %v1109_v12  ;;  %v1680_v33 = vpop.eup %1679  ;;  %v1060_v12 = vmul.f32 %v1058_v31, %v2220_v24 }
 0x27e   : > { %v2250_v54 = vadd.f32 %v1018_v53, %v1015_v11  ;;  %v985_v53 = vmul.f32 %v983_v14, %v2220_v24  ;;  %v1035_v14 = vmul.f32 %v1033_v22, %v2220_v24 }
 0x27f   : > { %1681 = vpow2.f32 %v1111_v21 }
 0x280   : > { %v1040_v59 = vmul.f32 %v1674_v58, %v2250_v54  ;;  %1636 = vset.pattern.permute.xlu2 %v2134_v37  ;;  %1683 = vpow2.f32 %v1136_v34  ;;  %v988_v56 = vmul.f32 1.442695, %v985_v53 }
 0x281   : > { %926 = vperm.xlu1 %1635, %v2167_v57  }
 0x282   : > { %v2262_v2 = vadd.f32 %v1043_v60, %v1040_v59  ;;  %v816_v3 = vpop.permute.xlu2 %815  ;;  %v873_v19 = vpop.permute.xlu0 %872  ;;  %1685 = vpow2.f32 %v988_v56  ;;  %v1010_v60 = vmul.f32 %v1008_v17, %v2220_v24  ;;  %v1038_v17 = vmul.f32 1.442695, %v1035_v14 }
 0x283   : > { %v770_v5 = vpop.permute.xlu1 %769  ;;  %v1068_v16 = vmul.f32 %v1067_v0, %v816_v3 }
 0x284   : > { %v969_v10 = vmul.f32 %v967_v30, %v770_v5  ;;  %v1065_v15 = vmul.f32 %v1678_v6, %v2262_v2  ;;  %v1013_v3 = vmul.f32 1.442695, %v1010_v60 }
 0x285   : > { %v1682_v36 = vpop.eup %1681 }
 0x286   : > { %v971_v18 = vadd.f32 %v969_v10, %v966_v9  ;;  %v2276_v26 = vadd.f32 %v1068_v16, %v1065_v15  ;;  %v1684_v49 = vpop.eup %1683  ;;  %1687 = vpow2.f32 %v1013_v3 }
 0x287   : > { %1689 = vpow2.f32 %v1038_v17 }
 0x288   : > { %v973_v20 = vmul.f32 %v971_v18, %v873_v19  ;;  %932 = vperm.xlu2 %1636, %v2167_v57   ;;  %v1090_v57 = vmul.f32 %v1680_v33, %v2276_v26  ;;  %v1686_v5 = vpop.eup %1685 }
 0x289   : > { %938 = vperm.xlu1 %1635, %v2182_v63   ;;  %v991_v6 = vmul.f32 %v1686_v5, %v971_v18 }
 0x28a   : > { %v829_v28 = vpop.permute.xlu2 %828  ;;  %v975_v62 = vsel %vm485_vm2, %v973_v20, 0.0  ;;  %v1063_v20 = vmul.f32 1.442695, %v1060_v12 }
 0x28b   : > { %v1093_v30 = vmul.f32 %v1092_v27, %v829_v28  ;;  %v796_v32 = vpop.permute.xlu1 %795 }
 0x28c   : > { %v1688_v10 = vpop.eup %1687  ;;  %v1019_v18 = vmul.f32 %v1017_v46, %v796_v32  ;;  %1691 = vpow2.f32 %v1063_v20 }
 0x28d   : > { %v2283_v35 = vadd.f32 %v1093_v30, %v1090_v57  ;;  %v1690_v28 = vpop.eup %1689 }
 0x28f   : > { %v1115_v41 = vmul.f32 %v1682_v36, %v2283_v35 }
 0x290   : > { %944 = vperm.xlu2 %1636, %v2182_v63  }
 0x291   : > { %1638 = vset.pattern.permute.xlu1 %v2134_v37 }
 0x292   : > { %v842_v40 = vpop.permute.xlu2 %841  ;;  %v855_v43 = vpop.permute.xlu0 %854 }
 0x293   : > { %v1118_v42 = vmul.f32 %v1117_v8, %v842_v40  ;;  %v809_v48 = vpop.permute.xlu1 %808  ;;  %v1143_v63 = vmul.f32 %v1142_v45, %v855_v43  ;;  %v1692_v43 = vpop.eup %1691 }
 0x295   : > { %v2291_v44 = vadd.f32 %v1118_v42, %v1115_v41 }
 0x297   : > { %v1140_v37 = vmul.f32 %v1684_v49, %v2291_v44 }
 0x299   : > { %956 = vperm.xlu1 %1638, %v2155_v51   ;;  %v2298_v52 = vadd.f32 %v1143_v63, %v1140_v37 }
 0x29b   : > { %1169 = vst.msk [vmem:[#allocation7] sm:$0xff] %vm485_vm2, %v2298_v52  ;;  %v822_v11 = vpop.permute.xlu1 %821 }
 0x29c   : > { %v1069_v42 = vmul.f32 %v1067_v0, %v822_v11 }
 0x29d   : > { %v2338_v63 = vpop.f32.mrf.mxu3 }
 0x2a2   : > { %v867_v58 = vpop.permute.xlu2 %866 }
 0x2a3   : > { %v972_v59 = vmul.f32 %v2233_v39, %v867_v58  ;;  %v835_v4 = vpop.permute.xlu1 %834  ;;  %v994_v39 = vmul.f32 %v992_v38, %v2227_v29  ;;  %v1085_v29 = vmul.f32 %v1083_v50, %v2220_v24  ;;  %v1044_v38 = vmul.f32 %v1042_v55, %v809_v48 }
 0x2a4   : > { %v1110_v55 = vmul.f32 %v1108_v61, %v2220_v24  ;;  %v1135_v61 = vmul.f32 %v1133_v13, %v2220_v24  ;;  %v1094_v0 = vmul.f32 %v1092_v27, %v835_v4 }
 0x2a5   : > { %v974_v51 = vsel %vm485_vm2, %v972_v59, 0.0  ;;  %v996_v9 = vadd.f32 %v994_v39, %v991_v6  ;;  %v1088_v32 = vmul.f32 1.442695, %v1085_v29  ;;  %v1233_v24 = vpop.f32.mrf.mxu3 }
 0x2a6   : > { %v976_v1 = vadd.f32 %v975_v62, %v974_v51  ;;  %v1113_v58 = vmul.f32 1.442695, %v1110_v55 }
 0x2a7   : > { %v1016_v16 = vmul.f32 %v1688_v10, %v996_v9  ;;  %1693 = vpow2.f32 %v1088_v32 }
 0x2a8   : > { %v977_v22 = vrot.slane %v976_v1, 4  ;;  %1695 = vpow2.f32 %v1113_v58 }
 0x2a9   : > { %v1021_v21 = vadd.f32 %v1019_v18, %v1016_v16 }
 0x2aa   : > { %v978_v31 = vadd.f32 %v977_v22, %v976_v1 }
 0x2ab   : > { %v848_v15 = vpop.permute.xlu1 %847  ;;  %v1041_v33 = vmul.f32 %v1690_v28, %v1021_v21 }
 0x2ac   : > { %v979_v40 = vrot.slane %v978_v31, 2  ;;  %v1119_v4 = vmul.f32 %v1117_v8, %v848_v15 }
 0x2ad   : > { %v2328_v34 = vadd.f32 %v1044_v38, %v1041_v33  ;;  %v1694_v1 = vpop.eup %1693 }
 0x2ae   : > { %v980_v37 = vadd.f32 %v979_v40, %v978_v31  ;;  %v1696_v12 = vpop.eup %1695  ;;  %v921_v31 = vpop.permute.xlu0 %920 }
 0x2b0   : > { %v981_v3 = vrot.slane %v980_v37, 1 }
 0x2b2   : > { %v885_v19 = vpop.permute.xlu2 %884  ;;  %v982_v13 = vadd.f32 %v981_v3, %v980_v37 }
 0x2b3   : > { %v998_v25 = vmul.f32 %v996_v9, %v885_v19  ;;  %v1138_v9 = vmul.f32 1.442695, %v1135_v61 }
 0x2b5   : > { %v1000_v57 = vsel %vm485_vm2, %v998_v25, 0.0  ;;  %1697 = vpow2.f32 %v1138_v9 }
 0x2ba   : > { %v897_v50 = vpop.permute.xlu2 %896 }
 0x2bb   : > { %v879_v30 = vpop.permute.xlu1 %878  ;;  %v1023_v49 = vmul.f32 %v1021_v21, %v897_v50  ;;  %v1698_v38 = vpop.eup %1697 }
 0x2bc   : > { %v997_v46 = vmul.f32 %v2244_v47, %v879_v30  ;;  %v1066_v47 = vmul.f32 %v1692_v43, %v2328_v34 }
 0x2bd   : > { %v1025_v11 = vsel %vm485_vm2, %v1023_v49, 0.0 }
 0x2be   : > { %v999_v36 = vsel %vm485_vm2, %v997_v46, 0.0  ;;  %v1071_v59 = vadd.f32 %v1069_v42, %v1066_v47 }
 0x2bf   : > { %v1001_v41 = vadd.f32 %v1000_v57, %v999_v36 }
 0x2c0   : > { %v1091_v14 = vmul.f32 %v1694_v1, %v1071_v59  ;;  %v1073_v32 = vmul.f32 %v1071_v59, %v921_v31  ;;  %v1526_v31 = vld [vmem:[%s2446_s11] sm:$0xff] }
 0x2c1   : > { %v1002_v48 = vrot.slane %v1001_v41, 4 }
 0x2c2   : > { %v1096_v7 = vadd.f32 %v1094_v0, %v1091_v14  ;;  %v1075_v36 = vsel %vm485_vm2, %v1073_v32, 0.0 }
 0x2c3   : > { %v1003_v53 = vadd.f32 %v1002_v48, %v1001_v41  ;;  %v891_v56 = vpop.permute.xlu1 %890 }
 0x2c4   : > { %v1022_v60 = vmul.f32 %v2250_v54, %v891_v56  ;;  %v1116_v19 = vmul.f32 %v1696_v12, %v1096_v7 }
 0x2c5   : > { %v1004_v51 = vrot.slane %v1003_v53, 2 }
 0x2c6   : > { %v1024_v62 = vsel %vm485_vm2, %v1022_v60, 0.0  ;;  %v1121_v22 = vadd.f32 %v1119_v4, %v1116_v19 }
 0x2c7   : > { %v1005_v5 = vadd.f32 %v1004_v51, %v1003_v53  ;;  %v1026_v6 = vadd.f32 %v1025_v11, %v1024_v62  ;;  %v1492_v62 = vmul.f32 -1.442695, %v2338_v63 }
 0x2c8   : > { %v1141_v33 = vmul.f32 %v1698_v38, %v1121_v22 }
 0x2c9   : > { %v1006_v39 = vrot.slane %v1005_v5, 1  ;;  %v1027_v54 = vrot.slane %v1026_v6, 4  ;;  %1699 = vpow2.f32 %v1492_v62 }
 0x2ca   : > { %v903_v17 = vpop.permute.xlu2 %902 }
 0x2cb   : > { %v1007_v10 = vadd.f32 %v1006_v39, %v1005_v5  ;;  %v1028_v27 = vadd.f32 %v1027_v54, %v1026_v6  ;;  %v1047_v41 = vmul.f32 %v2262_v2, %v903_v17 }
 0x2cd   : > { %v1159_v16 = vsel %vm1158_vm6, %v982_v13, %v1007_v10  ;;  %v1029_v18 = vrot.slane %v1028_v27, 2  ;;  %v1529_v10 = vld [vmem:[%s2446_s11 + $0x18] sm:$0xff] }
 0x2ce   : > { %1296 = vmatpush.bf16.msrb.mxu0 %v1529_v10 }
 0x2cf   : > { %v1030_v20 = vadd.f32 %v1029_v18, %v1028_v27  ;;  %v1700_v12 = vpop.eup %1699 }
 0x2d1   : > { %v1031_v21 = vrot.slane %v1030_v20, 1 }
 0x2d2   : > { %v915_v29 = vpop.permute.xlu2 %914 }
 0x2d3   : > { %v1032_v25 = vadd.f32 %v1031_v21, %v1030_v20  ;;  %v861_v28 = vpop.permute.xlu1 %860  ;;  %v1072_v8 = vmul.f32 %v2276_v26, %v915_v29  ;;  %v1049_v26 = vsel %vm485_vm2, %v1047_v41, 0.0  ;;  %v1527_v21 = vld [vmem:[%s2446_s11 + $0x8] sm:$0xff] }
 0x2d4   : > { %v1144_v30 = vmul.f32 %v1142_v45, %v861_v28 }
 0x2d5   : > { %v1161_v46 = vsel %vm1160_vm7, %v1159_v16, %v1032_v25  ;;  %v1074_v57 = vsel %vm485_vm2, %v1072_v8, 0.0  ;;  %v1528_v16 = vld [vmem:[%s2446_s11 + $0x10] sm:$0xff]  ;;  %v951_v25 = vpop.permute.xlu0 %950 }
 0x2d6   : > { %v2353_v15 = vadd.f32 %v1144_v30, %v1141_v33  ;;  %v1076_v40 = vadd.f32 %v1075_v36, %v1074_v57  ;;  %1297 = vmatpush.bf16.msrb.mxu0 %v1528_v16  ;;  %v1147_v33 = vmul.f32 %v2298_v52, %v951_v25 }
 0x2d8   : > { %1170 = vst.msk [vmem:[#allocation7 + $0x8] sm:$0xff] %vm485_vm2, %v2353_v15  ;;  %v1077_v50 = vrot.slane %v1076_v40, 4 }
 0x2da   : > { %v1078_v45 = vadd.f32 %v1077_v50, %v1076_v40  ;;  %1298 = vmatpush.bf16.msrb.mxu0 %v1527_v21  ;;  %v1149_v40 = vsel %vm485_vm2, %v1147_v33, 0.0 }
 0x2dc   : > { %v1079_v48 = vrot.slane %v1078_v45, 2 }
 0x2de   : > { %v1080_v37 = vadd.f32 %v1079_v48, %v1078_v45  ;;  %1299 = vmatpush.bf16.msrb.mxu0 %v1526_v31 }
 0x2e0   : > { %v1081_v59 = vrot.slane %v1080_v37, 1 }
 0x2e2   : > { %v933_v53 = vpop.permute.xlu2 %932  ;;  %v1082_v0 = vadd.f32 %v1081_v59, %v1080_v37  ;;  %v1648_v59 = vld [vmem:[%s2445_s10] ss:$0 sm:$0xff] }
 0x2e3   : > { %v909_v23 = vpop.permute.xlu1 %908  ;;  %v1098_v51 = vmul.f32 %v1096_v7, %v933_v53 }
 0x2e4   : > { %v1048_v55 = vmul.f32 %v2328_v34, %v909_v23 }
 0x2e5   : > { %v1100_v1 = vsel %vm485_vm2, %v1098_v51, 0.0 }
 0x2e6   : > { %v1050_v42 = vsel %vm485_vm2, %v1048_v55, 0.0 }
 0x2e7   : > { %v1051_v43 = vadd.f32 %v1050_v42, %v1049_v26 }
 0x2e9   : > { %v1052_v47 = vrot.slane %v1051_v43, 4 }
 0x2ea   : > { %v945_v6 = vpop.permute.xlu2 %944 }
 0x2eb   : > { %v1053_v49 = vadd.f32 %v1052_v47, %v1051_v43  ;;  %v1123_v54 = vmul.f32 %v1121_v22, %v945_v6 }
 0x2ed   : > { %v1054_v56 = vrot.slane %v1053_v49, 2 }
 0x2ef   : > { %v1055_v58 = vadd.f32 %v1054_v56, %v1053_v49 }
 0x2f1   : > { %v1056_v60 = vrot.slane %v1055_v58, 1 }
 0x2f3   : > { %v1057_v2 = vadd.f32 %v1056_v60, %v1055_v58  ;;  %v927_v61 = vpop.permute.xlu1 %926  ;;  %v1173_v60 = vld [vmem:[#allocation4] sm:$0xff] }
 0x2f4   : > { %v1097_v34 = vmul.f32 %v2283_v35, %v927_v61  ;;  %v1125_v35 = vsel %vm485_vm2, %v1123_v54, 0.0 }
 0x2f5   : > { %v1162_v11 = vsel %vm558_vm8, %v1161_v46, %v1057_v2  ;;  %v1177_v2 = vmul.f32 %v1648_v59, %v1173_v60 }
 0x2f6   : > { %v1099_v3 = vsel %vm485_vm2, %v1097_v34, 0.0  ;;  %v1164_v5 = vsel %vm1163_vm12, %v1162_v11, %v1082_v0 }
 0x2f7   : > { %v1101_v14 = vadd.f32 %v1100_v1, %v1099_v3  ;;  %v1703_v3 = vld [vmem:[%s2055_s26] sm:$0xff] }
 0x2f9   : > { %v1102_v39 = vrot.slane %v1101_v14, 4 }
 0x2fb   : > { %v1103_v9 = vadd.f32 %v1102_v39, %v1101_v14  ;;  %v939_v17 = vpop.permute.xlu1 %938 }
 0x2fc   : > { %v1122_v7 = vmul.f32 %v2291_v44, %v939_v17  ;;  %v1238_v44 = vadd.f32 1.0, %v1700_v12 }
 0x2fd   : > { %v1104_v24 = vrot.slane %v1103_v9, 2 }
 0x2fe   : > { %v1124_v13 = vsel %vm485_vm2, %v1122_v7, 0.0  ;;  %1701 = vrcp.f32 %v1238_v44  ;;  %vm1244_vm8 = vweird.f32 %v1238_v44  ;;  %v1248_v37 = vand.u32 2147483647, %v1238_v44 }
 0x2ff   : > { %v1105_v27 = vadd.f32 %v1104_v24, %v1103_v9  ;;  %v1126_v4 = vadd.f32 %v1125_v35, %v1124_v13 }
 0x300   : > { %vm1249_vm13 = vcmp.eq.f32.partialorder %v1248_v37, 8.507059e+37 }
 0x301   : > { %v1106_v18 = vrot.slane %v1105_v27, 1  ;;  %v1127_v19 = vrot.slane %v1126_v4, 4 }
 0x303   : > { %v1107_v20 = vadd.f32 %v1106_v18, %v1105_v27  ;;  %v1128_v22 = vadd.f32 %v1127_v19, %v1126_v4 }
 0x304   : > { %v1702_v57 = vpop.eup %1701 }
 0x305   : > { %v1165_v29 = vsel %vm593_vm11, %v1164_v5, %v1107_v20  ;;  %v1129_v38 = vrot.slane %v1128_v22, 2  ;;  %v1240_v23 = vmul.f32 %v1702_v57, %v1238_v44  ;;  %vm1245_vm11 = vweird.f32 %v1702_v57 }
 0x307   : > { %v1130_v28 = vadd.f32 %v1129_v38, %v1128_v22  ;;  %v1241_v26 = vsub.f32 1.0, %v1240_v23 }
 0x309   : > { %v1131_v30 = vrot.slane %v1130_v28, 1  ;;  %v1242_v52 = vmul.f32 %v1702_v57, %v1241_v26 }
 0x30b   : > { %v1132_v46 = vadd.f32 %v1131_v30, %v1130_v28  ;;  %v957_v8 = vpop.permute.xlu1 %956  ;;  %v1243_v49 = vadd.f32 %v1702_v57, %v1242_v52 }
 0x30c   : > { %v1148_v32 = vmul.f32 %v2353_v15, %v957_v8  ;;  %v1250_v15 = vand.u32 2147483648, %v1238_v44 }
 0x30d   : > { %v1166_v36 = vsel %vm581_vm10, %v1165_v29, %v1132_v46  ;;  %vm1246_vm10 = vmor %vm1244_vm8, %vm1245_vm11 }
 0x30e   : > { %v1150_v50 = vsel %vm485_vm2, %v1148_v32, 0.0  ;;  %v1251_v56 = vor.u32 1.1754944e-38, %v1250_v15  ;;  %v1247_v58 = vsel %vm1246_vm10, %v1702_v57, %v1243_v49 }
 0x30f   : > { %v1151_v41 = vadd.f32 %v1150_v50, %v1149_v40 }
 0x310   : > { %v1252_v51 = vsel %vm1249_vm13, %v1251_v56, %v1247_v58 }
 0x311   : > { %v1152_v45 = vrot.slane %v1151_v41, 4  ;;  %v1254_v0 = vmul.f32 %v1252_v51, %v2338_v63 }
 0x313   : > { %v1153_v55 = vadd.f32 %v1152_v45, %v1151_v41 }
 0x315   : > { %v1154_v42 = vrot.slane %v1153_v55, 2 }
 0x317   : > { %v1155_v43 = vadd.f32 %v1154_v42, %v1153_v55 }
 0x319   : > { %v1156_v48 = vrot.slane %v1155_v43, 1 }
 0x31b   : > { %v1157_v47 = vadd.f32 %v1156_v48, %v1155_v43 }
 0x31d   : > { %v1167_v53 = vsel %vm569_vm9, %v1166_v36, %v1157_v47 }
 0x31e   : > { %1168 = vst.msk [vmem:[#allocation6] sm:$0xff] %vm485_vm2, %v1167_v53 }
 0x325   : > { %v1171_v61 = vld [vmem:[#allocation6] sm:$0xff] }
 0x326   : > { %v1178_v34 = vadd.f32 %v1177_v2, %v1171_v61 }
 0x328   : > { %v1255_v11 = vmul.f32 %v1254_v0, %v1178_v34 }
 0x32a   : > { %v1256_v62 = vpack.c.bf16 %v1255_v11, %v1255_v11 }
 0x32c   : > { %1509 = vmatmul.msk.bf16.vlgmr.msrb.gmra.mxu0 %vm485_vm2, %v1256_v62 }
 0x3a9   : > { %v1301_v1 = vpop.f32.mrf.mxu0 }
 0x3aa   : > { %v1305_v5 = vadd.f32 %v1703_v3, %v1301_v1 }
 0x3ac   : > { %1306 = vst.msk [vmem:[%s472_s21] sm:$0xff] %vm492_vm0, %v1305_v5 }
 0x3ad   : > { %1821 = shalt.err (!%p1818_p9)
}
 0x3ae   : > { %1542 = dma.vmem_to_hbm [thread:$0]  (%p1994_p4), %s1322_s23, 128, %s1324_s25, %s1308_s29  }
 0x3b1   : > { %v1303_v63 = vpop.f32.mrf.mxu0 }
 0x3b2 PF: > { %s2473_s26 = sld [smem:[#allocation22_spill]] }
 0x3b3   : > { %s2474_s28 = sld [smem:[#allocation19_spill]] }
 0x3b8   : > { %p1564_p10 = scmp.ge.s32.totalorder %s2473_s26, 2 }
 0x3b9   : > { %s1335_s19 = sand.u32 1, %s2474_s28  }
 0x3ba   : > { %p1555_p11 = pnand %p1564_p10, %p2001_p8  ;;  %s1336_s20 = scalar_lea.sflag [#allocation11], %s1335_s19 }
 0x3bc   : > { %p1556_p12 = pneg %p1555_p11 }
 0x3be   : > { %1855 = dma.done.wait (%p1556_p12), %s1336_s20, 128  }
 0x3bf   : > { %1857 = vsyncadd (%p1556_p12), %s1336_s20, 4294967168  ;;  %s27_s26 = sadd.s32 1, %s2473_s26   ;;  %s2476_s4 = sld [smem:[#allocation20_spill]] }
 0x3c0   : > { %p24_p13 = scmp.ge.s32.totalorder %s27_s26, 4   ;;  %s2477_s23 = sld [smem:[#allocation26_spill]] }
 0x3c1   : > { %s2478_s24 = sld [smem:[#allocation21_spill]]  ;;  %s2480_s21 = smov %s1864_s22 }
 0x3c2   : > { %s2479_s25 = sld [smem:[#allocation23_spill]]  ;;  %26 = sbr.rel (!%p24_p13) target bundleno = 8 (0x8), region = 120 }
 0x3c5   : > { %s2481_s22 = smov %s2476_s4 }
 0x3c7   :  { %1342 = vsyncpa [#allocation10], 1 }
 0x3c8   :  { %1344 = vsyncpa [#allocation10 + $0x1], 1 }
 0x3c9   :  { %1345 = vsyncpa [#allocation13], 1 }
 0x3ca   :  { %1346 = vsyncpa [#allocation11], 1 }
 0x3cb   :  { %1348 = vsyncpa [#allocation11 + $0x1], 1 }

</bundles_post_ra>
